<compile_context>
chip_gen: v5e
topology: v5e:2x2
jax: 0.10.0
libtpu: 0.0.40
codegen_flags: <defaults>
</compile_context>

<pallas_src>
import math

import jax
import jax.numpy as jnp
from jax import lax
from jax.experimental import pallas as pl
from jax.experimental.pallas import tpu as pltpu


# ---------------------------------------------------------------------------
# small helpers
# ---------------------------------------------------------------------------
def _round_up(n, m):
    return ((n + m - 1) // m) * m


def _largest_divisor(n, upper):
    d = 1
    for k in range(1, min(n, upper) + 1):
        if n % k == 0:
            d = k
    return d


_VMEM_CFG = None


def _vmem_cfg():
    """Generation-aware VMEM budgets (v7x: 64 MiB/TC, v5e/v6e: 128 MiB)."""
    global _VMEM_CFG
    if _VMEM_CFG is None:
        try:
            cap = int(getattr(pltpu.get_tpu_info(), "vmem_capacity_bytes",
                              128 * 1024 * 1024))
        except Exception:
            cap = 128 * 1024 * 1024
        if cap <= 64 * 1024 * 1024:      # v7x-class: shrink everything
            _VMEM_CFG = dict(limit=40 * 1024 * 1024,
                             stream_budget=14 * 1024 * 1024,
                             row_cap=512)
        else:                            # v5e / v6e: grow projection row blocks
            _VMEM_CFG = dict(limit=64 * 1024 * 1024,
                             stream_budget=24 * 1024 * 1024,
                             row_cap=1024)
    return _VMEM_CFG


def _pick_time_chunk(T, B, HG, H, budget):
    # Double-buffered per-time-row VMEM of the streamed arrays (all f32):
    #   xp fwd lanes (HG) + xp bwd lanes (HG) + prod_fwd (H) + prod_bwd (H).
    row_bytes = 2 * 4 * B * (2 * HG + 2 * H)
    max_rows = max(1, budget // max(row_bytes, 1))
    # TODO(synk): a prime/awkward T degenerates to tc=1 (per-step grid overhead);
    # pad T (bwd-safe side) or add a bounded tail chunk if production T demands it.
    return _largest_divisor(T, min(128, max_rows))


def _pick_row_block(n_pad, cap):
    # multiple of 8 that divides n_pad, <= cap
    return 8 * _largest_divisor(n_pad // 8, max(1, cap // 8))


def _pad_rows(a, n_pad):
    n = a.shape[0]
    if n == n_pad:
        return a
    return jnp.pad(a, ((0, n_pad - n), (0, 0)))


# ---------------------------------------------------------------------------
# Kernel 1: hoisted input projection  X_proj = x @ W_ih_fused + b_fused
# ---------------------------------------------------------------------------
def _in_proj_kernel(x_ref, w_ref, b_ref, o_ref):
    o_ref[...] = (
        jnp.dot(x_ref[...].astype(jnp.bfloat16), w_ref[...],
                preferred_element_type=jnp.float32)
        + b_ref[...]
    )


def _input_projection(x2d, w_bf16, b_f32, cfg):
    N, P = x2d.shape
    G = w_bf16.shape[1]
    N_pad = _round_up(N, 8)
    x2d_p = _pad_rows(x2d, N_pad)
    bn = _pick_row_block(N_pad, cfg["row_cap"])
    out = pl.pallas_call(
        _in_proj_kernel,
        out_shape=jax.ShapeDtypeStruct((N_pad, G), jnp.float32),
        grid=(N_pad // bn,),
        in_specs=[
            pl.BlockSpec((bn, P), lambda i: (i, 0)),
            pl.BlockSpec((P, G), lambda i: (0, 0)),
            pl.BlockSpec((1, G), lambda i: (0, 0)),
        ],
        out_specs=pl.BlockSpec((bn, G), lambda i: (i, 0)),
        compiler_params=pltpu.CompilerParams(
            dimension_semantics=("parallel",),
            vmem_limit_bytes=cfg["limit"],
        ),
    )(x2d_p, w_bf16, b_f32)
    return out[:N]


# ---------------------------------------------------------------------------
# Kernel 2: fused 4-direction LSTM recurrence
#
# xpf_ref: fwd-gate lanes of X_proj, natural chunk order          (tc, B, 8H)
# xpb_ref: bwd-gate lanes of X_proj, reversed chunk order         (tc, B, 8H)
# Each half is gate-major [i|f|g|o], each gate 2H = [lstm1 | lstm2].
# Outputs (natural time order in HBM, no flips anywhere):
#   pf[t] = h_lstm1_fwd(t) * h_lstm2_fwd(t)    (T, B, H)
#   pb[t] = h_lstm1_bwd(t) * h_lstm2_bwd(t)    (T, B, H)
# ---------------------------------------------------------------------------
def _fused_lstm_kernel(xpf_ref, xpb_ref, whf_ref, whb_ref, pf_ref, pb_ref,
                       hf_sc, cf_sc, hb_sc, cb_sc):
    tc = xpf_ref.shape[0]          # time-chunk length (static)
    HG = xpf_ref.shape[-1]         # 4 gates * 2 dirs * H = 8H
    HD = HG // 4                   # fused hidden width of one half = 2H
    H = HD // 2

    @pl.when(pl.program_id(0) == 0)
    def _init():
        hf_sc[...] = jnp.zeros_like(hf_sc)
        cf_sc[...] = jnp.zeros_like(cf_sc)
        hb_sc[...] = jnp.zeros_like(hb_sc)
        cb_sc[...] = jnp.zeros_like(cb_sc)

    whf = whf_ref[...]             # (2H, 8H) bf16, loop-invariant (hoisted)
    whb = whb_ref[...]

    def step(s, carry):
        hf = hf_sc[...]
        hb = hb_sc[...]
        # Two independent chains: both bf16 MXU pushes issued back-to-back so the
        # scheduler overlaps one chain's matmul latency with the other's VPU/EUP work.
        gf = xpf_ref[s] + jnp.dot(hf.astype(jnp.bfloat16), whf,
                                  preferred_element_type=jnp.float32)
        gb = xpb_ref[tc - 1 - s] + jnp.dot(hb.astype(jnp.bfloat16), whb,
                                           preferred_element_type=jnp.float32)

        i_f = jax.nn.sigmoid(gf[:, 0 * HD:1 * HD])
        f_f = jax.nn.sigmoid(gf[:, 1 * HD:2 * HD])
        g_f = jnp.tanh(gf[:, 2 * HD:3 * HD])
        o_f = jax.nn.sigmoid(gf[:, 3 * HD:4 * HD])
        i_b = jax.nn.sigmoid(gb[:, 0 * HD:1 * HD])
        f_b = jax.nn.sigmoid(gb[:, 1 * HD:2 * HD])
        g_b = jnp.tanh(gb[:, 2 * HD:3 * HD])
        o_b = jax.nn.sigmoid(gb[:, 3 * HD:4 * HD])

        cf_new = f_f * cf_sc[...] + i_f * g_f
        hf_new = o_f * jnp.tanh(cf_new)
        cb_new = f_b * cb_sc[...] + i_b * g_b
        hb_new = o_b * jnp.tanh(cb_new)

        hf_sc[...] = hf_new
        cf_sc[...] = cf_new
        hb_sc[...] = hb_new
        cb_sc[...] = cb_new

        # directly emit the products the output projection needs
        pf_ref[s] = hf_new[:, :H] * hf_new[:, H:]
        pb_ref[tc - 1 - s] = hb_new[:, :H] * hb_new[:, H:]   # un-reverses bwd time
        return carry

    lax.fori_loop(0, tc, step, 0, unroll=min(int(tc), 8))


def _fused_bilstm(xp, whh_f_bf16, whh_b_bf16, H, cfg):
    T, B, G = xp.shape
    HG = G // 2
    tc = _pick_time_chunk(T, B, HG, H, cfg["stream_budget"])
    C = T // tc
    # TODO(synk): on v7x, split the fwd and bwd chains across the two TensorCores
    # (core-parallel leading grid axis / pl.core_map) instead of one fused body.
    pf, pb = pl.pallas_call(
        _fused_lstm_kernel,
        out_shape=(jax.ShapeDtypeStruct((T, B, H), jnp.float32),
                   jax.ShapeDtypeStruct((T, B, H), jnp.float32)),
        grid=(C,),
        in_specs=[
            # X_proj is streamed from HBM exactly once: fwd-gate lane half in
            # natural chunk order, bwd-gate lane half in reversed chunk order.
            pl.BlockSpec((tc, B, HG), lambda c: (c, 0, 0)),
            pl.BlockSpec((tc, B, HG), lambda c: (C - 1 - c, 0, 1)),
            pl.BlockSpec((2 * H, HG), lambda c: (0, 0)),   # resident W_hh fwd (bf16)
            pl.BlockSpec((2 * H, HG), lambda c: (0, 0)),   # resident W_hh bwd (bf16)
        ],
        out_specs=(
            pl.BlockSpec((tc, B, H), lambda c: (c, 0, 0)),
            pl.BlockSpec((tc, B, H), lambda c: (C - 1 - c, 0, 0)),
        ),
        scratch_shapes=[
            pltpu.VMEM((B, 2 * H), jnp.float32),   # h fwd  [lstm1 | lstm2]
            pltpu.VMEM((B, 2 * H), jnp.float32),   # c fwd
            pltpu.VMEM((B, 2 * H), jnp.float32),   # h bwd
            pltpu.VMEM((B, 2 * H), jnp.float32),   # c bwd
        ],
        compiler_params=pltpu.CompilerParams(
            dimension_semantics=("arbitrary",),
            vmem_limit_bytes=cfg["limit"],
        ),
    )(xp, xp, whh_f_bf16, whh_b_bf16)
    return pf, pb


# ---------------------------------------------------------------------------
# Kernel 3: out = concat(prod_fwd, prod_bwd, x) @ W_P^T + b_P
#   single K = (2H + P) bf16 MXU push per row block (in-kernel lane concat).
# ---------------------------------------------------------------------------
def _out_proj_kernel(pf_ref, pb_ref, x_ref, w_ref, b_ref, o_ref):
    cat = jnp.concatenate([pf_ref[...], pb_ref[...], x_ref[...]],
                          axis=-1).astype(jnp.bfloat16)
    o_ref[...] = (
        jnp.dot(cat, w_ref[...], preferred_element_type=jnp.float32) + b_ref[...]
    )


def _output_projection(pf2d, pb2d, x2d, w_bf16, b_f32, cfg):
    N, P = x2d.shape
    H = pf2d.shape[-1]
    KW = w_bf16.shape[0]
    N_pad = _round_up(N, 8)
    pf2d = _pad_rows(pf2d, N_pad)
    pb2d = _pad_rows(pb2d, N_pad)
    x2d_p = _pad_rows(x2d, N_pad)
    bn = _pick_row_block(N_pad, cfg["row_cap"])
    out = pl.pallas_call(
        _out_proj_kernel,
        out_shape=jax.ShapeDtypeStruct((N_pad, P), jnp.float32),
        grid=(N_pad // bn,),
        in_specs=[
            pl.BlockSpec((bn, H), lambda i: (i, 0)),
            pl.BlockSpec((bn, H), lambda i: (i, 0)),
            pl.BlockSpec((bn, P), lambda i: (i, 0)),
            pl.BlockSpec((KW, P), lambda i: (0, 0)),
            pl.BlockSpec((1, P), lambda i: (0, 0)),
        ],
        out_specs=pl.BlockSpec((bn, P), lambda i: (i, 0)),
        compiler_params=pltpu.CompilerParams(
            dimension_semantics=("parallel",),
            vmem_limit_bytes=cfg["limit"],
        ),
    )(pf2d, pb2d, x2d_p, w_bf16, b_f32)
    return out[:N]


# ---------------------------------------------------------------------------
# Top-level forward
# ---------------------------------------------------------------------------
def base_rnn_block(x, params):
    """Forward pass of BaseRNNBlock. x: (B, T, Parameter) float32 -> same shape."""
    B, T, P = x.shape
    H = params["H"]
    cfg = _vmem_cfg()
    x_tbp = jnp.transpose(x, (1, 0, 2))            # time-major
    x2d = x_tbp.reshape(T * B, P)

    # 1) hoisted input GEMM for all 4 LSTM directions
    # TODO(synk): X_proj could be stored in bf16 to halve its HBM traffic, at the
    # cost of a looser numerical tolerance.
    xp2d = _input_projection(x2d, params["wih_fused_bf16"], params["b_fused"], cfg)
    xp = xp2d.reshape(T, B, -1)

    # 2) fused 4-direction LSTM recurrence -> per-time products h1f*h2f, h1b*h2b
    pf, pb = _fused_bilstm(xp, params["whh_fwd_bf16"], params["whh_bwd_bf16"], H, cfg)

    # 3) fused concat + linear projection
    out2d = _output_projection(pf.reshape(T * B, H), pb.reshape(T * B, H),
                               x2d, params["wp_fused_bf16"], params["P_b"], cfg)
    return jnp.transpose(out2d.reshape(T, B, P), (1, 0, 2))


# ---------------------------------------------------------------------------
# Parameters: raw per-direction weights (PyTorch-like) + fused kernel layout
# ---------------------------------------------------------------------------
def init_params(key, P, H):
    s_lstm = 1.0 / math.sqrt(H)
    s_lin = 1.0 / math.sqrt(2 * H + P)

    def u(k, shape, s):
        return jax.random.uniform(k, shape, jnp.float32, minval=-s, maxval=s)

    keys = iter(jax.random.split(key, 32))

    def lstm_dir():
        return dict(
            wih=u(next(keys), (P, 4 * H), s_lstm),                              # W_ih^T
            whh=u(next(keys), (H, 4 * H), s_lstm),                              # W_hh^T
            b=u(next(keys), (1, 4 * H), s_lstm) + u(next(keys), (1, 4 * H), s_lstm),
        )

    return dict(
        lstm1=dict(fwd=lstm_dir(), bwd=lstm_dir()),
        lstm2=dict(fwd=lstm_dir(), bwd=lstm_dir()),
        P_w=u(next(keys), (2 * H + P, P), s_lin),   # W_P^T (rows: fwd-prod, bwd-prod, x)
        P_b=u(next(keys), (1, P), s_lin),
    )


def fuse_params(raw, P, H):
    """Build the fused [fwd-half | bwd-half], gate-major kernel weights."""
    fdirs = [raw["lstm1"]["fwd"], raw["lstm2"]["fwd"]]
    bdirs = [raw["lstm1"]["bwd"], raw["lstm2"]["bwd"]]

    def pack_half(dirs):
        D = len(dirs)                      # 2 (lstm1, lstm2)
        HG = 4 * D * H
        wih = jnp.zeros((P, HG), jnp.float32)
        b = jnp.zeros((1, HG), jnp.float32)
        whh = jnp.zeros((D * H, HG), jnp.float32)   # block-diagonal per lstm
        for d, p in enumerate(dirs):
            for g in range(4):
                col = slice(g * D * H + d * H, g * D * H + (d + 1) * H)
                wih = wih.at[:, col].set(p["wih"][:, g * H:(g + 1) * H])
                b = b.at[:, col].set(p["b"][:, g * H:(g + 1) * H])
                whh = whh.at[d * H:(d + 1) * H, col].set(p["whh"][:, g * H:(g + 1) * H])
        return wih, b, whh

    wih_f, b_f, whh_f = pack_half(fdirs)
    wih_b, b_b, whh_b = pack_half(bdirs)
    return dict(
        H=H,
        wih_fused_bf16=jnp.concatenate([wih_f, wih_b], axis=1).astype(jnp.bfloat16),
        b_fused=jnp.concatenate([b_f, b_b], axis=1),
        whh_fwd_bf16=whh_f.astype(jnp.bfloat16),    # bf16 W_hh: one MXU pass / step
        whh_bwd_bf16=whh_b.astype(jnp.bfloat16),
        wp_fused_bf16=raw["P_w"].astype(jnp.bfloat16),
        P_b=raw["P_b"],
    )


# ---------------------------------------------------------------------------
# Pure-JAX f32 reference (PyTorch semantics) for the numerical check
# ---------------------------------------------------------------------------
def _lstm_dir_ref(x_tbp, p):
    H = p["whh"].shape[0]
    B = x_tbp.shape[1]

    def step(carry, x_t):
        h, c = carry
        g = x_t @ p["wih"] + h @ p["whh"] + p["b"]
        i = jax.nn.sigmoid(g[:, :H])
        f = jax.nn.sigmoid(g[:, H:2 * H])
        gg = jnp.tanh(g[:, 2 * H:3 * H])
        o = jax.nn.sigmoid(g[:, 3 * H:])
        c = f * c + i * gg
        h = o * jnp.tanh(c)
        return (h, c), h

    _, hs = lax.scan(step, (jnp.zeros((B, H)), jnp.zeros((B, H))), x_tbp)
    return hs


def _bilstm_ref(x_btp, p):
    x_tbp = jnp.transpose(x_btp, (1, 0, 2))
    h_f = _lstm_dir_ref(x_tbp, p["fwd"])
    h_b = jnp.flip(_lstm_dir_ref(jnp.flip(x_tbp, 0), p["bwd"]), 0)
    return jnp.transpose(jnp.concatenate([h_f, h_b], -1), (1, 0, 2))


def base_rnn_block_ref(x, raw):
    o1 = _bilstm_ref(x, raw["lstm1"])
    o2 = _bilstm_ref(x, raw["lstm2"])
    cat = jnp.concatenate([o1 * o2, x], axis=-1)
    return cat @ raw["P_w"] + raw["P_b"]


# ---------------------------------------------------------------------------
if __name__ == "__main__":
    B, T, PARAM, HID = 2, 8, 32, 32   # small shapes: batch=2, seq=8, feature/hidden=32

    key = jax.random.PRNGKey(0)
    kx, kp = jax.random.split(key)
    x = jax.random.normal(kx, (B, T, PARAM), dtype=jnp.float32)
    raw = init_params(kp, PARAM, HID)
    params = fuse_params(raw, PARAM, HID)

    fwd = jax.jit(lambda xx: base_rnn_block(xx, params))
    out = jax.block_until_ready(fwd(x))

    ref = base_rnn_block_ref(x, raw)
    assert out.shape == (B, T, PARAM)
    assert bool(jnp.all(jnp.isfinite(out)))
    max_err = float(jnp.max(jnp.abs(out - ref)))
    # bf16 MXU inputs on all three matmuls (input GEMM, recurrent W_hh, output
    # projection) -> slightly looser tolerance vs the f32 reference.
    assert bool(jnp.allclose(out, ref, atol=5e-2, rtol=5e-2)), \
        f"mismatch vs reference (max|d|={max_err})"

    print("KERNEL_OK")
</pallas_src>

<mosaic_0001>
module attributes {stable_mosaic.version = 11 : i64} {
  func.func @_in_proj_kernel(%arg0: i32, %arg1: memref<16x32xf32, #tpu.memory_space<vmem>>, %arg2: memref<32x512xbf16, #tpu.memory_space<vmem>>, %arg3: memref<1x512xf32, #tpu.memory_space<vmem>>, %arg4: memref<16x512xf32, #tpu.memory_space<vmem>>) attributes {dimension_semantics = [#tpu.dimension_semantics<parallel>], iteration_bounds = array<i64: 1>, scalar_prefetch = 0 : i64, scratch_operands = 0 : i64, tpu.core_type = #tpu.core_type<tc>, window_params = [{transform_indices = @transform_0, window_bounds = array<i64: 16, 32>}, {pipeline_mode = #tpu.pipeline_mode<synchronous>, transform_indices = @transform_1, window_bounds = array<i64: 32, 512>}, {pipeline_mode = #tpu.pipeline_mode<synchronous>, transform_indices = @transform_2, window_bounds = array<i64: 1, 512>}, {transform_indices = @transform_3, window_bounds = array<i64: 16, 512>}]} {
    %c0 = arith.constant 0 : index
    %c0_0 = arith.constant 0 : index
    %0 = vector.load %arg1[%c0, %c0_0] : memref<16x32xf32, #tpu.memory_space<vmem>>, vector<16x32xf32>
    %1 = arith.truncf %0 : vector<16x32xf32> to vector<16x32xbf16>
    %c0_1 = arith.constant 0 : index
    %c0_2 = arith.constant 0 : index
    %2 = vector.load %arg2[%c0_1, %c0_2] : memref<32x512xbf16, #tpu.memory_space<vmem>>, vector<32x512xbf16>
    %cst = arith.constant dense<0.000000e+00> : vector<16x512xf32>
    %3 = tpu.matmul %1, %2, %cst {dimension_numbers = #tpu.dot_dimension_numbers<[1], [0], [0], [1], [0, 0, 1, 1], [], []>} : vector<16x32xbf16>, vector<32x512xbf16>, vector<16x512xf32> -> vector<16x512xf32>
    %c0_3 = arith.constant 0 : index
    %c0_4 = arith.constant 0 : index
    %4 = vector.load %arg3[%c0_3, %c0_4] : memref<1x512xf32, #tpu.memory_space<vmem>>, vector<1x512xf32>
    %5 = vector.broadcast %4 : vector<1x512xf32> to vector<16x512xf32>
    %6 = arith.addf %3, %5 : vector<16x512xf32>
    %c0_5 = arith.constant 0 : index
    %c0_6 = arith.constant 0 : index
    %7 = vector.load %arg4[%c0_5, %c0_6] : memref<16x512xf32, #tpu.memory_space<vmem>>, vector<16x512xf32>
    tpu.vector_store %arg4[%c0_5, %c0_6], %6 {strides = array<i32>} : memref<16x512xf32, #tpu.memory_space<vmem>>, vector<16x512xf32>,
    return
  }
  func.func @transform_0(%arg0: i32) -> (i32, i32) {
    %c0_i32 = arith.constant 0 : i32
    %c0_i32_0 = arith.constant 0 : i32
    return %arg0, %c0_i32 : i32, i32
  }
  func.func @transform_1(%arg0: i32) -> (i32, i32) {
    %c0_i32 = arith.constant 0 : i32
    %c0_i32_0 = arith.constant 0 : i32
    %c0_i32_1 = arith.constant 0 : i32
    return %c0_i32, %c0_i32_0 : i32, i32
  }
  func.func @transform_2(%arg0: i32) -> (i32, i32) {
    %c0_i32 = arith.constant 0 : i32
    %c0_i32_0 = arith.constant 0 : i32
    %c0_i32_1 = arith.constant 0 : i32
    return %c0_i32, %c0_i32_0 : i32, i32
  }
  func.func @transform_3(%arg0: i32) -> (i32, i32) {
    %c0_i32 = arith.constant 0 : i32
    %c0_i32_0 = arith.constant 0 : i32
    return %arg0, %c0_i32 : i32, i32
  }
}

module attributes {stable_mosaic.version = 11 : i64} {
  func.func @_fused_lstm_kernel(%arg0: i32, %arg1: memref<8x2x256xf32, #tpu.memory_space<vmem>>, %arg2: memref<8x2x256xf32, #tpu.memory_space<vmem>>, %arg3: memref<64x256xbf16, #tpu.memory_space<vmem>>, %arg4: memref<64x256xbf16, #tpu.memory_space<vmem>>, %arg5: memref<8x2x32xf32, #tpu.memory_space<vmem>>, %arg6: memref<8x2x32xf32, #tpu.memory_space<vmem>>, %arg7: memref<2x64xf32, #tpu.memory_space<vmem>>, %arg8: memref<2x64xf32, #tpu.memory_space<vmem>>, %arg9: memref<2x64xf32, #tpu.memory_space<vmem>>, %arg10: memref<2x64xf32, #tpu.memory_space<vmem>>) attributes {dimension_semantics = [#tpu.dimension_semantics<arbitrary>], iteration_bounds = array<i64: 1>, scalar_prefetch = 0 : i64, scratch_operands = 4 : i64, tpu.core_type = #tpu.core_type<tc>, window_params = [{transform_indices = @transform_0, window_bounds = array<i64: 8, 2, 256>}, {transform_indices = @transform_1, window_bounds = array<i64: 8, 2, 256>}, {pipeline_mode = #tpu.pipeline_mode<synchronous>, transform_indices = @transform_2, window_bounds = array<i64: 64, 256>}, {pipeline_mode = #tpu.pipeline_mode<synchronous>, transform_indices = @transform_3, window_bounds = array<i64: 64, 256>}, {transform_indices = @transform_4, window_bounds = array<i64: 8, 2, 32>}, {transform_indices = @transform_5, window_bounds = array<i64: 8, 2, 32>}]} {
    %c0_i32 = arith.constant 0 : i32
    %0 = arith.cmpi eq, %arg0, %c0_i32 : i32
    %1 = arith.extui %0 : i1 to i32
    %c0_i32_0 = arith.constant 0 : i32
    %2 = arith.cmpi ne, %1, %c0_i32_0 : i32
    scf.if %2 {
      %cst_276 = arith.constant 0.000000e+00 : f32
      %693 = vector.broadcast %cst_276 : f32 to vector<2x64xf32>
      %c0_277 = arith.constant 0 : index
      %c0_278 = arith.constant 0 : index
      %694 = vector.load %arg7[%c0_277, %c0_278] : memref<2x64xf32, #tpu.memory_space<vmem>>, vector<2x64xf32>
      tpu.vector_store %arg7[%c0_277, %c0_278], %693 {strides = array<i32>} : memref<2x64xf32, #tpu.memory_space<vmem>>, vector<2x64xf32>,
      %cst_279 = arith.constant 0.000000e+00 : f32
      %695 = vector.broadcast %cst_279 : f32 to vector<2x64xf32>
      %c0_280 = arith.constant 0 : index
      %c0_281 = arith.constant 0 : index
      %696 = vector.load %arg8[%c0_280, %c0_281] : memref<2x64xf32, #tpu.memory_space<vmem>>, vector<2x64xf32>
      tpu.vector_store %arg8[%c0_280, %c0_281], %695 {strides = array<i32>} : memref<2x64xf32, #tpu.memory_space<vmem>>, vector<2x64xf32>,
      %cst_282 = arith.constant 0.000000e+00 : f32
      %697 = vector.broadcast %cst_282 : f32 to vector<2x64xf32>
      %c0_283 = arith.constant 0 : index
      %c0_284 = arith.constant 0 : index
      %698 = vector.load %arg9[%c0_283, %c0_284] : memref<2x64xf32, #tpu.memory_space<vmem>>, vector<2x64xf32>
      tpu.vector_store %arg9[%c0_283, %c0_284], %697 {strides = array<i32>} : memref<2x64xf32, #tpu.memory_space<vmem>>, vector<2x64xf32>,
      %cst_285 = arith.constant 0.000000e+00 : f32
      %699 = vector.broadcast %cst_285 : f32 to vector<2x64xf32>
      %c0_286 = arith.constant 0 : index
      %c0_287 = arith.constant 0 : index
      %700 = vector.load %arg10[%c0_286, %c0_287] : memref<2x64xf32, #tpu.memory_space<vmem>>, vector<2x64xf32>
      tpu.vector_store %arg10[%c0_286, %c0_287], %699 {strides = array<i32>} : memref<2x64xf32, #tpu.memory_space<vmem>>, vector<2x64xf32>,
    } else {
    }
    %c0 = arith.constant 0 : index
    %c0_1 = arith.constant 0 : index
    %3 = vector.load %arg3[%c0, %c0_1] : memref<64x256xbf16, #tpu.memory_space<vmem>>, vector<64x256xbf16>
    %c0_2 = arith.constant 0 : index
    %c0_3 = arith.constant 0 : index
    %4 = vector.load %arg4[%c0_2, %c0_3] : memref<64x256xbf16, #tpu.memory_space<vmem>>, vector<64x256xbf16>
    %c0_i32_4 = arith.constant 0 : i32
    %c0_5 = arith.constant 0 : index
    %c0_6 = arith.constant 0 : index
    %5 = vector.load %arg7[%c0_5, %c0_6] : memref<2x64xf32, #tpu.memory_space<vmem>>, vector<2x64xf32>
    %c0_7 = arith.constant 0 : index
    %c0_8 = arith.constant 0 : index
    %6 = vector.load %arg9[%c0_7, %c0_8] : memref<2x64xf32, #tpu.memory_space<vmem>>, vector<2x64xf32>
    %7 = arith.index_cast %c0_i32_4 : i32 to index
    %c0_9 = arith.constant 0 : index
    %c0_10 = arith.constant 0 : index
    %8 = vector.load %arg1[%7, %c0_9, %c0_10] : memref<8x2x256xf32, #tpu.memory_space<vmem>>, vector<1x2x256xf32>
    %9 = vector.shape_cast %8 : vector<1x2x256xf32> to vector<2x256xf32>
    %10 = arith.truncf %5 : vector<2x64xf32> to vector<2x64xbf16>
    %cst = arith.constant dense<0.000000e+00> : vector<2x256xf32>
    %11 = tpu.matmul %10, %3, %cst {dimension_numbers = #tpu.dot_dimension_numbers<[1], [0], [0], [1], [0, 0, 1, 1], [], []>} : vector<2x64xbf16>, vector<64x256xbf16>, vector<2x256xf32> -> vector<2x256xf32>
    %12 = arith.addf %9, %11 : vector<2x256xf32>
    %c7_i32 = arith.constant 7 : i32
    %13 = arith.subi %c7_i32, %c0_i32_4 : i32
    %14 = arith.index_cast %13 : i32 to index
    %c0_11 = arith.constant 0 : index
    %c0_12 = arith.constant 0 : index
    %15 = vector.load %arg2[%14, %c0_11, %c0_12] : memref<8x2x256xf32, #tpu.memory_space<vmem>>, vector<1x2x256xf32>
    %16 = vector.shape_cast %15 : vector<1x2x256xf32> to vector<2x256xf32>
    %17 = arith.truncf %6 : vector<2x64xf32> to vector<2x64xbf16>
    %cst_13 = arith.constant dense<0.000000e+00> : vector<2x256xf32>
    %18 = tpu.matmul %17, %4, %cst_13 {dimension_numbers = #tpu.dot_dimension_numbers<[1], [0], [0], [1], [0, 0, 1, 1], [], []>} : vector<2x64xbf16>, vector<64x256xbf16>, vector<2x256xf32> -> vector<2x256xf32>
    %19 = arith.addf %16, %18 : vector<2x256xf32>
    %20 = vector.extract_strided_slice %12 {offsets = [0, 0], sizes = [2, 64], strides = [1, 1]} : vector<2x256xf32> to vector<2x64xf32>
    %21 = arith.negf %20 : vector<2x64xf32>
    %22 = math.exp %21 : vector<2x64xf32>
    %cst_14 = arith.constant 1.000000e+00 : f32
    %23 = vector.broadcast %cst_14 : f32 to vector<2x64xf32>
    %24 = arith.addf %23, %22 : vector<2x64xf32>
    %25 = arith.divf %23, %24 : vector<2x64xf32>
    %26 = vector.extract_strided_slice %12 {offsets = [0, 64], sizes = [2, 64], strides = [1, 1]} : vector<2x256xf32> to vector<2x64xf32>
    %27 = arith.negf %26 : vector<2x64xf32>
    %28 = math.exp %27 : vector<2x64xf32>
    %cst_15 = arith.constant 1.000000e+00 : f32
    %29 = vector.broadcast %cst_15 : f32 to vector<2x64xf32>
    %30 = arith.addf %29, %28 : vector<2x64xf32>
    %31 = arith.divf %29, %30 : vector<2x64xf32>
    %32 = vector.extract_strided_slice %12 {offsets = [0, 128], sizes = [2, 64], strides = [1, 1]} : vector<2x256xf32> to vector<2x64xf32>
    %33 = math.tanh %32 : vector<2x64xf32>
    %34 = vector.extract_strided_slice %12 {offsets = [0, 192], sizes = [2, 64], strides = [1, 1]} : vector<2x256xf32> to vector<2x64xf32>
    %35 = arith.negf %34 : vector<2x64xf32>
    %36 = math.exp %35 : vector<2x64xf32>
    %cst_16 = arith.constant 1.000000e+00 : f32
    %37 = vector.broadcast %cst_16 : f32 to vector<2x64xf32>
    %38 = arith.addf %37, %36 : vector<2x64xf32>
    %39 = arith.divf %37, %38 : vector<2x64xf32>
    %40 = vector.extract_strided_slice %19 {offsets = [0, 0], sizes = [2, 64], strides = [1, 1]} : vector<2x256xf32> to vector<2x64xf32>
    %41 = arith.negf %40 : vector<2x64xf32>
    %42 = math.exp %41 : vector<2x64xf32>
    %cst_17 = arith.constant 1.000000e+00 : f32
    %43 = vector.broadcast %cst_17 : f32 to vector<2x64xf32>
    %44 = arith.addf %43, %42 : vector<2x64xf32>
    %45 = arith.divf %43, %44 : vector<2x64xf32>
    %46 = vector.extract_strided_slice %19 {offsets = [0, 64], sizes = [2, 64], strides = [1, 1]} : vector<2x256xf32> to vector<2x64xf32>
    %47 = arith.negf %46 : vector<2x64xf32>
    %48 = math.exp %47 : vector<2x64xf32>
    %cst_18 = arith.constant 1.000000e+00 : f32
    %49 = vector.broadcast %cst_18 : f32 to vector<2x64xf32>
    %50 = arith.addf %49, %48 : vector<2x64xf32>
    %51 = arith.divf %49, %50 : vector<2x64xf32>
    %52 = vector.extract_strided_slice %19 {offsets = [0, 128], sizes = [2, 64], strides = [1, 1]} : vector<2x256xf32> to vector<2x64xf32>
    %53 = math.tanh %52 : vector<2x64xf32>
    %54 = vector.extract_strided_slice %19 {offsets = [0, 192], sizes = [2, 64], strides = [1, 1]} : vector<2x256xf32> to vector<2x64xf32>
    %55 = arith.negf %54 : vector<2x64xf32>
    %56 = math.exp %55 : vector<2x64xf32>
    %cst_19 = arith.constant 1.000000e+00 : f32
    %57 = vector.broadcast %cst_19 : f32 to vector<2x64xf32>
    %58 = arith.addf %57, %56 : vector<2x64xf32>
    %59 = arith.divf %57, %58 : vector<2x64xf32>
    %c0_20 = arith.constant 0 : index
    %c0_21 = arith.constant 0 : index
    %60 = vector.load %arg8[%c0_20, %c0_21] : memref<2x64xf32, #tpu.memory_space<vmem>>, vector<2x64xf32>
    %61 = arith.mulf %31, %60 : vector<2x64xf32>
    %62 = arith.mulf %25, %33 : vector<2x64xf32>
    %63 = arith.addf %61, %62 : vector<2x64xf32>
    %64 = math.tanh %63 : vector<2x64xf32>
    %65 = arith.mulf %39, %64 : vector<2x64xf32>
    %c0_22 = arith.constant 0 : index
    %c0_23 = arith.constant 0 : index
    %66 = vector.load %arg10[%c0_22, %c0_23] : memref<2x64xf32, #tpu.memory_space<vmem>>, vector<2x64xf32>
    %67 = arith.mulf %51, %66 : vector<2x64xf32>
    %68 = arith.mulf %45, %53 : vector<2x64xf32>
    %69 = arith.addf %67, %68 : vector<2x64xf32>
    %70 = math.tanh %69 : vector<2x64xf32>
    %71 = arith.mulf %59, %70 : vector<2x64xf32>
    %c0_24 = arith.constant 0 : index
    %c0_25 = arith.constant 0 : index
    %72 = vector.load %arg7[%c0_24, %c0_25] : memref<2x64xf32, #tpu.memory_space<vmem>>, vector<2x64xf32>
    tpu.vector_store %arg7[%c0_24, %c0_25], %65 {strides = array<i32>} : memref<2x64xf32, #tpu.memory_space<vmem>>, vector<2x64xf32>,
    %c0_26 = arith.constant 0 : index
    %c0_27 = arith.constant 0 : index
    %73 = vector.load %arg8[%c0_26, %c0_27] : memref<2x64xf32, #tpu.memory_space<vmem>>, vector<2x64xf32>
    tpu.vector_store %arg8[%c0_26, %c0_27], %63 {strides = array<i32>} : memref<2x64xf32, #tpu.memory_space<vmem>>, vector<2x64xf32>,
    %c0_28 = arith.constant 0 : index
    %c0_29 = arith.constant 0 : index
    %74 = vector.load %arg9[%c0_28, %c0_29] : memref<2x64xf32, #tpu.memory_space<vmem>>, vector<2x64xf32>
    tpu.vector_store %arg9[%c0_28, %c0_29], %71 {strides = array<i32>} : memref<2x64xf32, #tpu.memory_space<vmem>>, vector<2x64xf32>,
    %c0_30 = arith.constant 0 : index
    %c0_31 = arith.constant 0 : index
    %75 = vector.load %arg10[%c0_30, %c0_31] : memref<2x64xf32, #tpu.memory_space<vmem>>, vector<2x64xf32>
    tpu.vector_store %arg10[%c0_30, %c0_31], %69 {strides = array<i32>} : memref<2x64xf32, #tpu.memory_space<vmem>>, vector<2x64xf32>,
    %76 = vector.extract_strided_slice %65 {offsets = [0, 0], sizes = [2, 32], strides = [1, 1]} : vector<2x64xf32> to vector<2x32xf32>
    %77 = vector.extract_strided_slice %65 {offsets = [0, 32], sizes = [2, 32], strides = [1, 1]} : vector<2x64xf32> to vector<2x32xf32>
    %78 = arith.mulf %76, %77 : vector<2x32xf32>
    %79 = arith.index_cast %c0_i32_4 : i32 to index
    %c0_32 = arith.constant 0 : index
    %c0_33 = arith.constant 0 : index
    %80 = vector.load %arg5[%79, %c0_32, %c0_33] : memref<8x2x32xf32, #tpu.memory_space<vmem>>, vector<1x2x32xf32>
    %81 = vector.shape_cast %80 : vector<1x2x32xf32> to vector<2x32xf32>
    %82 = vector.shape_cast %78 : vector<2x32xf32> to vector<1x2x32xf32>
    tpu.vector_store %arg5[%79, %c0_32, %c0_33], %82 {strides = array<i32>} : memref<8x2x32xf32, #tpu.memory_space<vmem>>, vector<1x2x32xf32>,
    %83 = vector.extract_strided_slice %71 {offsets = [0, 0], sizes = [2, 32], strides = [1, 1]} : vector<2x64xf32> to vector<2x32xf32>
    %84 = vector.extract_strided_slice %71 {offsets = [0, 32], sizes = [2, 32], strides = [1, 1]} : vector<2x64xf32> to vector<2x32xf32>
    %85 = arith.mulf %83, %84 : vector<2x32xf32>
    %c7_i32_34 = arith.constant 7 : i32
    %86 = arith.subi %c7_i32_34, %c0_i32_4 : i32
    %87 = arith.index_cast %86 : i32 to index
    %c0_35 = arith.constant 0 : index
    %c0_36 = arith.constant 0 : index
    %88 = vector.load %arg6[%87, %c0_35, %c0_36] : memref<8x2x32xf32, #tpu.memory_space<vmem>>, vector<1x2x32xf32>
    %89 = vector.shape_cast %88 : vector<1x2x32xf32> to vector<2x32xf32>
    %90 = vector.shape_cast %85 : vector<2x32xf32> to vector<1x2x32xf32>
    tpu.vector_store %arg6[%87, %c0_35, %c0_36], %90 {strides = array<i32>} : memref<8x2x32xf32, #tpu.memory_space<vmem>>, vector<1x2x32xf32>,
    %c1_i32 = arith.constant 1 : i32
    %c0_37 = arith.constant 0 : index
    %c0_38 = arith.constant 0 : index
    %91 = vector.load %arg7[%c0_37, %c0_38] : memref<2x64xf32, #tpu.memory_space<vmem>>, vector<2x64xf32>
    %c0_39 = arith.constant 0 : index
    %c0_40 = arith.constant 0 : index
    %92 = vector.load %arg9[%c0_39, %c0_40] : memref<2x64xf32, #tpu.memory_space<vmem>>, vector<2x64xf32>
    %93 = arith.index_cast %c1_i32 : i32 to index
    %c0_41 = arith.constant 0 : index
    %c0_42 = arith.constant 0 : index
    %94 = vector.load %arg1[%93, %c0_41, %c0_42] : memref<8x2x256xf32, #tpu.memory_space<vmem>>, vector<1x2x256xf32>
    %95 = vector.shape_cast %94 : vector<1x2x256xf32> to vector<2x256xf32>
    %96 = arith.truncf %91 : vector<2x64xf32> to vector<2x64xbf16>
    %cst_43 = arith.constant dense<0.000000e+00> : vector<2x256xf32>
    %97 = tpu.matmul %96, %3, %cst_43 {dimension_numbers = #tpu.dot_dimension_numbers<[1], [0], [0], [1], [0, 0, 1, 1], [], []>} : vector<2x64xbf16>, vector<64x256xbf16>, vector<2x256xf32> -> vector<2x256xf32>
    %98 = arith.addf %95, %97 : vector<2x256xf32>
    %c7_i32_44 = arith.constant 7 : i32
    %99 = arith.subi %c7_i32_44, %c1_i32 : i32
    %100 = arith.index_cast %99 : i32 to index
    %c0_45 = arith.constant 0 : index
    %c0_46 = arith.constant 0 : index
    %101 = vector.load %arg2[%100, %c0_45, %c0_46] : memref<8x2x256xf32, #tpu.memory_space<vmem>>, vector<1x2x256xf32>
    %102 = vector.shape_cast %101 : vector<1x2x256xf32> to vector<2x256xf32>
    %103 = arith.truncf %92 : vector<2x64xf32> to vector<2x64xbf16>
    %cst_47 = arith.constant dense<0.000000e+00> : vector<2x256xf32>
    %104 = tpu.matmul %103, %4, %cst_47 {dimension_numbers = #tpu.dot_dimension_numbers<[1], [0], [0], [1], [0, 0, 1, 1], [], []>} : vector<2x64xbf16>, vector<64x256xbf16>, vector<2x256xf32> -> vector<2x256xf32>
    %105 = arith.addf %102, %104 : vector<2x256xf32>
    %106 = vector.extract_strided_slice %98 {offsets = [0, 0], sizes = [2, 64], strides = [1, 1]} : vector<2x256xf32> to vector<2x64xf32>
    %107 = arith.negf %106 : vector<2x64xf32>
    %108 = math.exp %107 : vector<2x64xf32>
    %cst_48 = arith.constant 1.000000e+00 : f32
    %109 = vector.broadcast %cst_48 : f32 to vector<2x64xf32>
    %110 = arith.addf %109, %108 : vector<2x64xf32>
    %111 = arith.divf %109, %110 : vector<2x64xf32>
    %112 = vector.extract_strided_slice %98 {offsets = [0, 64], sizes = [2, 64], strides = [1, 1]} : vector<2x256xf32> to vector<2x64xf32>
    %113 = arith.negf %112 : vector<2x64xf32>
    %114 = math.exp %113 : vector<2x64xf32>
    %cst_49 = arith.constant 1.000000e+00 : f32
    %115 = vector.broadcast %cst_49 : f32 to vector<2x64xf32>
    %116 = arith.addf %115, %114 : vector<2x64xf32>
    %117 = arith.divf %115, %116 : vector<2x64xf32>
    %118 = vector.extract_strided_slice %98 {offsets = [0, 128], sizes = [2, 64], strides = [1, 1]} : vector<2x256xf32> to vector<2x64xf32>
    %119 = math.tanh %118 : vector<2x64xf32>
    %120 = vector.extract_strided_slice %98 {offsets = [0, 192], sizes = [2, 64], strides = [1, 1]} : vector<2x256xf32> to vector<2x64xf32>
    %121 = arith.negf %120 : vector<2x64xf32>
    %122 = math.exp %121 : vector<2x64xf32>
    %cst_50 = arith.constant 1.000000e+00 : f32
    %123 = vector.broadcast %cst_50 : f32 to vector<2x64xf32>
    %124 = arith.addf %123, %122 : vector<2x64xf32>
    %125 = arith.divf %123, %124 : vector<2x64xf32>
    %126 = vector.extract_strided_slice %105 {offsets = [0, 0], sizes = [2, 64], strides = [1, 1]} : vector<2x256xf32> to vector<2x64xf32>
    %127 = arith.negf %126 : vector<2x64xf32>
    %128 = math.exp %127 : vector<2x64xf32>
    %cst_51 = arith.constant 1.000000e+00 : f32
    %129 = vector.broadcast %cst_51 : f32 to vector<2x64xf32>
    %130 = arith.addf %129, %128 : vector<2x64xf32>
    %131 = arith.divf %129, %130 : vector<2x64xf32>
    %132 = vector.extract_strided_slice %105 {offsets = [0, 64], sizes = [2, 64], strides = [1, 1]} : vector<2x256xf32> to vector<2x64xf32>
    %133 = arith.negf %132 : vector<2x64xf32>
    %134 = math.exp %133 : vector<2x64xf32>
    %cst_52 = arith.constant 1.000000e+00 : f32
    %135 = vector.broadcast %cst_52 : f32 to vector<2x64xf32>
    %136 = arith.addf %135, %134 : vector<2x64xf32>
    %137 = arith.divf %135, %136 : vector<2x64xf32>
    %138 = vector.extract_strided_slice %105 {offsets = [0, 128], sizes = [2, 64], strides = [1, 1]} : vector<2x256xf32> to vector<2x64xf32>
    %139 = math.tanh %138 : vector<2x64xf32>
    %140 = vector.extract_strided_slice %105 {offsets = [0, 192], sizes = [2, 64], strides = [1, 1]} : vector<2x256xf32> to vector<2x64xf32>
    %141 = arith.negf %140 : vector<2x64xf32>
    %142 = math.exp %141 : vector<2x64xf32>
    %cst_53 = arith.constant 1.000000e+00 : f32
    %143 = vector.broadcast %cst_53 : f32 to vector<2x64xf32>
    %144 = arith.addf %143, %142 : vector<2x64xf32>
    %145 = arith.divf %143, %144 : vector<2x64xf32>
    %c0_54 = arith.constant 0 : index
    %c0_55 = arith.constant 0 : index
    %146 = vector.load %arg8[%c0_54, %c0_55] : memref<2x64xf32, #tpu.memory_space<vmem>>, vector<2x64xf32>
    %147 = arith.mulf %117, %146 : vector<2x64xf32>
    %148 = arith.mulf %111, %119 : vector<2x64xf32>
    %149 = arith.addf %147, %148 : vector<2x64xf32>
    %150 = math.tanh %149 : vector<2x64xf32>
    %151 = arith.mulf %125, %150 : vector<2x64xf32>
    %c0_56 = arith.constant 0 : index
    %c0_57 = arith.constant 0 : index
    %152 = vector.load %arg10[%c0_56, %c0_57] : memref<2x64xf32, #tpu.memory_space<vmem>>, vector<2x64xf32>
    %153 = arith.mulf %137, %152 : vector<2x64xf32>
    %154 = arith.mulf %131, %139 : vector<2x64xf32>
    %155 = arith.addf %153, %154 : vector<2x64xf32>
    %156 = math.tanh %155 : vector<2x64xf32>
    %157 = arith.mulf %145, %156 : vector<2x64xf32>
    %c0_58 = arith.constant 0 : index
    %c0_59 = arith.constant 0 : index
    %158 = vector.load %arg7[%c0_58, %c0_59] : memref<2x64xf32, #tpu.memory_space<vmem>>, vector<2x64xf32>
    tpu.vector_store %arg7[%c0_58, %c0_59], %151 {strides = array<i32>} : memref<2x64xf32, #tpu.memory_space<vmem>>, vector<2x64xf32>,
    %c0_60 = arith.constant 0 : index
    %c0_61 = arith.constant 0 : index
    %159 = vector.load %arg8[%c0_60, %c0_61] : memref<2x64xf32, #tpu.memory_space<vmem>>, vector<2x64xf32>
    tpu.vector_store %arg8[%c0_60, %c0_61], %149 {strides = array<i32>} : memref<2x64xf32, #tpu.memory_space<vmem>>, vector<2x64xf32>,
    %c0_62 = arith.constant 0 : index
    %c0_63 = arith.constant 0 : index
    %160 = vector.load %arg9[%c0_62, %c0_63] : memref<2x64xf32, #tpu.memory_space<vmem>>, vector<2x64xf32>
    tpu.vector_store %arg9[%c0_62, %c0_63], %157 {strides = array<i32>} : memref<2x64xf32, #tpu.memory_space<vmem>>, vector<2x64xf32>,
    %c0_64 = arith.constant 0 : index
    %c0_65 = arith.constant 0 : index
    %161 = vector.load %arg10[%c0_64, %c0_65] : memref<2x64xf32, #tpu.memory_space<vmem>>, vector<2x64xf32>
    tpu.vector_store %arg10[%c0_64, %c0_65], %155 {strides = array<i32>} : memref<2x64xf32, #tpu.memory_space<vmem>>, vector<2x64xf32>,
    %162 = vector.extract_strided_slice %151 {offsets = [0, 0], sizes = [2, 32], strides = [1, 1]} : vector<2x64xf32> to vector<2x32xf32>
    %163 = vector.extract_strided_slice %151 {offsets = [0, 32], sizes = [2, 32], strides = [1, 1]} : vector<2x64xf32> to vector<2x32xf32>
    %164 = arith.mulf %162, %163 : vector<2x32xf32>
    %165 = arith.index_cast %c1_i32 : i32 to index
    %c0_66 = arith.constant 0 : index
    %c0_67 = arith.constant 0 : index
    %166 = vector.load %arg5[%165, %c0_66, %c0_67] : memref<8x2x32xf32, #tpu.memory_space<vmem>>, vector<1x2x32xf32>
    %167 = vector.shape_cast %166 : vector<1x2x32xf32> to vector<2x32xf32>
    %168 = vector.shape_cast %164 : vector<2x32xf32> to vector<1x2x32xf32>
    tpu.vector_store %arg5[%165, %c0_66, %c0_67], %168 {strides = array<i32>} : memref<8x2x32xf32, #tpu.memory_space<vmem>>, vector<1x2x32xf32>,
    %169 = vector.extract_strided_slice %157 {offsets = [0, 0], sizes = [2, 32], strides = [1, 1]} : vector<2x64xf32> to vector<2x32xf32>
    %170 = vector.extract_strided_slice %157 {offsets = [0, 32], sizes = [2, 32], strides = [1, 1]} : vector<2x64xf32> to vector<2x32xf32>
    %171 = arith.mulf %169, %170 : vector<2x32xf32>
    %c7_i32_68 = arith.constant 7 : i32
    %172 = arith.subi %c7_i32_68, %c1_i32 : i32
    %173 = arith.index_cast %172 : i32 to index
    %c0_69 = arith.constant 0 : index
    %c0_70 = arith.constant 0 : index
    %174 = vector.load %arg6[%173, %c0_69, %c0_70] : memref<8x2x32xf32, #tpu.memory_space<vmem>>, vector<1x2x32xf32>
    %175 = vector.shape_cast %174 : vector<1x2x32xf32> to vector<2x32xf32>
    %176 = vector.shape_cast %171 : vector<2x32xf32> to vector<1x2x32xf32>
    tpu.vector_store %arg6[%173, %c0_69, %c0_70], %176 {strides = array<i32>} : memref<8x2x32xf32, #tpu.memory_space<vmem>>, vector<1x2x32xf32>,
    %c2_i32 = arith.constant 2 : i32
    %c0_71 = arith.constant 0 : index
    %c0_72 = arith.constant 0 : index
    %177 = vector.load %arg7[%c0_71, %c0_72] : memref<2x64xf32, #tpu.memory_space<vmem>>, vector<2x64xf32>
    %c0_73 = arith.constant 0 : index
    %c0_74 = arith.constant 0 : index
    %178 = vector.load %arg9[%c0_73, %c0_74] : memref<2x64xf32, #tpu.memory_space<vmem>>, vector<2x64xf32>
    %179 = arith.index_cast %c2_i32 : i32 to index
    %c0_75 = arith.constant 0 : index
    %c0_76 = arith.constant 0 : index
    %180 = vector.load %arg1[%179, %c0_75, %c0_76] : memref<8x2x256xf32, #tpu.memory_space<vmem>>, vector<1x2x256xf32>
    %181 = vector.shape_cast %180 : vector<1x2x256xf32> to vector<2x256xf32>
    %182 = arith.truncf %177 : vector<2x64xf32> to vector<2x64xbf16>
    %cst_77 = arith.constant dense<0.000000e+00> : vector<2x256xf32>
    %183 = tpu.matmul %182, %3, %cst_77 {dimension_numbers = #tpu.dot_dimension_numbers<[1], [0], [0], [1], [0, 0, 1, 1], [], []>} : vector<2x64xbf16>, vector<64x256xbf16>, vector<2x256xf32> -> vector<2x256xf32>
    %184 = arith.addf %181, %183 : vector<2x256xf32>
    %c7_i32_78 = arith.constant 7 : i32
    %185 = arith.subi %c7_i32_78, %c2_i32 : i32
    %186 = arith.index_cast %185 : i32 to index
    %c0_79 = arith.constant 0 : index
    %c0_80 = arith.constant 0 : index
    %187 = vector.load %arg2[%186, %c0_79, %c0_80] : memref<8x2x256xf32, #tpu.memory_space<vmem>>, vector<1x2x256xf32>
    %188 = vector.shape_cast %187 : vector<1x2x256xf32> to vector<2x256xf32>
    %189 = arith.truncf %178 : vector<2x64xf32> to vector<2x64xbf16>
    %cst_81 = arith.constant dense<0.000000e+00> : vector<2x256xf32>
    %190 = tpu.matmul %189, %4, %cst_81 {dimension_numbers = #tpu.dot_dimension_numbers<[1], [0], [0], [1], [0, 0, 1, 1], [], []>} : vector<2x64xbf16>, vector<64x256xbf16>, vector<2x256xf32> -> vector<2x256xf32>
    %191 = arith.addf %188, %190 : vector<2x256xf32>
    %192 = vector.extract_strided_slice %184 {offsets = [0, 0], sizes = [2, 64], strides = [1, 1]} : vector<2x256xf32> to vector<2x64xf32>
    %193 = arith.negf %192 : vector<2x64xf32>
    %194 = math.exp %193 : vector<2x64xf32>
    %cst_82 = arith.constant 1.000000e+00 : f32
    %195 = vector.broadcast %cst_82 : f32 to vector<2x64xf32>
    %196 = arith.addf %195, %194 : vector<2x64xf32>
    %197 = arith.divf %195, %196 : vector<2x64xf32>
    %198 = vector.extract_strided_slice %184 {offsets = [0, 64], sizes = [2, 64], strides = [1, 1]} : vector<2x256xf32> to vector<2x64xf32>
    %199 = arith.negf %198 : vector<2x64xf32>
    %200 = math.exp %199 : vector<2x64xf32>
    %cst_83 = arith.constant 1.000000e+00 : f32
    %201 = vector.broadcast %cst_83 : f32 to vector<2x64xf32>
    %202 = arith.addf %201, %200 : vector<2x64xf32>
    %203 = arith.divf %201, %202 : vector<2x64xf32>
    %204 = vector.extract_strided_slice %184 {offsets = [0, 128], sizes = [2, 64], strides = [1, 1]} : vector<2x256xf32> to vector<2x64xf32>
    %205 = math.tanh %204 : vector<2x64xf32>
    %206 = vector.extract_strided_slice %184 {offsets = [0, 192], sizes = [2, 64], strides = [1, 1]} : vector<2x256xf32> to vector<2x64xf32>
    %207 = arith.negf %206 : vector<2x64xf32>
    %208 = math.exp %207 : vector<2x64xf32>
    %cst_84 = arith.constant 1.000000e+00 : f32
    %209 = vector.broadcast %cst_84 : f32 to vector<2x64xf32>
    %210 = arith.addf %209, %208 : vector<2x64xf32>
    %211 = arith.divf %209, %210 : vector<2x64xf32>
    %212 = vector.extract_strided_slice %191 {offsets = [0, 0], sizes = [2, 64], strides = [1, 1]} : vector<2x256xf32> to vector<2x64xf32>
    %213 = arith.negf %212 : vector<2x64xf32>
    %214 = math.exp %213 : vector<2x64xf32>
    %cst_85 = arith.constant 1.000000e+00 : f32
    %215 = vector.broadcast %cst_85 : f32 to vector<2x64xf32>
    %216 = arith.addf %215, %214 : vector<2x64xf32>
    %217 = arith.divf %215, %216 : vector<2x64xf32>
    %218 = vector.extract_strided_slice %191 {offsets = [0, 64], sizes = [2, 64], strides = [1, 1]} : vector<2x256xf32> to vector<2x64xf32>
    %219 = arith.negf %218 : vector<2x64xf32>
    %220 = math.exp %219 : vector<2x64xf32>
    %cst_86 = arith.constant 1.000000e+00 : f32
    %221 = vector.broadcast %cst_86 : f32 to vector<2x64xf32>
    %222 = arith.addf %221, %220 : vector<2x64xf32>
    %223 = arith.divf %221, %222 : vector<2x64xf32>
    %224 = vector.extract_strided_slice %191 {offsets = [0, 128], sizes = [2, 64], strides = [1, 1]} : vector<2x256xf32> to vector<2x64xf32>
    %225 = math.tanh %224 : vector<2x64xf32>
    %226 = vector.extract_strided_slice %191 {offsets = [0, 192], sizes = [2, 64], strides = [1, 1]} : vector<2x256xf32> to vector<2x64xf32>
    %227 = arith.negf %226 : vector<2x64xf32>
    %228 = math.exp %227 : vector<2x64xf32>
    %cst_87 = arith.constant 1.000000e+00 : f32
    %229 = vector.broadcast %cst_87 : f32 to vector<2x64xf32>
    %230 = arith.addf %229, %228 : vector<2x64xf32>
    %231 = arith.divf %229, %230 : vector<2x64xf32>
    %c0_88 = arith.constant 0 : index
    %c0_89 = arith.constant 0 : index
    %232 = vector.load %arg8[%c0_88, %c0_89] : memref<2x64xf32, #tpu.memory_space<vmem>>, vector<2x64xf32>
    %233 = arith.mulf %203, %232 : vector<2x64xf32>
    %234 = arith.mulf %197, %205 : vector<2x64xf32>
    %235 = arith.addf %233, %234 : vector<2x64xf32>
    %236 = math.tanh %235 : vector<2x64xf32>
    %237 = arith.mulf %211, %236 : vector<2x64xf32>
    %c0_90 = arith.constant 0 : index
    %c0_91 = arith.constant 0 : index
    %238 = vector.load %arg10[%c0_90, %c0_91] : memref<2x64xf32, #tpu.memory_space<vmem>>, vector<2x64xf32>
    %239 = arith.mulf %223, %238 : vector<2x64xf32>
    %240 = arith.mulf %217, %225 : vector<2x64xf32>
    %241 = arith.addf %239, %240 : vector<2x64xf32>
    %242 = math.tanh %241 : vector<2x64xf32>
    %243 = arith.mulf %231, %242 : vector<2x64xf32>
    %c0_92 = arith.constant 0 : index
    %c0_93 = arith.constant 0 : index
    %244 = vector.load %arg7[%c0_92, %c0_93] : memref<2x64xf32, #tpu.memory_space<vmem>>, vector<2x64xf32>
    tpu.vector_store %arg7[%c0_92, %c0_93], %237 {strides = array<i32>} : memref<2x64xf32, #tpu.memory_space<vmem>>, vector<2x64xf32>,
    %c0_94 = arith.constant 0 : index
    %c0_95 = arith.constant 0 : index
    %245 = vector.load %arg8[%c0_94, %c0_95] : memref<2x64xf32, #tpu.memory_space<vmem>>, vector<2x64xf32>
    tpu.vector_store %arg8[%c0_94, %c0_95], %235 {strides = array<i32>} : memref<2x64xf32, #tpu.memory_space<vmem>>, vector<2x64xf32>,
    %c0_96 = arith.constant 0 : index
    %c0_97 = arith.constant 0 : index
    %246 = vector.load %arg9[%c0_96, %c0_97] : memref<2x64xf32, #tpu.memory_space<vmem>>, vector<2x64xf32>
    tpu.vector_store %arg9[%c0_96, %c0_97], %243 {strides = array<i32>} : memref<2x64xf32, #tpu.memory_space<vmem>>, vector<2x64xf32>,
    %c0_98 = arith.constant 0 : index
    %c0_99 = arith.constant 0 : index
    %247 = vector.load %arg10[%c0_98, %c0_99] : memref<2x64xf32, #tpu.memory_space<vmem>>, vector<2x64xf32>
    tpu.vector_store %arg10[%c0_98, %c0_99], %241 {strides = array<i32>} : memref<2x64xf32, #tpu.memory_space<vmem>>, vector<2x64xf32>,
    %248 = vector.extract_strided_slice %237 {offsets = [0, 0], sizes = [2, 32], strides = [1, 1]} : vector<2x64xf32> to vector<2x32xf32>
    %249 = vector.extract_strided_slice %237 {offsets = [0, 32], sizes = [2, 32], strides = [1, 1]} : vector<2x64xf32> to vector<2x32xf32>
    %250 = arith.mulf %248, %249 : vector<2x32xf32>
    %251 = arith.index_cast %c2_i32 : i32 to index
    %c0_100 = arith.constant 0 : index
    %c0_101 = arith.constant 0 : index
    %252 = vector.load %arg5[%251, %c0_100, %c0_101] : memref<8x2x32xf32, #tpu.memory_space<vmem>>, vector<1x2x32xf32>
    %253 = vector.shape_cast %252 : vector<1x2x32xf32> to vector<2x32xf32>
    %254 = vector.shape_cast %250 : vector<2x32xf32> to vector<1x2x32xf32>
    tpu.vector_store %arg5[%251, %c0_100, %c0_101], %254 {strides = array<i32>} : memref<8x2x32xf32, #tpu.memory_space<vmem>>, vector<1x2x32xf32>,
    %255 = vector.extract_strided_slice %243 {offsets = [0, 0], sizes = [2, 32], strides = [1, 1]} : vector<2x64xf32> to vector<2x32xf32>
    %256 = vector.extract_strided_slice %243 {offsets = [0, 32], sizes = [2, 32], strides = [1, 1]} : vector<2x64xf32> to vector<2x32xf32>
    %257 = arith.mulf %255, %256 : vector<2x32xf32>
    %c7_i32_102 = arith.constant 7 : i32
    %258 = arith.subi %c7_i32_102, %c2_i32 : i32
    %259 = arith.index_cast %258 : i32 to index
    %c0_103 = arith.constant 0 : index
    %c0_104 = arith.constant 0 : index
    %260 = vector.load %arg6[%259, %c0_103, %c0_104] : memref<8x2x32xf32, #tpu.memory_space<vmem>>, vector<1x2x32xf32>
    %261 = vector.shape_cast %260 : vector<1x2x32xf32> to vector<2x32xf32>
    %262 = vector.shape_cast %257 : vector<2x32xf32> to vector<1x2x32xf32>
    tpu.vector_store %arg6[%259, %c0_103, %c0_104], %262 {strides = array<i32>} : memref<8x2x32xf32, #tpu.memory_space<vmem>>, vector<1x2x32xf32>,
    %c3_i32 = arith.constant 3 : i32
    %c0_105 = arith.constant 0 : index
    %c0_106 = arith.constant 0 : index
    %263 = vector.load %arg7[%c0_105, %c0_106] : memref<2x64xf32, #tpu.memory_space<vmem>>, vector<2x64xf32>
    %c0_107 = arith.constant 0 : index
    %c0_108 = arith.constant 0 : index
    %264 = vector.load %arg9[%c0_107, %c0_108] : memref<2x64xf32, #tpu.memory_space<vmem>>, vector<2x64xf32>
    %265 = arith.index_cast %c3_i32 : i32 to index
    %c0_109 = arith.constant 0 : index
    %c0_110 = arith.constant 0 : index
    %266 = vector.load %arg1[%265, %c0_109, %c0_110] : memref<8x2x256xf32, #tpu.memory_space<vmem>>, vector<1x2x256xf32>
    %267 = vector.shape_cast %266 : vector<1x2x256xf32> to vector<2x256xf32>
    %268 = arith.truncf %263 : vector<2x64xf32> to vector<2x64xbf16>
    %cst_111 = arith.constant dense<0.000000e+00> : vector<2x256xf32>
    %269 = tpu.matmul %268, %3, %cst_111 {dimension_numbers = #tpu.dot_dimension_numbers<[1], [0], [0], [1], [0, 0, 1, 1], [], []>} : vector<2x64xbf16>, vector<64x256xbf16>, vector<2x256xf32> -> vector<2x256xf32>
    %270 = arith.addf %267, %269 : vector<2x256xf32>
    %c7_i32_112 = arith.constant 7 : i32
    %271 = arith.subi %c7_i32_112, %c3_i32 : i32
    %272 = arith.index_cast %271 : i32 to index
    %c0_113 = arith.constant 0 : index
    %c0_114 = arith.constant 0 : index
    %273 = vector.load %arg2[%272, %c0_113, %c0_114] : memref<8x2x256xf32, #tpu.memory_space<vmem>>, vector<1x2x256xf32>
    %274 = vector.shape_cast %273 : vector<1x2x256xf32> to vector<2x256xf32>
    %275 = arith.truncf %264 : vector<2x64xf32> to vector<2x64xbf16>
    %cst_115 = arith.constant dense<0.000000e+00> : vector<2x256xf32>
    %276 = tpu.matmul %275, %4, %cst_115 {dimension_numbers = #tpu.dot_dimension_numbers<[1], [0], [0], [1], [0, 0, 1, 1], [], []>} : vector<2x64xbf16>, vector<64x256xbf16>, vector<2x256xf32> -> vector<2x256xf32>
    %277 = arith.addf %274, %276 : vector<2x256xf32>
    %278 = vector.extract_strided_slice %270 {offsets = [0, 0], sizes = [2, 64], strides = [1, 1]} : vector<2x256xf32> to vector<2x64xf32>
    %279 = arith.negf %278 : vector<2x64xf32>
    %280 = math.exp %279 : vector<2x64xf32>
    %cst_116 = arith.constant 1.000000e+00 : f32
    %281 = vector.broadcast %cst_116 : f32 to vector<2x64xf32>
    %282 = arith.addf %281, %280 : vector<2x64xf32>
    %283 = arith.divf %281, %282 : vector<2x64xf32>
    %284 = vector.extract_strided_slice %270 {offsets = [0, 64], sizes = [2, 64], strides = [1, 1]} : vector<2x256xf32> to vector<2x64xf32>
    %285 = arith.negf %284 : vector<2x64xf32>
    %286 = math.exp %285 : vector<2x64xf32>
    %cst_117 = arith.constant 1.000000e+00 : f32
    %287 = vector.broadcast %cst_117 : f32 to vector<2x64xf32>
    %288 = arith.addf %287, %286 : vector<2x64xf32>
    %289 = arith.divf %287, %288 : vector<2x64xf32>
    %290 = vector.extract_strided_slice %270 {offsets = [0, 128], sizes = [2, 64], strides = [1, 1]} : vector<2x256xf32> to vector<2x64xf32>
    %291 = math.tanh %290 : vector<2x64xf32>
    %292 = vector.extract_strided_slice %270 {offsets = [0, 192], sizes = [2, 64], strides = [1, 1]} : vector<2x256xf32> to vector<2x64xf32>
    %293 = arith.negf %292 : vector<2x64xf32>
    %294 = math.exp %293 : vector<2x64xf32>
    %cst_118 = arith.constant 1.000000e+00 : f32
    %295 = vector.broadcast %cst_118 : f32 to vector<2x64xf32>
    %296 = arith.addf %295, %294 : vector<2x64xf32>
    %297 = arith.divf %295, %296 : vector<2x64xf32>
    %298 = vector.extract_strided_slice %277 {offsets = [0, 0], sizes = [2, 64], strides = [1, 1]} : vector<2x256xf32> to vector<2x64xf32>
    %299 = arith.negf %298 : vector<2x64xf32>
    %300 = math.exp %299 : vector<2x64xf32>
    %cst_119 = arith.constant 1.000000e+00 : f32
    %301 = vector.broadcast %cst_119 : f32 to vector<2x64xf32>
    %302 = arith.addf %301, %300 : vector<2x64xf32>
    %303 = arith.divf %301, %302 : vector<2x64xf32>
    %304 = vector.extract_strided_slice %277 {offsets = [0, 64], sizes = [2, 64], strides = [1, 1]} : vector<2x256xf32> to vector<2x64xf32>
    %305 = arith.negf %304 : vector<2x64xf32>
    %306 = math.exp %305 : vector<2x64xf32>
    %cst_120 = arith.constant 1.000000e+00 : f32
    %307 = vector.broadcast %cst_120 : f32 to vector<2x64xf32>
    %308 = arith.addf %307, %306 : vector<2x64xf32>
    %309 = arith.divf %307, %308 : vector<2x64xf32>
    %310 = vector.extract_strided_slice %277 {offsets = [0, 128], sizes = [2, 64], strides = [1, 1]} : vector<2x256xf32> to vector<2x64xf32>
    %311 = math.tanh %310 : vector<2x64xf32>
    %312 = vector.extract_strided_slice %277 {offsets = [0, 192], sizes = [2, 64], strides = [1, 1]} : vector<2x256xf32> to vector<2x64xf32>
    %313 = arith.negf %312 : vector<2x64xf32>
    %314 = math.exp %313 : vector<2x64xf32>
    %cst_121 = arith.constant 1.000000e+00 : f32
    %315 = vector.broadcast %cst_121 : f32 to vector<2x64xf32>
    %316 = arith.addf %315, %314 : vector<2x64xf32>
    %317 = arith.divf %315, %316 : vector<2x64xf32>
    %c0_122 = arith.constant 0 : index
    %c0_123 = arith.constant 0 : index
    %318 = vector.load %arg8[%c0_122, %c0_123] : memref<2x64xf32, #tpu.memory_space<vmem>>, vector<2x64xf32>
    %319 = arith.mulf %289, %318 : vector<2x64xf32>
    %320 = arith.mulf %283, %291 : vector<2x64xf32>
    %321 = arith.addf %319, %320 : vector<2x64xf32>
    %322 = math.tanh %321 : vector<2x64xf32>
    %323 = arith.mulf %297, %322 : vector<2x64xf32>
    %c0_124 = arith.constant 0 : index
    %c0_125 = arith.constant 0 : index
    %324 = vector.load %arg10[%c0_124, %c0_125] : memref<2x64xf32, #tpu.memory_space<vmem>>, vector<2x64xf32>
    %325 = arith.mulf %309, %324 : vector<2x64xf32>
    %326 = arith.mulf %303, %311 : vector<2x64xf32>
    %327 = arith.addf %325, %326 : vector<2x64xf32>
    %328 = math.tanh %327 : vector<2x64xf32>
    %329 = arith.mulf %317, %328 : vector<2x64xf32>
    %c0_126 = arith.constant 0 : index
    %c0_127 = arith.constant 0 : index
    %330 = vector.load %arg7[%c0_126, %c0_127] : memref<2x64xf32, #tpu.memory_space<vmem>>, vector<2x64xf32>
    tpu.vector_store %arg7[%c0_126, %c0_127], %323 {strides = array<i32>} : memref<2x64xf32, #tpu.memory_space<vmem>>, vector<2x64xf32>,
    %c0_128 = arith.constant 0 : index
    %c0_129 = arith.constant 0 : index
    %331 = vector.load %arg8[%c0_128, %c0_129] : memref<2x64xf32, #tpu.memory_space<vmem>>, vector<2x64xf32>
    tpu.vector_store %arg8[%c0_128, %c0_129], %321 {strides = array<i32>} : memref<2x64xf32, #tpu.memory_space<vmem>>, vector<2x64xf32>,
    %c0_130 = arith.constant 0 : index
    %c0_131 = arith.constant 0 : index
    %332 = vector.load %arg9[%c0_130, %c0_131] : memref<2x64xf32, #tpu.memory_space<vmem>>, vector<2x64xf32>
    tpu.vector_store %arg9[%c0_130, %c0_131], %329 {strides = array<i32>} : memref<2x64xf32, #tpu.memory_space<vmem>>, vector<2x64xf32>,
    %c0_132 = arith.constant 0 : index
    %c0_133 = arith.constant 0 : index
    %333 = vector.load %arg10[%c0_132, %c0_133] : memref<2x64xf32, #tpu.memory_space<vmem>>, vector<2x64xf32>
    tpu.vector_store %arg10[%c0_132, %c0_133], %327 {strides = array<i32>} : memref<2x64xf32, #tpu.memory_space<vmem>>, vector<2x64xf32>,
    %334 = vector.extract_strided_slice %323 {offsets = [0, 0], sizes = [2, 32], strides = [1, 1]} : vector<2x64xf32> to vector<2x32xf32>
    %335 = vector.extract_strided_slice %323 {offsets = [0, 32], sizes = [2, 32], strides = [1, 1]} : vector<2x64xf32> to vector<2x32xf32>
    %336 = arith.mulf %334, %335 : vector<2x32xf32>
    %337 = arith.index_cast %c3_i32 : i32 to index
    %c0_134 = arith.constant 0 : index
    %c0_135 = arith.constant 0 : index
    %338 = vector.load %arg5[%337, %c0_134, %c0_135] : memref<8x2x32xf32, #tpu.memory_space<vmem>>, vector<1x2x32xf32>
    %339 = vector.shape_cast %338 : vector<1x2x32xf32> to vector<2x32xf32>
    %340 = vector.shape_cast %336 : vector<2x32xf32> to vector<1x2x32xf32>
    tpu.vector_store %arg5[%337, %c0_134, %c0_135], %340 {strides = array<i32>} : memref<8x2x32xf32, #tpu.memory_space<vmem>>, vector<1x2x32xf32>,
    %341 = vector.extract_strided_slice %329 {offsets = [0, 0], sizes = [2, 32], strides = [1, 1]} : vector<2x64xf32> to vector<2x32xf32>
    %342 = vector.extract_strided_slice %329 {offsets = [0, 32], sizes = [2, 32], strides = [1, 1]} : vector<2x64xf32> to vector<2x32xf32>
    %343 = arith.mulf %341, %342 : vector<2x32xf32>
    %c7_i32_136 = arith.constant 7 : i32
    %344 = arith.subi %c7_i32_136, %c3_i32 : i32
    %345 = arith.index_cast %344 : i32 to index
    %c0_137 = arith.constant 0 : index
    %c0_138 = arith.constant 0 : index
    %346 = vector.load %arg6[%345, %c0_137, %c0_138] : memref<8x2x32xf32, #tpu.memory_space<vmem>>, vector<1x2x32xf32>
    %347 = vector.shape_cast %346 : vector<1x2x32xf32> to vector<2x32xf32>
    %348 = vector.shape_cast %343 : vector<2x32xf32> to vector<1x2x32xf32>
    tpu.vector_store %arg6[%345, %c0_137, %c0_138], %348 {strides = array<i32>} : memref<8x2x32xf32, #tpu.memory_space<vmem>>, vector<1x2x32xf32>,
    %c4_i32 = arith.constant 4 : i32
    %c0_139 = arith.constant 0 : index
    %c0_140 = arith.constant 0 : index
    %349 = vector.load %arg7[%c0_139, %c0_140] : memref<2x64xf32, #tpu.memory_space<vmem>>, vector<2x64xf32>
    %c0_141 = arith.constant 0 : index
    %c0_142 = arith.constant 0 : index
    %350 = vector.load %arg9[%c0_141, %c0_142] : memref<2x64xf32, #tpu.memory_space<vmem>>, vector<2x64xf32>
    %351 = arith.index_cast %c4_i32 : i32 to index
    %c0_143 = arith.constant 0 : index
    %c0_144 = arith.constant 0 : index
    %352 = vector.load %arg1[%351, %c0_143, %c0_144] : memref<8x2x256xf32, #tpu.memory_space<vmem>>, vector<1x2x256xf32>
    %353 = vector.shape_cast %352 : vector<1x2x256xf32> to vector<2x256xf32>
    %354 = arith.truncf %349 : vector<2x64xf32> to vector<2x64xbf16>
    %cst_145 = arith.constant dense<0.000000e+00> : vector<2x256xf32>
    %355 = tpu.matmul %354, %3, %cst_145 {dimension_numbers = #tpu.dot_dimension_numbers<[1], [0], [0], [1], [0, 0, 1, 1], [], []>} : vector<2x64xbf16>, vector<64x256xbf16>, vector<2x256xf32> -> vector<2x256xf32>
    %356 = arith.addf %353, %355 : vector<2x256xf32>
    %c7_i32_146 = arith.constant 7 : i32
    %357 = arith.subi %c7_i32_146, %c4_i32 : i32
    %358 = arith.index_cast %357 : i32 to index
    %c0_147 = arith.constant 0 : index
    %c0_148 = arith.constant 0 : index
    %359 = vector.load %arg2[%358, %c0_147, %c0_148] : memref<8x2x256xf32, #tpu.memory_space<vmem>>, vector<1x2x256xf32>
    %360 = vector.shape_cast %359 : vector<1x2x256xf32> to vector<2x256xf32>
    %361 = arith.truncf %350 : vector<2x64xf32> to vector<2x64xbf16>
    %cst_149 = arith.constant dense<0.000000e+00> : vector<2x256xf32>
    %362 = tpu.matmul %361, %4, %cst_149 {dimension_numbers = #tpu.dot_dimension_numbers<[1], [0], [0], [1], [0, 0, 1, 1], [], []>} : vector<2x64xbf16>, vector<64x256xbf16>, vector<2x256xf32> -> vector<2x256xf32>
    %363 = arith.addf %360, %362 : vector<2x256xf32>
    %364 = vector.extract_strided_slice %356 {offsets = [0, 0], sizes = [2, 64], strides = [1, 1]} : vector<2x256xf32> to vector<2x64xf32>
    %365 = arith.negf %364 : vector<2x64xf32>
    %366 = math.exp %365 : vector<2x64xf32>
    %cst_150 = arith.constant 1.000000e+00 : f32
    %367 = vector.broadcast %cst_150 : f32 to vector<2x64xf32>
    %368 = arith.addf %367, %366 : vector<2x64xf32>
    %369 = arith.divf %367, %368 : vector<2x64xf32>
    %370 = vector.extract_strided_slice %356 {offsets = [0, 64], sizes = [2, 64], strides = [1, 1]} : vector<2x256xf32> to vector<2x64xf32>
    %371 = arith.negf %370 : vector<2x64xf32>
    %372 = math.exp %371 : vector<2x64xf32>
    %cst_151 = arith.constant 1.000000e+00 : f32
    %373 = vector.broadcast %cst_151 : f32 to vector<2x64xf32>
    %374 = arith.addf %373, %372 : vector<2x64xf32>
    %375 = arith.divf %373, %374 : vector<2x64xf32>
    %376 = vector.extract_strided_slice %356 {offsets = [0, 128], sizes = [2, 64], strides = [1, 1]} : vector<2x256xf32> to vector<2x64xf32>
    %377 = math.tanh %376 : vector<2x64xf32>
    %378 = vector.extract_strided_slice %356 {offsets = [0, 192], sizes = [2, 64], strides = [1, 1]} : vector<2x256xf32> to vector<2x64xf32>
    %379 = arith.negf %378 : vector<2x64xf32>
    %380 = math.exp %379 : vector<2x64xf32>
    %cst_152 = arith.constant 1.000000e+00 : f32
    %381 = vector.broadcast %cst_152 : f32 to vector<2x64xf32>
    %382 = arith.addf %381, %380 : vector<2x64xf32>
    %383 = arith.divf %381, %382 : vector<2x64xf32>
    %384 = vector.extract_strided_slice %363 {offsets = [0, 0], sizes = [2, 64], strides = [1, 1]} : vector<2x256xf32> to vector<2x64xf32>
    %385 = arith.negf %384 : vector<2x64xf32>
    %386 = math.exp %385 : vector<2x64xf32>
    %cst_153 = arith.constant 1.000000e+00 : f32
    %387 = vector.broadcast %cst_153 : f32 to vector<2x64xf32>
    %388 = arith.addf %387, %386 : vector<2x64xf32>
    %389 = arith.divf %387, %388 : vector<2x64xf32>
    %390 = vector.extract_strided_slice %363 {offsets = [0, 64], sizes = [2, 64], strides = [1, 1]} : vector<2x256xf32> to vector<2x64xf32>
    %391 = arith.negf %390 : vector<2x64xf32>
    %392 = math.exp %391 : vector<2x64xf32>
    %cst_154 = arith.constant 1.000000e+00 : f32
    %393 = vector.broadcast %cst_154 : f32 to vector<2x64xf32>
    %394 = arith.addf %393, %392 : vector<2x64xf32>
    %395 = arith.divf %393, %394 : vector<2x64xf32>
    %396 = vector.extract_strided_slice %363 {offsets = [0, 128], sizes = [2, 64], strides = [1, 1]} : vector<2x256xf32> to vector<2x64xf32>
    %397 = math.tanh %396 : vector<2x64xf32>
    %398 = vector.extract_strided_slice %363 {offsets = [0, 192], sizes = [2, 64], strides = [1, 1]} : vector<2x256xf32> to vector<2x64xf32>
    %399 = arith.negf %398 : vector<2x64xf32>
    %400 = math.exp %399 : vector<2x64xf32>
    %cst_155 = arith.constant 1.000000e+00 : f32
    %401 = vector.broadcast %cst_155 : f32 to vector<2x64xf32>
    %402 = arith.addf %401, %400 : vector<2x64xf32>
    %403 = arith.divf %401, %402 : vector<2x64xf32>
    %c0_156 = arith.constant 0 : index
    %c0_157 = arith.constant 0 : index
    %404 = vector.load %arg8[%c0_156, %c0_157] : memref<2x64xf32, #tpu.memory_space<vmem>>, vector<2x64xf32>
    %405 = arith.mulf %375, %404 : vector<2x64xf32>
    %406 = arith.mulf %369, %377 : vector<2x64xf32>
    %407 = arith.addf %405, %406 : vector<2x64xf32>
    %408 = math.tanh %407 : vector<2x64xf32>
    %409 = arith.mulf %383, %408 : vector<2x64xf32>
    %c0_158 = arith.constant 0 : index
    %c0_159 = arith.constant 0 : index
    %410 = vector.load %arg10[%c0_158, %c0_159] : memref<2x64xf32, #tpu.memory_space<vmem>>, vector<2x64xf32>
    %411 = arith.mulf %395, %410 : vector<2x64xf32>
    %412 = arith.mulf %389, %397 : vector<2x64xf32>
    %413 = arith.addf %411, %412 : vector<2x64xf32>
    %414 = math.tanh %413 : vector<2x64xf32>
    %415 = arith.mulf %403, %414 : vector<2x64xf32>
    %c0_160 = arith.constant 0 : index
    %c0_161 = arith.constant 0 : index
    %416 = vector.load %arg7[%c0_160, %c0_161] : memref<2x64xf32, #tpu.memory_space<vmem>>, vector<2x64xf32>
    tpu.vector_store %arg7[%c0_160, %c0_161], %409 {strides = array<i32>} : memref<2x64xf32, #tpu.memory_space<vmem>>, vector<2x64xf32>,
    %c0_162 = arith.constant 0 : index
    %c0_163 = arith.constant 0 : index
    %417 = vector.load %arg8[%c0_162, %c0_163] : memref<2x64xf32, #tpu.memory_space<vmem>>, vector<2x64xf32>
    tpu.vector_store %arg8[%c0_162, %c0_163], %407 {strides = array<i32>} : memref<2x64xf32, #tpu.memory_space<vmem>>, vector<2x64xf32>,
    %c0_164 = arith.constant 0 : index
    %c0_165 = arith.constant 0 : index
    %418 = vector.load %arg9[%c0_164, %c0_165] : memref<2x64xf32, #tpu.memory_space<vmem>>, vector<2x64xf32>
    tpu.vector_store %arg9[%c0_164, %c0_165], %415 {strides = array<i32>} : memref<2x64xf32, #tpu.memory_space<vmem>>, vector<2x64xf32>,
    %c0_166 = arith.constant 0 : index
    %c0_167 = arith.constant 0 : index
    %419 = vector.load %arg10[%c0_166, %c0_167] : memref<2x64xf32, #tpu.memory_space<vmem>>, vector<2x64xf32>
    tpu.vector_store %arg10[%c0_166, %c0_167], %413 {strides = array<i32>} : memref<2x64xf32, #tpu.memory_space<vmem>>, vector<2x64xf32>,
    %420 = vector.extract_strided_slice %409 {offsets = [0, 0], sizes = [2, 32], strides = [1, 1]} : vector<2x64xf32> to vector<2x32xf32>
    %421 = vector.extract_strided_slice %409 {offsets = [0, 32], sizes = [2, 32], strides = [1, 1]} : vector<2x64xf32> to vector<2x32xf32>
    %422 = arith.mulf %420, %421 : vector<2x32xf32>
    %423 = arith.index_cast %c4_i32 : i32 to index
    %c0_168 = arith.constant 0 : index
    %c0_169 = arith.constant 0 : index
    %424 = vector.load %arg5[%423, %c0_168, %c0_169] : memref<8x2x32xf32, #tpu.memory_space<vmem>>, vector<1x2x32xf32>
    %425 = vector.shape_cast %424 : vector<1x2x32xf32> to vector<2x32xf32>
    %426 = vector.shape_cast %422 : vector<2x32xf32> to vector<1x2x32xf32>
    tpu.vector_store %arg5[%423, %c0_168, %c0_169], %426 {strides = array<i32>} : memref<8x2x32xf32, #tpu.memory_space<vmem>>, vector<1x2x32xf32>,
    %427 = vector.extract_strided_slice %415 {offsets = [0, 0], sizes = [2, 32], strides = [1, 1]} : vector<2x64xf32> to vector<2x32xf32>
    %428 = vector.extract_strided_slice %415 {offsets = [0, 32], sizes = [2, 32], strides = [1, 1]} : vector<2x64xf32> to vector<2x32xf32>
    %429 = arith.mulf %427, %428 : vector<2x32xf32>
    %c7_i32_170 = arith.constant 7 : i32
    %430 = arith.subi %c7_i32_170, %c4_i32 : i32
    %431 = arith.index_cast %430 : i32 to index
    %c0_171 = arith.constant 0 : index
    %c0_172 = arith.constant 0 : index
    %432 = vector.load %arg6[%431, %c0_171, %c0_172] : memref<8x2x32xf32, #tpu.memory_space<vmem>>, vector<1x2x32xf32>
    %433 = vector.shape_cast %432 : vector<1x2x32xf32> to vector<2x32xf32>
    %434 = vector.shape_cast %429 : vector<2x32xf32> to vector<1x2x32xf32>
    tpu.vector_store %arg6[%431, %c0_171, %c0_172], %434 {strides = array<i32>} : memref<8x2x32xf32, #tpu.memory_space<vmem>>, vector<1x2x32xf32>,
    %c5_i32 = arith.constant 5 : i32
    %c0_173 = arith.constant 0 : index
    %c0_174 = arith.constant 0 : index
    %435 = vector.load %arg7[%c0_173, %c0_174] : memref<2x64xf32, #tpu.memory_space<vmem>>, vector<2x64xf32>
    %c0_175 = arith.constant 0 : index
    %c0_176 = arith.constant 0 : index
    %436 = vector.load %arg9[%c0_175, %c0_176] : memref<2x64xf32, #tpu.memory_space<vmem>>, vector<2x64xf32>
    %437 = arith.index_cast %c5_i32 : i32 to index
    %c0_177 = arith.constant 0 : index
    %c0_178 = arith.constant 0 : index
    %438 = vector.load %arg1[%437, %c0_177, %c0_178] : memref<8x2x256xf32, #tpu.memory_space<vmem>>, vector<1x2x256xf32>
    %439 = vector.shape_cast %438 : vector<1x2x256xf32> to vector<2x256xf32>
    %440 = arith.truncf %435 : vector<2x64xf32> to vector<2x64xbf16>
    %cst_179 = arith.constant dense<0.000000e+00> : vector<2x256xf32>
    %441 = tpu.matmul %440, %3, %cst_179 {dimension_numbers = #tpu.dot_dimension_numbers<[1], [0], [0], [1], [0, 0, 1, 1], [], []>} : vector<2x64xbf16>, vector<64x256xbf16>, vector<2x256xf32> -> vector<2x256xf32>
    %442 = arith.addf %439, %441 : vector<2x256xf32>
    %c7_i32_180 = arith.constant 7 : i32
    %443 = arith.subi %c7_i32_180, %c5_i32 : i32
    %444 = arith.index_cast %443 : i32 to index
    %c0_181 = arith.constant 0 : index
    %c0_182 = arith.constant 0 : index
    %445 = vector.load %arg2[%444, %c0_181, %c0_182] : memref<8x2x256xf32, #tpu.memory_space<vmem>>, vector<1x2x256xf32>
    %446 = vector.shape_cast %445 : vector<1x2x256xf32> to vector<2x256xf32>
    %447 = arith.truncf %436 : vector<2x64xf32> to vector<2x64xbf16>
    %cst_183 = arith.constant dense<0.000000e+00> : vector<2x256xf32>
    %448 = tpu.matmul %447, %4, %cst_183 {dimension_numbers = #tpu.dot_dimension_numbers<[1], [0], [0], [1], [0, 0, 1, 1], [], []>} : vector<2x64xbf16>, vector<64x256xbf16>, vector<2x256xf32> -> vector<2x256xf32>
    %449 = arith.addf %446, %448 : vector<2x256xf32>
    %450 = vector.extract_strided_slice %442 {offsets = [0, 0], sizes = [2, 64], strides = [1, 1]} : vector<2x256xf32> to vector<2x64xf32>
    %451 = arith.negf %450 : vector<2x64xf32>
    %452 = math.exp %451 : vector<2x64xf32>
    %cst_184 = arith.constant 1.000000e+00 : f32
    %453 = vector.broadcast %cst_184 : f32 to vector<2x64xf32>
    %454 = arith.addf %453, %452 : vector<2x64xf32>
    %455 = arith.divf %453, %454 : vector<2x64xf32>
    %456 = vector.extract_strided_slice %442 {offsets = [0, 64], sizes = [2, 64], strides = [1, 1]} : vector<2x256xf32> to vector<2x64xf32>
    %457 = arith.negf %456 : vector<2x64xf32>
    %458 = math.exp %457 : vector<2x64xf32>
    %cst_185 = arith.constant 1.000000e+00 : f32
    %459 = vector.broadcast %cst_185 : f32 to vector<2x64xf32>
    %460 = arith.addf %459, %458 : vector<2x64xf32>
    %461 = arith.divf %459, %460 : vector<2x64xf32>
    %462 = vector.extract_strided_slice %442 {offsets = [0, 128], sizes = [2, 64], strides = [1, 1]} : vector<2x256xf32> to vector<2x64xf32>
    %463 = math.tanh %462 : vector<2x64xf32>
    %464 = vector.extract_strided_slice %442 {offsets = [0, 192], sizes = [2, 64], strides = [1, 1]} : vector<2x256xf32> to vector<2x64xf32>
    %465 = arith.negf %464 : vector<2x64xf32>
    %466 = math.exp %465 : vector<2x64xf32>
    %cst_186 = arith.constant 1.000000e+00 : f32
    %467 = vector.broadcast %cst_186 : f32 to vector<2x64xf32>
    %468 = arith.addf %467, %466 : vector<2x64xf32>
    %469 = arith.divf %467, %468 : vector<2x64xf32>
    %470 = vector.extract_strided_slice %449 {offsets = [0, 0], sizes = [2, 64], strides = [1, 1]} : vector<2x256xf32> to vector<2x64xf32>
    %471 = arith.negf %470 : vector<2x64xf32>
    %472 = math.exp %471 : vector<2x64xf32>
    %cst_187 = arith.constant 1.000000e+00 : f32
    %473 = vector.broadcast %cst_187 : f32 to vector<2x64xf32>
    %474 = arith.addf %473, %472 : vector<2x64xf32>
    %475 = arith.divf %473, %474 : vector<2x64xf32>
    %476 = vector.extract_strided_slice %449 {offsets = [0, 64], sizes = [2, 64], strides = [1, 1]} : vector<2x256xf32> to vector<2x64xf32>
    %477 = arith.negf %476 : vector<2x64xf32>
    %478 = math.exp %477 : vector<2x64xf32>
    %cst_188 = arith.constant 1.000000e+00 : f32
    %479 = vector.broadcast %cst_188 : f32 to vector<2x64xf32>
    %480 = arith.addf %479, %478 : vector<2x64xf32>
    %481 = arith.divf %479, %480 : vector<2x64xf32>
    %482 = vector.extract_strided_slice %449 {offsets = [0, 128], sizes = [2, 64], strides = [1, 1]} : vector<2x256xf32> to vector<2x64xf32>
    %483 = math.tanh %482 : vector<2x64xf32>
    %484 = vector.extract_strided_slice %449 {offsets = [0, 192], sizes = [2, 64], strides = [1, 1]} : vector<2x256xf32> to vector<2x64xf32>
    %485 = arith.negf %484 : vector<2x64xf32>
    %486 = math.exp %485 : vector<2x64xf32>
    %cst_189 = arith.constant 1.000000e+00 : f32
    %487 = vector.broadcast %cst_189 : f32 to vector<2x64xf32>
    %488 = arith.addf %487, %486 : vector<2x64xf32>
    %489 = arith.divf %487, %488 : vector<2x64xf32>
    %c0_190 = arith.constant 0 : index
    %c0_191 = arith.constant 0 : index
    %490 = vector.load %arg8[%c0_190, %c0_191] : memref<2x64xf32, #tpu.memory_space<vmem>>, vector<2x64xf32>
    %491 = arith.mulf %461, %490 : vector<2x64xf32>
    %492 = arith.mulf %455, %463 : vector<2x64xf32>
    %493 = arith.addf %491, %492 : vector<2x64xf32>
    %494 = math.tanh %493 : vector<2x64xf32>
    %495 = arith.mulf %469, %494 : vector<2x64xf32>
    %c0_192 = arith.constant 0 : index
    %c0_193 = arith.constant 0 : index
    %496 = vector.load %arg10[%c0_192, %c0_193] : memref<2x64xf32, #tpu.memory_space<vmem>>, vector<2x64xf32>
    %497 = arith.mulf %481, %496 : vector<2x64xf32>
    %498 = arith.mulf %475, %483 : vector<2x64xf32>
    %499 = arith.addf %497, %498 : vector<2x64xf32>
    %500 = math.tanh %499 : vector<2x64xf32>
    %501 = arith.mulf %489, %500 : vector<2x64xf32>
    %c0_194 = arith.constant 0 : index
    %c0_195 = arith.constant 0 : index
    %502 = vector.load %arg7[%c0_194, %c0_195] : memref<2x64xf32, #tpu.memory_space<vmem>>, vector<2x64xf32>
    tpu.vector_store %arg7[%c0_194, %c0_195], %495 {strides = array<i32>} : memref<2x64xf32, #tpu.memory_space<vmem>>, vector<2x64xf32>,
    %c0_196 = arith.constant 0 : index
    %c0_197 = arith.constant 0 : index
    %503 = vector.load %arg8[%c0_196, %c0_197] : memref<2x64xf32, #tpu.memory_space<vmem>>, vector<2x64xf32>
    tpu.vector_store %arg8[%c0_196, %c0_197], %493 {strides = array<i32>} : memref<2x64xf32, #tpu.memory_space<vmem>>, vector<2x64xf32>,
    %c0_198 = arith.constant 0 : index
    %c0_199 = arith.constant 0 : index
    %504 = vector.load %arg9[%c0_198, %c0_199] : memref<2x64xf32, #tpu.memory_space<vmem>>, vector<2x64xf32>
    tpu.vector_store %arg9[%c0_198, %c0_199], %501 {strides = array<i32>} : memref<2x64xf32, #tpu.memory_space<vmem>>, vector<2x64xf32>,
    %c0_200 = arith.constant 0 : index
    %c0_201 = arith.constant 0 : index
    %505 = vector.load %arg10[%c0_200, %c0_201] : memref<2x64xf32, #tpu.memory_space<vmem>>, vector<2x64xf32>
    tpu.vector_store %arg10[%c0_200, %c0_201], %499 {strides = array<i32>} : memref<2x64xf32, #tpu.memory_space<vmem>>, vector<2x64xf32>,
    %506 = vector.extract_strided_slice %495 {offsets = [0, 0], sizes = [2, 32], strides = [1, 1]} : vector<2x64xf32> to vector<2x32xf32>
    %507 = vector.extract_strided_slice %495 {offsets = [0, 32], sizes = [2, 32], strides = [1, 1]} : vector<2x64xf32> to vector<2x32xf32>
    %508 = arith.mulf %506, %507 : vector<2x32xf32>
    %509 = arith.index_cast %c5_i32 : i32 to index
    %c0_202 = arith.constant 0 : index
    %c0_203 = arith.constant 0 : index
    %510 = vector.load %arg5[%509, %c0_202, %c0_203] : memref<8x2x32xf32, #tpu.memory_space<vmem>>, vector<1x2x32xf32>
    %511 = vector.shape_cast %510 : vector<1x2x32xf32> to vector<2x32xf32>
    %512 = vector.shape_cast %508 : vector<2x32xf32> to vector<1x2x32xf32>
    tpu.vector_store %arg5[%509, %c0_202, %c0_203], %512 {strides = array<i32>} : memref<8x2x32xf32, #tpu.memory_space<vmem>>, vector<1x2x32xf32>,
    %513 = vector.extract_strided_slice %501 {offsets = [0, 0], sizes = [2, 32], strides = [1, 1]} : vector<2x64xf32> to vector<2x32xf32>
    %514 = vector.extract_strided_slice %501 {offsets = [0, 32], sizes = [2, 32], strides = [1, 1]} : vector<2x64xf32> to vector<2x32xf32>
    %515 = arith.mulf %513, %514 : vector<2x32xf32>
    %c7_i32_204 = arith.constant 7 : i32
    %516 = arith.subi %c7_i32_204, %c5_i32 : i32
    %517 = arith.index_cast %516 : i32 to index
    %c0_205 = arith.constant 0 : index
    %c0_206 = arith.constant 0 : index
    %518 = vector.load %arg6[%517, %c0_205, %c0_206] : memref<8x2x32xf32, #tpu.memory_space<vmem>>, vector<1x2x32xf32>
    %519 = vector.shape_cast %518 : vector<1x2x32xf32> to vector<2x32xf32>
    %520 = vector.shape_cast %515 : vector<2x32xf32> to vector<1x2x32xf32>
    tpu.vector_store %arg6[%517, %c0_205, %c0_206], %520 {strides = array<i32>} : memref<8x2x32xf32, #tpu.memory_space<vmem>>, vector<1x2x32xf32>,
    %c6_i32 = arith.constant 6 : i32
    %c0_207 = arith.constant 0 : index
    %c0_208 = arith.constant 0 : index
    %521 = vector.load %arg7[%c0_207, %c0_208] : memref<2x64xf32, #tpu.memory_space<vmem>>, vector<2x64xf32>
    %c0_209 = arith.constant 0 : index
    %c0_210 = arith.constant 0 : index
    %522 = vector.load %arg9[%c0_209, %c0_210] : memref<2x64xf32, #tpu.memory_space<vmem>>, vector<2x64xf32>
    %523 = arith.index_cast %c6_i32 : i32 to index
    %c0_211 = arith.constant 0 : index
    %c0_212 = arith.constant 0 : index
    %524 = vector.load %arg1[%523, %c0_211, %c0_212] : memref<8x2x256xf32, #tpu.memory_space<vmem>>, vector<1x2x256xf32>
    %525 = vector.shape_cast %524 : vector<1x2x256xf32> to vector<2x256xf32>
    %526 = arith.truncf %521 : vector<2x64xf32> to vector<2x64xbf16>
    %cst_213 = arith.constant dense<0.000000e+00> : vector<2x256xf32>
    %527 = tpu.matmul %526, %3, %cst_213 {dimension_numbers = #tpu.dot_dimension_numbers<[1], [0], [0], [1], [0, 0, 1, 1], [], []>} : vector<2x64xbf16>, vector<64x256xbf16>, vector<2x256xf32> -> vector<2x256xf32>
    %528 = arith.addf %525, %527 : vector<2x256xf32>
    %c7_i32_214 = arith.constant 7 : i32
    %529 = arith.subi %c7_i32_214, %c6_i32 : i32
    %530 = arith.index_cast %529 : i32 to index
    %c0_215 = arith.constant 0 : index
    %c0_216 = arith.constant 0 : index
    %531 = vector.load %arg2[%530, %c0_215, %c0_216] : memref<8x2x256xf32, #tpu.memory_space<vmem>>, vector<1x2x256xf32>
    %532 = vector.shape_cast %531 : vector<1x2x256xf32> to vector<2x256xf32>
    %533 = arith.truncf %522 : vector<2x64xf32> to vector<2x64xbf16>
    %cst_217 = arith.constant dense<0.000000e+00> : vector<2x256xf32>
    %534 = tpu.matmul %533, %4, %cst_217 {dimension_numbers = #tpu.dot_dimension_numbers<[1], [0], [0], [1], [0, 0, 1, 1], [], []>} : vector<2x64xbf16>, vector<64x256xbf16>, vector<2x256xf32> -> vector<2x256xf32>
    %535 = arith.addf %532, %534 : vector<2x256xf32>
    %536 = vector.extract_strided_slice %528 {offsets = [0, 0], sizes = [2, 64], strides = [1, 1]} : vector<2x256xf32> to vector<2x64xf32>
    %537 = arith.negf %536 : vector<2x64xf32>
    %538 = math.exp %537 : vector<2x64xf32>
    %cst_218 = arith.constant 1.000000e+00 : f32
    %539 = vector.broadcast %cst_218 : f32 to vector<2x64xf32>
    %540 = arith.addf %539, %538 : vector<2x64xf32>
    %541 = arith.divf %539, %540 : vector<2x64xf32>
    %542 = vector.extract_strided_slice %528 {offsets = [0, 64], sizes = [2, 64], strides = [1, 1]} : vector<2x256xf32> to vector<2x64xf32>
    %543 = arith.negf %542 : vector<2x64xf32>
    %544 = math.exp %543 : vector<2x64xf32>
    %cst_219 = arith.constant 1.000000e+00 : f32
    %545 = vector.broadcast %cst_219 : f32 to vector<2x64xf32>
    %546 = arith.addf %545, %544 : vector<2x64xf32>
    %547 = arith.divf %545, %546 : vector<2x64xf32>
    %548 = vector.extract_strided_slice %528 {offsets = [0, 128], sizes = [2, 64], strides = [1, 1]} : vector<2x256xf32> to vector<2x64xf32>
    %549 = math.tanh %548 : vector<2x64xf32>
    %550 = vector.extract_strided_slice %528 {offsets = [0, 192], sizes = [2, 64], strides = [1, 1]} : vector<2x256xf32> to vector<2x64xf32>
    %551 = arith.negf %550 : vector<2x64xf32>
    %552 = math.exp %551 : vector<2x64xf32>
    %cst_220 = arith.constant 1.000000e+00 : f32
    %553 = vector.broadcast %cst_220 : f32 to vector<2x64xf32>
    %554 = arith.addf %553, %552 : vector<2x64xf32>
    %555 = arith.divf %553, %554 : vector<2x64xf32>
    %556 = vector.extract_strided_slice %535 {offsets = [0, 0], sizes = [2, 64], strides = [1, 1]} : vector<2x256xf32> to vector<2x64xf32>
    %557 = arith.negf %556 : vector<2x64xf32>
    %558 = math.exp %557 : vector<2x64xf32>
    %cst_221 = arith.constant 1.000000e+00 : f32
    %559 = vector.broadcast %cst_221 : f32 to vector<2x64xf32>
    %560 = arith.addf %559, %558 : vector<2x64xf32>
    %561 = arith.divf %559, %560 : vector<2x64xf32>
    %562 = vector.extract_strided_slice %535 {offsets = [0, 64], sizes = [2, 64], strides = [1, 1]} : vector<2x256xf32> to vector<2x64xf32>
    %563 = arith.negf %562 : vector<2x64xf32>
    %564 = math.exp %563 : vector<2x64xf32>
    %cst_222 = arith.constant 1.000000e+00 : f32
    %565 = vector.broadcast %cst_222 : f32 to vector<2x64xf32>
    %566 = arith.addf %565, %564 : vector<2x64xf32>
    %567 = arith.divf %565, %566 : vector<2x64xf32>
    %568 = vector.extract_strided_slice %535 {offsets = [0, 128], sizes = [2, 64], strides = [1, 1]} : vector<2x256xf32> to vector<2x64xf32>
    %569 = math.tanh %568 : vector<2x64xf32>
    %570 = vector.extract_strided_slice %535 {offsets = [0, 192], sizes = [2, 64], strides = [1, 1]} : vector<2x256xf32> to vector<2x64xf32>
    %571 = arith.negf %570 : vector<2x64xf32>
    %572 = math.exp %571 : vector<2x64xf32>
    %cst_223 = arith.constant 1.000000e+00 : f32
    %573 = vector.broadcast %cst_223 : f32 to vector<2x64xf32>
    %574 = arith.addf %573, %572 : vector<2x64xf32>
    %575 = arith.divf %573, %574 : vector<2x64xf32>
    %c0_224 = arith.constant 0 : index
    %c0_225 = arith.constant 0 : index
    %576 = vector.load %arg8[%c0_224, %c0_225] : memref<2x64xf32, #tpu.memory_space<vmem>>, vector<2x64xf32>
    %577 = arith.mulf %547, %576 : vector<2x64xf32>
    %578 = arith.mulf %541, %549 : vector<2x64xf32>
    %579 = arith.addf %577, %578 : vector<2x64xf32>
    %580 = math.tanh %579 : vector<2x64xf32>
    %581 = arith.mulf %555, %580 : vector<2x64xf32>
    %c0_226 = arith.constant 0 : index
    %c0_227 = arith.constant 0 : index
    %582 = vector.load %arg10[%c0_226, %c0_227] : memref<2x64xf32, #tpu.memory_space<vmem>>, vector<2x64xf32>
    %583 = arith.mulf %567, %582 : vector<2x64xf32>
    %584 = arith.mulf %561, %569 : vector<2x64xf32>
    %585 = arith.addf %583, %584 : vector<2x64xf32>
    %586 = math.tanh %585 : vector<2x64xf32>
    %587 = arith.mulf %575, %586 : vector<2x64xf32>
    %c0_228 = arith.constant 0 : index
    %c0_229 = arith.constant 0 : index
    %588 = vector.load %arg7[%c0_228, %c0_229] : memref<2x64xf32, #tpu.memory_space<vmem>>, vector<2x64xf32>
    tpu.vector_store %arg7[%c0_228, %c0_229], %581 {strides = array<i32>} : memref<2x64xf32, #tpu.memory_space<vmem>>, vector<2x64xf32>,
    %c0_230 = arith.constant 0 : index
    %c0_231 = arith.constant 0 : index
    %589 = vector.load %arg8[%c0_230, %c0_231] : memref<2x64xf32, #tpu.memory_space<vmem>>, vector<2x64xf32>
    tpu.vector_store %arg8[%c0_230, %c0_231], %579 {strides = array<i32>} : memref<2x64xf32, #tpu.memory_space<vmem>>, vector<2x64xf32>,
    %c0_232 = arith.constant 0 : index
    %c0_233 = arith.constant 0 : index
    %590 = vector.load %arg9[%c0_232, %c0_233] : memref<2x64xf32, #tpu.memory_space<vmem>>, vector<2x64xf32>
    tpu.vector_store %arg9[%c0_232, %c0_233], %587 {strides = array<i32>} : memref<2x64xf32, #tpu.memory_space<vmem>>, vector<2x64xf32>,
    %c0_234 = arith.constant 0 : index
    %c0_235 = arith.constant 0 : index
    %591 = vector.load %arg10[%c0_234, %c0_235] : memref<2x64xf32, #tpu.memory_space<vmem>>, vector<2x64xf32>
    tpu.vector_store %arg10[%c0_234, %c0_235], %585 {strides = array<i32>} : memref<2x64xf32, #tpu.memory_space<vmem>>, vector<2x64xf32>,
    %592 = vector.extract_strided_slice %581 {offsets = [0, 0], sizes = [2, 32], strides = [1, 1]} : vector<2x64xf32> to vector<2x32xf32>
    %593 = vector.extract_strided_slice %581 {offsets = [0, 32], sizes = [2, 32], strides = [1, 1]} : vector<2x64xf32> to vector<2x32xf32>
    %594 = arith.mulf %592, %593 : vector<2x32xf32>
    %595 = arith.index_cast %c6_i32 : i32 to index
    %c0_236 = arith.constant 0 : index
    %c0_237 = arith.constant 0 : index
    %596 = vector.load %arg5[%595, %c0_236, %c0_237] : memref<8x2x32xf32, #tpu.memory_space<vmem>>, vector<1x2x32xf32>
    %597 = vector.shape_cast %596 : vector<1x2x32xf32> to vector<2x32xf32>
    %598 = vector.shape_cast %594 : vector<2x32xf32> to vector<1x2x32xf32>
    tpu.vector_store %arg5[%595, %c0_236, %c0_237], %598 {strides = array<i32>} : memref<8x2x32xf32, #tpu.memory_space<vmem>>, vector<1x2x32xf32>,
    %599 = vector.extract_strided_slice %587 {offsets = [0, 0], sizes = [2, 32], strides = [1, 1]} : vector<2x64xf32> to vector<2x32xf32>
    %600 = vector.extract_strided_slice %587 {offsets = [0, 32], sizes = [2, 32], strides = [1, 1]} : vector<2x64xf32> to vector<2x32xf32>
    %601 = arith.mulf %599, %600 : vector<2x32xf32>
    %c7_i32_238 = arith.constant 7 : i32
    %602 = arith.subi %c7_i32_238, %c6_i32 : i32
    %603 = arith.index_cast %602 : i32 to index
    %c0_239 = arith.constant 0 : index
    %c0_240 = arith.constant 0 : index
    %604 = vector.load %arg6[%603, %c0_239, %c0_240] : memref<8x2x32xf32, #tpu.memory_space<vmem>>, vector<1x2x32xf32>
    %605 = vector.shape_cast %604 : vector<1x2x32xf32> to vector<2x32xf32>
    %606 = vector.shape_cast %601 : vector<2x32xf32> to vector<1x2x32xf32>
    tpu.vector_store %arg6[%603, %c0_239, %c0_240], %606 {strides = array<i32>} : memref<8x2x32xf32, #tpu.memory_space<vmem>>, vector<1x2x32xf32>,
    %c7_i32_241 = arith.constant 7 : i32
    %c0_242 = arith.constant 0 : index
    %c0_243 = arith.constant 0 : index
    %607 = vector.load %arg7[%c0_242, %c0_243] : memref<2x64xf32, #tpu.memory_space<vmem>>, vector<2x64xf32>
    %c0_244 = arith.constant 0 : index
    %c0_245 = arith.constant 0 : index
    %608 = vector.load %arg9[%c0_244, %c0_245] : memref<2x64xf32, #tpu.memory_space<vmem>>, vector<2x64xf32>
    %609 = arith.index_cast %c7_i32_241 : i32 to index
    %c0_246 = arith.constant 0 : index
    %c0_247 = arith.constant 0 : index
    %610 = vector.load %arg1[%609, %c0_246, %c0_247] : memref<8x2x256xf32, #tpu.memory_space<vmem>>, vector<1x2x256xf32>
    %611 = vector.shape_cast %610 : vector<1x2x256xf32> to vector<2x256xf32>
    %612 = arith.truncf %607 : vector<2x64xf32> to vector<2x64xbf16>
    %cst_248 = arith.constant dense<0.000000e+00> : vector<2x256xf32>
    %613 = tpu.matmul %612, %3, %cst_248 {dimension_numbers = #tpu.dot_dimension_numbers<[1], [0], [0], [1], [0, 0, 1, 1], [], []>} : vector<2x64xbf16>, vector<64x256xbf16>, vector<2x256xf32> -> vector<2x256xf32>
    %614 = arith.addf %611, %613 : vector<2x256xf32>
    %c7_i32_249 = arith.constant 7 : i32
    %615 = arith.subi %c7_i32_249, %c7_i32_241 : i32
    %616 = arith.index_cast %615 : i32 to index
    %c0_250 = arith.constant 0 : index
    %c0_251 = arith.constant 0 : index
    %617 = vector.load %arg2[%616, %c0_250, %c0_251] : memref<8x2x256xf32, #tpu.memory_space<vmem>>, vector<1x2x256xf32>
    %618 = vector.shape_cast %617 : vector<1x2x256xf32> to vector<2x256xf32>
    %619 = arith.truncf %608 : vector<2x64xf32> to vector<2x64xbf16>
    %cst_252 = arith.constant dense<0.000000e+00> : vector<2x256xf32>
    %620 = tpu.matmul %619, %4, %cst_252 {dimension_numbers = #tpu.dot_dimension_numbers<[1], [0], [0], [1], [0, 0, 1, 1], [], []>} : vector<2x64xbf16>, vector<64x256xbf16>, vector<2x256xf32> -> vector<2x256xf32>
    %621 = arith.addf %618, %620 : vector<2x256xf32>
    %622 = vector.extract_strided_slice %614 {offsets = [0, 0], sizes = [2, 64], strides = [1, 1]} : vector<2x256xf32> to vector<2x64xf32>
    %623 = arith.negf %622 : vector<2x64xf32>
    %624 = math.exp %623 : vector<2x64xf32>
    %cst_253 = arith.constant 1.000000e+00 : f32
    %625 = vector.broadcast %cst_253 : f32 to vector<2x64xf32>
    %626 = arith.addf %625, %624 : vector<2x64xf32>
    %627 = arith.divf %625, %626 : vector<2x64xf32>
    %628 = vector.extract_strided_slice %614 {offsets = [0, 64], sizes = [2, 64], strides = [1, 1]} : vector<2x256xf32> to vector<2x64xf32>
    %629 = arith.negf %628 : vector<2x64xf32>
    %630 = math.exp %629 : vector<2x64xf32>
    %cst_254 = arith.constant 1.000000e+00 : f32
    %631 = vector.broadcast %cst_254 : f32 to vector<2x64xf32>
    %632 = arith.addf %631, %630 : vector<2x64xf32>
    %633 = arith.divf %631, %632 : vector<2x64xf32>
    %634 = vector.extract_strided_slice %614 {offsets = [0, 128], sizes = [2, 64], strides = [1, 1]} : vector<2x256xf32> to vector<2x64xf32>
    %635 = math.tanh %634 : vector<2x64xf32>
    %636 = vector.extract_strided_slice %614 {offsets = [0, 192], sizes = [2, 64], strides = [1, 1]} : vector<2x256xf32> to vector<2x64xf32>
    %637 = arith.negf %636 : vector<2x64xf32>
    %638 = math.exp %637 : vector<2x64xf32>
    %cst_255 = arith.constant 1.000000e+00 : f32
    %639 = vector.broadcast %cst_255 : f32 to vector<2x64xf32>
    %640 = arith.addf %639, %638 : vector<2x64xf32>
    %641 = arith.divf %639, %640 : vector<2x64xf32>
    %642 = vector.extract_strided_slice %621 {offsets = [0, 0], sizes = [2, 64], strides = [1, 1]} : vector<2x256xf32> to vector<2x64xf32>
    %643 = arith.negf %642 : vector<2x64xf32>
    %644 = math.exp %643 : vector<2x64xf32>
    %cst_256 = arith.constant 1.000000e+00 : f32
    %645 = vector.broadcast %cst_256 : f32 to vector<2x64xf32>
    %646 = arith.addf %645, %644 : vector<2x64xf32>
    %647 = arith.divf %645, %646 : vector<2x64xf32>
    %648 = vector.extract_strided_slice %621 {offsets = [0, 64], sizes = [2, 64], strides = [1, 1]} : vector<2x256xf32> to vector<2x64xf32>
    %649 = arith.negf %648 : vector<2x64xf32>
    %650 = math.exp %649 : vector<2x64xf32>
    %cst_257 = arith.constant 1.000000e+00 : f32
    %651 = vector.broadcast %cst_257 : f32 to vector<2x64xf32>
    %652 = arith.addf %651, %650 : vector<2x64xf32>
    %653 = arith.divf %651, %652 : vector<2x64xf32>
    %654 = vector.extract_strided_slice %621 {offsets = [0, 128], sizes = [2, 64], strides = [1, 1]} : vector<2x256xf32> to vector<2x64xf32>
    %655 = math.tanh %654 : vector<2x64xf32>
    %656 = vector.extract_strided_slice %621 {offsets = [0, 192], sizes = [2, 64], strides = [1, 1]} : vector<2x256xf32> to vector<2x64xf32>
    %657 = arith.negf %656 : vector<2x64xf32>
    %658 = math.exp %657 : vector<2x64xf32>
    %cst_258 = arith.constant 1.000000e+00 : f32
    %659 = vector.broadcast %cst_258 : f32 to vector<2x64xf32>
    %660 = arith.addf %659, %658 : vector<2x64xf32>
    %661 = arith.divf %659, %660 : vector<2x64xf32>
    %c0_259 = arith.constant 0 : index
    %c0_260 = arith.constant 0 : index
    %662 = vector.load %arg8[%c0_259, %c0_260] : memref<2x64xf32, #tpu.memory_space<vmem>>, vector<2x64xf32>
    %663 = arith.mulf %633, %662 : vector<2x64xf32>
    %664 = arith.mulf %627, %635 : vector<2x64xf32>
    %665 = arith.addf %663, %664 : vector<2x64xf32>
    %666 = math.tanh %665 : vector<2x64xf32>
    %667 = arith.mulf %641, %666 : vector<2x64xf32>
    %c0_261 = arith.constant 0 : index
    %c0_262 = arith.constant 0 : index
    %668 = vector.load %arg10[%c0_261, %c0_262] : memref<2x64xf32, #tpu.memory_space<vmem>>, vector<2x64xf32>
    %669 = arith.mulf %653, %668 : vector<2x64xf32>
    %670 = arith.mulf %647, %655 : vector<2x64xf32>
    %671 = arith.addf %669, %670 : vector<2x64xf32>
    %672 = math.tanh %671 : vector<2x64xf32>
    %673 = arith.mulf %661, %672 : vector<2x64xf32>
    %c0_263 = arith.constant 0 : index
    %c0_264 = arith.constant 0 : index
    %674 = vector.load %arg7[%c0_263, %c0_264] : memref<2x64xf32, #tpu.memory_space<vmem>>, vector<2x64xf32>
    tpu.vector_store %arg7[%c0_263, %c0_264], %667 {strides = array<i32>} : memref<2x64xf32, #tpu.memory_space<vmem>>, vector<2x64xf32>,
    %c0_265 = arith.constant 0 : index
    %c0_266 = arith.constant 0 : index
    %675 = vector.load %arg8[%c0_265, %c0_266] : memref<2x64xf32, #tpu.memory_space<vmem>>, vector<2x64xf32>
    tpu.vector_store %arg8[%c0_265, %c0_266], %665 {strides = array<i32>} : memref<2x64xf32, #tpu.memory_space<vmem>>, vector<2x64xf32>,
    %c0_267 = arith.constant 0 : index
    %c0_268 = arith.constant 0 : index
    %676 = vector.load %arg9[%c0_267, %c0_268] : memref<2x64xf32, #tpu.memory_space<vmem>>, vector<2x64xf32>
    tpu.vector_store %arg9[%c0_267, %c0_268], %673 {strides = array<i32>} : memref<2x64xf32, #tpu.memory_space<vmem>>, vector<2x64xf32>,
    %c0_269 = arith.constant 0 : index
    %c0_270 = arith.constant 0 : index
    %677 = vector.load %arg10[%c0_269, %c0_270] : memref<2x64xf32, #tpu.memory_space<vmem>>, vector<2x64xf32>
    tpu.vector_store %arg10[%c0_269, %c0_270], %671 {strides = array<i32>} : memref<2x64xf32, #tpu.memory_space<vmem>>, vector<2x64xf32>,
    %678 = vector.extract_strided_slice %667 {offsets = [0, 0], sizes = [2, 32], strides = [1, 1]} : vector<2x64xf32> to vector<2x32xf32>
    %679 = vector.extract_strided_slice %667 {offsets = [0, 32], sizes = [2, 32], strides = [1, 1]} : vector<2x64xf32> to vector<2x32xf32>
    %680 = arith.mulf %678, %679 : vector<2x32xf32>
    %681 = arith.index_cast %c7_i32_241 : i32 to index
    %c0_271 = arith.constant 0 : index
    %c0_272 = arith.constant 0 : index
    %682 = vector.load %arg5[%681, %c0_271, %c0_272] : memref<8x2x32xf32, #tpu.memory_space<vmem>>, vector<1x2x32xf32>
    %683 = vector.shape_cast %682 : vector<1x2x32xf32> to vector<2x32xf32>
    %684 = vector.shape_cast %680 : vector<2x32xf32> to vector<1x2x32xf32>
    tpu.vector_store %arg5[%681, %c0_271, %c0_272], %684 {strides = array<i32>} : memref<8x2x32xf32, #tpu.memory_space<vmem>>, vector<1x2x32xf32>,
    %685 = vector.extract_strided_slice %673 {offsets = [0, 0], sizes = [2, 32], strides = [1, 1]} : vector<2x64xf32> to vector<2x32xf32>
    %686 = vector.extract_strided_slice %673 {offsets = [0, 32], sizes = [2, 32], strides = [1, 1]} : vector<2x64xf32> to vector<2x32xf32>
    %687 = arith.mulf %685, %686 : vector<2x32xf32>
    %c7_i32_273 = arith.constant 7 : i32
    %688 = arith.subi %c7_i32_273, %c7_i32_241 : i32
    %689 = arith.index_cast %688 : i32 to index
    %c0_274 = arith.constant 0 : index
    %c0_275 = arith.constant 0 : index
    %690 = vector.load %arg6[%689, %c0_274, %c0_275] : memref<8x2x32xf32, #tpu.memory_space<vmem>>, vector<1x2x32xf32>
    %691 = vector.shape_cast %690 : vector<1x2x32xf32> to vector<2x32xf32>
    %692 = vector.shape_cast %687 : vector<2x32xf32> to vector<1x2x32xf32>
    tpu.vector_store %arg6[%689, %c0_274, %c0_275], %692 {strides = array<i32>} : memref<8x2x32xf32, #tpu.memory_space<vmem>>, vector<1x2x32xf32>,
    %c8_i32 = arith.constant 8 : i32
    return
  }
  func.func @transform_0(%arg0: i32) -> (i32, i32, i32) {
    %c0_i32 = arith.constant 0 : i32
    %c0_i32_0 = arith.constant 0 : i32
    %c0_i32_1 = arith.constant 0 : i32
    return %arg0, %c0_i32, %c0_i32_0 : i32, i32, i32
  }
  func.func @transform_1(%arg0: i32) -> (i32, i32, i32) {
    %c0_i32 = arith.constant 0 : i32
    %0 = arith.subi %c0_i32, %arg0 : i32
    %c0_i32_0 = arith.constant 0 : i32
    %c1_i32 = arith.constant 1 : i32
    %c0_i32_1 = arith.constant 0 : i32
    return %0, %c0_i32_0, %c1_i32 : i32, i32, i32
  }
  func.func @transform_2(%arg0: i32) -> (i32, i32) {
    %c0_i32 = arith.constant 0 : i32
    %c0_i32_0 = arith.constant 0 : i32
    %c0_i32_1 = arith.constant 0 : i32
    return %c0_i32, %c0_i32_0 : i32, i32
  }
  func.func @transform_3(%arg0: i32) -> (i32, i32) {
    %c0_i32 = arith.constant 0 : i32
    %c0_i32_0 = arith.constant 0 : i32
    %c0_i32_1 = arith.constant 0 : i32
    return %c0_i32, %c0_i32_0 : i32, i32
  }
  func.func @transform_4(%arg0: i32) -> (i32, i32, i32) {
    %c0_i32 = arith.constant 0 : i32
    %c0_i32_0 = arith.constant 0 : i32
    %c0_i32_1 = arith.constant 0 : i32
    return %arg0, %c0_i32, %c0_i32_0 : i32, i32, i32
  }
  func.func @transform_5(%arg0: i32) -> (i32, i32, i32) {
    %c0_i32 = arith.constant 0 : i32
    %0 = arith.subi %c0_i32, %arg0 : i32
    %c0_i32_0 = arith.constant 0 : i32
    %c0_i32_1 = arith.constant 0 : i32
    %c0_i32_2 = arith.constant 0 : i32
    return %0, %c0_i32_0, %c0_i32_1 : i32, i32, i32
  }
}

module attributes {stable_mosaic.version = 11 : i64} {
  func.func @_out_proj_kernel(%arg0: i32, %arg1: memref<16x32xf32, #tpu.memory_space<vmem>>, %arg2: memref<16x32xf32, #tpu.memory_space<vmem>>, %arg3: memref<16x32xf32, #tpu.memory_space<vmem>>, %arg4: memref<96x32xbf16, #tpu.memory_space<vmem>>, %arg5: memref<1x32xf32, #tpu.memory_space<vmem>>, %arg6: memref<16x32xf32, #tpu.memory_space<vmem>>) attributes {dimension_semantics = [#tpu.dimension_semantics<parallel>], iteration_bounds = array<i64: 1>, scalar_prefetch = 0 : i64, scratch_operands = 0 : i64, tpu.core_type = #tpu.core_type<tc>, window_params = [{transform_indices = @transform_0, window_bounds = array<i64: 16, 32>}, {transform_indices = @transform_1, window_bounds = array<i64: 16, 32>}, {transform_indices = @transform_2, window_bounds = array<i64: 16, 32>}, {pipeline_mode = #tpu.pipeline_mode<synchronous>, transform_indices = @transform_3, window_bounds = array<i64: 96, 32>}, {pipeline_mode = #tpu.pipeline_mode<synchronous>, transform_indices = @transform_4, window_bounds = array<i64: 1, 32>}, {transform_indices = @transform_5, window_bounds = array<i64: 16, 32>}]} {
    %c0 = arith.constant 0 : index
    %c0_0 = arith.constant 0 : index
    %0 = vector.load %arg1[%c0, %c0_0] : memref<16x32xf32, #tpu.memory_space<vmem>>, vector<16x32xf32>
    %c0_1 = arith.constant 0 : index
    %c0_2 = arith.constant 0 : index
    %1 = vector.load %arg2[%c0_1, %c0_2] : memref<16x32xf32, #tpu.memory_space<vmem>>, vector<16x32xf32>
    %c0_3 = arith.constant 0 : index
    %c0_4 = arith.constant 0 : index
    %2 = vector.load %arg3[%c0_3, %c0_4] : memref<16x32xf32, #tpu.memory_space<vmem>>, vector<16x32xf32>
    %3 = tpu.concatenate %0, %1, %2 in 1 : vector<16x32xf32>, vector<16x32xf32>, vector<16x32xf32> -> vector<16x96xf32>
    %4 = arith.truncf %3 : vector<16x96xf32> to vector<16x96xbf16>
    %c0_5 = arith.constant 0 : index
    %c0_6 = arith.constant 0 : index
    %5 = vector.load %arg4[%c0_5, %c0_6] : memref<96x32xbf16, #tpu.memory_space<vmem>>, vector<96x32xbf16>
    %cst = arith.constant dense<0.000000e+00> : vector<16x32xf32>
    %6 = tpu.matmul %4, %5, %cst {dimension_numbers = #tpu.dot_dimension_numbers<[1], [0], [0], [1], [0, 0, 1, 1], [], []>} : vector<16x96xbf16>, vector<96x32xbf16>, vector<16x32xf32> -> vector<16x32xf32>
    %c0_7 = arith.constant 0 : index
    %c0_8 = arith.constant 0 : index
    %7 = vector.load %arg5[%c0_7, %c0_8] : memref<1x32xf32, #tpu.memory_space<vmem>>, vector<1x32xf32>
    %8 = vector.broadcast %7 : vector<1x32xf32> to vector<16x32xf32>
    %9 = arith.addf %6, %8 : vector<16x32xf32>
    %c0_9 = arith.constant 0 : index
    %c0_10 = arith.constant 0 : index
    %10 = vector.load %arg6[%c0_9, %c0_10] : memref<16x32xf32, #tpu.memory_space<vmem>>, vector<16x32xf32>
    tpu.vector_store %arg6[%c0_9, %c0_10], %9 {strides = array<i32>} : memref<16x32xf32, #tpu.memory_space<vmem>>, vector<16x32xf32>,
    return
  }
  func.func @transform_0(%arg0: i32) -> (i32, i32) {
    %c0_i32 = arith.constant 0 : i32
    %c0_i32_0 = arith.constant 0 : i32
    return %arg0, %c0_i32 : i32, i32
  }
  func.func @transform_1(%arg0: i32) -> (i32, i32) {
    %c0_i32 = arith.constant 0 : i32
    %c0_i32_0 = arith.constant 0 : i32
    return %arg0, %c0_i32 : i32, i32
  }
  func.func @transform_2(%arg0: i32) -> (i32, i32) {
    %c0_i32 = arith.constant 0 : i32
    %c0_i32_0 = arith.constant 0 : i32
    return %arg0, %c0_i32 : i32, i32
  }
  func.func @transform_3(%arg0: i32) -> (i32, i32) {
    %c0_i32 = arith.constant 0 : i32
    %c0_i32_0 = arith.constant 0 : i32
    %c0_i32_1 = arith.constant 0 : i32
    return %c0_i32, %c0_i32_0 : i32, i32
  }
  func.func @transform_4(%arg0: i32) -> (i32, i32) {
    %c0_i32 = arith.constant 0 : i32
    %c0_i32_0 = arith.constant 0 : i32
    %c0_i32_1 = arith.constant 0 : i32
    return %c0_i32, %c0_i32_0 : i32, i32
  }
  func.func @transform_5(%arg0: i32) -> (i32, i32) {
    %c0_i32 = arith.constant 0 : i32
    %c0_i32_0 = arith.constant 0 : i32
    return %arg0, %c0_i32 : i32, i32
  }
}

</mosaic_0001>

<bundles_post_ra>
// kernel: _lambda_.3
= control target key start
LH: loop header
LB: loop body
LE: loop exit
PB: predicated region body
PF: predicated region fallthrough
CT: control target
= control target key end

     0   :  { %8 = vsyncpa [#allocation3], 0  ;;  %s238_s15 = smov [#allocation2]   ;;  %s239_s17 = smov 256   ;;  %s297_s0 = inlined_call_operand.vmem [shape: f32[16,32], index: 0, kind: input, shape index: {}]   ;;  %s298_s1 = inlined_call_operand.hbm [shape: bf16[32,512], index: 1, kind: input, shape index: {}]   ;;  %s299_s2 = inlined_call_operand.vmem [shape: f32[1,512], index: 2, kind: input, shape index: {}]   ;;  %s300_s3 = inlined_call_operand.vmem [shape: f32[16,512], index: 3, kind: output, shape index: {}]  }
   0x1   :  { %s15_s14 = sshll.u32 %s298_s1, 4  ;;  %s17_s16 = sshll.u32 %s238_s15, 4  ;;  %s16_s14 = int_to_ptr.hbm [resolvable:$true] %s15_s14  ;;  %s18_s16 = int_to_ptr.vmem [resolvable:$true] %s17_s16 }
   0x2   :  { %s240_s18 = smov 16  }
   0x3   :  { %23 = dma.hbm_to_vmem [thread:$0]  %s16_s14, 1024, %s18_s16, [#allocation3], %s239_s17, %s239_s17, %s240_s18  }
   0x4   :  { %236 = dma.done.wait [#allocation3], 1024  }
   0x5   :  { %237 = vsyncadd [#allocation3], 4294966272  ;;  %v183_v0 = vld [vmem:[#allocation2 + $0x20] sm:$0xf]  ;;  %v207_v1 = vld [vmem:[#allocation2 + $0x2c] sm:$0xf0] }
   0x6   :  { %v205_v2 = vld [vmem:[#allocation2 + $0x24] sm:$0xf]  ;;  %v184_v3 = vor.u32 %v207_v1, %v183_v0  ;;  %v185_v4 = vld [vmem:[#allocation2 + $0x30] sm:$0xf0]  ;;  %v191_v5 = vld [vmem:[#allocation2 + $0x28] sm:$0xf] }
   0x7   :  { %v208_v6 = vld [vmem:[#allocation2 + $0x34] sm:$0xf0]  ;;  %v188_v7 = vor.u32 %v205_v2, %v185_v4  ;;  %v206_v9 = vld [vmem:[#allocation2 + $0x2c] sm:$0xf]  ;;  %v193_v10 = vld [vmem:[#allocation2 + $0x38] sm:$0xf0] }
   0x8   :  { %v192_v8 = vor.u32 %v208_v6, %v191_v5  ;;  %v167_v11 = vld [vmem:[#allocation2] sm:$0xf]  ;;  %102 = vmatpush.bf16.msra.mxu0 %v184_v3  ;;  %v196_v12 = vor.u32 %v206_v9, %v193_v10  ;;  %v203_v13 = vld [vmem:[#allocation2 + $0xc] sm:$0xf0]  ;;  %v201_v14 = vld [vmem:[#allocation2 + $0x4] sm:$0xf] }
   0x9   :  { %v169_v15 = vld [vmem:[#allocation2 + $0x10] sm:$0xf0]  ;;  %116 = vmatpush.bf16.msra.mxu1 %v188_v7  ;;  %v168_v16 = vor.u32 %v203_v13, %v167_v11  ;;  %v175_v18 = vld [vmem:[#allocation2 + $0x8] sm:$0xf]  ;;  %v204_v19 = vld [vmem:[#allocation2 + $0x14] sm:$0xf0] }
   0xa   :  { %130 = vmatpush.bf16.msra.mxu2 %v192_v8  ;;  %v172_v17 = vor.u32 %v201_v14, %v169_v15  ;;  %v202_v20 = vld [vmem:[#allocation2 + $0xc] sm:$0xf]  ;;  %144 = vmatpush.bf16.msra.mxu3 %v196_v12  ;;  %v176_v21 = vor.u32 %v204_v19, %v175_v18  ;;  %v177_v22 = vld [vmem:[#allocation2 + $0x18] sm:$0xf0]  ;;  %v31_v23 = vld [vmem:[%s297_s0] sm:$0xff]  ;;  %vm92_vm0 = vcmask 261120  }
   0xb   :  { %v32_v24 = vld [vmem:[%s297_s0 + $0x8] sm:$0xff]  ;;  %v180_v25 = vor.u32 %v202_v20, %v177_v22  ;;  %v42_v27 = vld [vmem:[%s299_s2] sm:$0xf] }
   0xc   :  { %v33_v26 = vpack.c.bf16 %v32_v24, %v31_v23  ;;  %103 = vmatpush.bf16.msra.mxu0 %v168_v16  ;;  %v44_v28 = vperm.slane %v42_v27, 0  ;;  %v45_v29 = vperm.slane %v42_v27, 1  ;;  %v46_v34 = vperm.slane %v42_v27, 2 }
   0xd   :  { %117 = vmatpush.bf16.msra.mxu1 %v172_v17  ;;  %v47_v35 = vperm.slane %v42_v27, 3 }
   0xe   :  { %131 = vmatpush.bf16.msra.mxu2 %v176_v21  ;;  %145 = vmatpush.bf16.msra.mxu3 %v180_v25 }
   0xf   :  { %197 = vmatmul.msk.bf16.vlgmr.msra.gmra.mxu0 %vm92_vm0, %v33_v26 }
  0x10   :  { %198 = vmatmul.msk.bf16.vlgmr.msra.gmra.mxu1 %vm92_vm0, %v33_v26 }
  0x11   :  { %199 = vmatmul.msk.bf16.vlgmr.msra.gmra.mxu2 %vm92_vm0, %v33_v26  ;;  %200 = vmatmul.msk.bf16.vlgmr.msra.gmra.mxu3 %vm92_vm0, %v33_v26 }
  0x8c   :  { %v105_v30 = vpop.f32.mrf.mxu0 }
  0x8d   :  { %v106_v31 = vadd.f32 %v105_v30, %v44_v28  ;;  %v119_v32 = vpop.f32.mrf.mxu1 }
  0x8e   :  { %v120_v33 = vadd.f32 %v119_v32, %v45_v29 }
  0x8f   :  { %152 = vst [vmem:[%s300_s3] sm:$0xff] %v106_v31 }
  0x90   :  { %153 = vst [vmem:[%s300_s3 + $0x8] sm:$0xff] %v120_v33 }
  0x94   :  { %v133_v36 = vpop.f32.mrf.mxu2  ;;  %v147_v38 = vpop.f32.mrf.mxu3 }
  0x95   :  { %v134_v37 = vadd.f32 %v133_v36, %v46_v34  ;;  %v107_v39 = vpop.f32.mrf.mxu0  ;;  %v148_v40 = vadd.f32 %v147_v38, %v47_v35  ;;  %v121_v42 = vpop.f32.mrf.mxu1 }
  0x96   :  { %v108_v41 = vadd.f32 %v107_v39, %v44_v28  ;;  %v122_v43 = vadd.f32 %v121_v42, %v45_v29 }
  0x97   :  { %154 = vst [vmem:[%s300_s3 + $0x10] sm:$0xff] %v134_v37 }
  0x98   :  { %155 = vst [vmem:[%s300_s3 + $0x18] sm:$0xff] %v148_v40 }
  0x99   :  { %156 = vst [vmem:[%s300_s3 + $0x20] sm:$0xff] %v108_v41 }
  0x9a   :  { %157 = vst [vmem:[%s300_s3 + $0x28] sm:$0xff] %v122_v43 }
  0x9c   :  { %v135_v44 = vpop.f32.mrf.mxu2  ;;  %v149_v46 = vpop.f32.mrf.mxu3 }
  0x9d   :  { %v136_v45 = vadd.f32 %v135_v44, %v46_v34  ;;  %v150_v47 = vadd.f32 %v149_v46, %v47_v35 }
  0x9f   :  { %158 = vst [vmem:[%s300_s3 + $0x30] sm:$0xff] %v136_v45 }
  0xa0   :  { %159 = vst [vmem:[%s300_s3 + $0x38] sm:$0xff] %v150_v47 }
  0xa1   :  { %164 = vsyncpa [#allocation3], 1 }

// kernel: _lambda_.5
= control target key start
LH: loop header
LB: loop body
LE: loop exit
PB: predicated region body
PF: predicated region fallthrough
CT: control target
= control target key end

     0   :  { %10 = vsyncpa [#allocation3], 0  ;;  %s215_s21 = smov [#allocation2]   ;;  %s216_s23 = smov 64   ;;  %s283_s0 = inlined_call_operand.vmem [shape: f32[16,32], index: 0, kind: input, shape index: {}]   ;;  %s284_s1 = inlined_call_operand.vmem [shape: f32[16,32], index: 1, kind: input, shape index: {}]   ;;  %s285_s2 = inlined_call_operand.vmem [shape: f32[16,32], index: 2, kind: input, shape index: {}]   ;;  %s286_s3 = inlined_call_operand.hbm [shape: bf16[96,32], index: 3, kind: input, shape index: {}]   ;;  %s287_s4 = inlined_call_operand.vmem [shape: f32[1,32], index: 4, kind: input, shape index: {}]   ;;  %s288_s5 = inlined_call_operand.vmem [shape: f32[16,32], index: 5, kind: output, shape index: {}]  }
   0x1   :  { %s21_s20 = sshll.u32 %s286_s3, 4  ;;  %s23_s22 = sshll.u32 %s215_s21, 4  ;;  %s22_s20 = int_to_ptr.hbm [resolvable:$true] %s21_s20  ;;  %s24_s22 = int_to_ptr.vmem [resolvable:$true] %s23_s22 }
   0x2   :  { %s217_s24 = smov 4  }
   0x3   :  { %29 = dma.hbm_to_vmem [thread:$0]  %s22_s20, 768, %s24_s22, [#allocation3], %s216_s23, %s216_s23, %s217_s24  }
   0x4   :  { %213 = dma.done.wait [#allocation3], 768  }
   0x5   :  { %214 = vsyncadd [#allocation3], 4294966528  ;;  %v39_v0 = vld [vmem:[%s284_s1] sm:$0xff]  ;;  %v40_v1 = vld [vmem:[%s284_s1 + $0x8] sm:$0xff]  ;;  %s218_s3 = smov 32   ;;  %vm59_vm0 = vcmask 261120  }
   0x6   :  { %v178_v2 = vpack.i.bf16 %v40_v1, %v39_v0  ;;  %v173_v3 = vld [vmem:[#allocation2 + $0x28] sm:$0xff]  ;;  %v172_v4 = vld [vmem:[#allocation2 + $0x20] sm:$0xff]  ;;  %v171_v8 = vld [vmem:[#allocation2 + $0x18] sm:$0xff]  ;;  %vm62_vm1 = vcmask 523264   ;;  %vm118_vm2 = vcmask 785408  }
   0x7   :  { %124 = vmatpush.bf16.msra.mxu0 %v173_v3  ;;  %v41_v5 = vld [vmem:[%s285_s2] sm:$0xff]  ;;  %v42_v6 = vld [vmem:[%s285_s2 + $0x8] sm:$0xff]  ;;  %v170_v9 = vld [vmem:[#allocation2 + $0x10] sm:$0xff] }
   0x8   :  { %179 = vrot.lane.b32.xlu0 %v178_v2, %s218_s3  ;;  %v183_v7 = vpack.i.bf16 %v42_v6, %v41_v5  ;;  %v169_v10 = vld [vmem:[#allocation2 + $0x8] sm:$0xff]  ;;  %v168_v11 = vld [vmem:[#allocation2] sm:$0xff] }
   0x9   :  { %v37_v15 = vld [vmem:[%s283_s0] sm:$0xff]  ;;  %v38_v16 = vld [vmem:[%s283_s0 + $0x8] sm:$0xff] }
   0xa   :  { %v188_v25 = vld [vmem:[%s287_s4] ss:$0 sm:$0xff] }
   0xb   :  { %125 = vmatpush.bf16.msra.mxu0 %v172_v4 }
   0xf   :  { %126 = vmatpush.bf16.msra.mxu0 %v171_v8 }
  0x10   :  { %184 = vrot.lane.b32.xlu0 %v183_v7, %s216_s23 }
  0x13   :  { %127 = vmatpush.bf16.msra.mxu0 %v170_v9 }
  0x17   :  { %128 = vmatpush.bf16.msra.mxu0 %v169_v10 }
  0x1b   :  { %129 = vmatpush.bf16.msra.mxu0 %v168_v11 }
  0x7a   :  { %v180_v12 = vpop.permute.xlu0 %179 }
  0x7b   :  { %v182_v13 = vunpack.i.h.bf16 %v180_v12  ;;  %v181_v14 = vunpack.i.l.bf16 %v180_v12 }
  0x7d   :  { %v60_v20 = vsel %vm59_vm0, %v37_v15, %v181_v14  ;;  %v61_v21 = vsel %vm59_vm0, %v38_v16, %v182_v13 }
  0x82   :  { %v185_v17 = vpop.permute.xlu0 %184 }
  0x83   :  { %v187_v18 = vunpack.i.h.bf16 %v185_v17  ;;  %v186_v19 = vunpack.i.l.bf16 %v185_v17 }
  0x85   :  { %v63_v22 = vsel %vm62_vm1, %v60_v20, %v186_v19  ;;  %v64_v23 = vsel %vm62_vm1, %v61_v21, %v187_v18 }
  0x86   :  { %v65_v24 = vpack.c.bf16 %v64_v23, %v63_v22 }
  0x88   :  { %167 = vmatmul.msk.bf16.vlgmr.msra.gmra.mxu0 %vm118_vm2, %v65_v24 }
 0x105   :  { %v131_v26 = vpop.f32.mrf.mxu0 }
 0x106   :  { %v132_v27 = vadd.f32 %v188_v25, %v131_v26 }
 0x108   :  { %136 = vst.msk [vmem:[%s288_s5] sm:$0xff] %vm59_vm0, %v132_v27 }
 0x10d   :  { %v133_v28 = vpop.f32.mrf.mxu0 }
 0x10e   :  { %v134_v29 = vadd.f32 %v188_v25, %v133_v28 }
 0x110   :  { %137 = vst.msk [vmem:[%s288_s5 + $0x8] sm:$0xff] %vm59_vm0, %v134_v29 }
 0x111   :  { %142 = vsyncpa [#allocation3], 1 }

// kernel: _lambda_.4
= control target key start
LH: loop header
LB: loop body
LE: loop exit
PB: predicated region body
PF: predicated region fallthrough
CT: control target
= control target key end

     0   :  { %vm188_vm0 = vcmask 517120   ;;  %v2580_v31 = vmov 0.0   ;;  %vm253_vm1 = vcmask 523264   ;;  %vm286_vm2 = vcmask 1041408   ;;  %s3231_s0 = inlined_call_operand.vmem [shape: f32[8,2,512], index: 0, kind: input, shape index: {}, may-alias: {0,1}]   ;;  %s3232_s1 = inlined_call_operand.vmem [shape: f32[8,2,512], index: 1, kind: input, shape index: {}, may-alias: {0,1}]   ;;  %s3233_s2 = inlined_call_operand.vmem [shape: bf16[64,256], index: 2, kind: input, shape index: {}]   ;;  %s3234_s3 = inlined_call_operand.vmem [shape: bf16[64,256], index: 3, kind: input, shape index: {}]   ;;  %s3235_s4 = inlined_call_operand.vmem [shape: f32[8,2,32], index: 4, kind: output, shape index: {0}]   ;;  %s3236_s5 = inlined_call_operand.vmem [shape: f32[8,2,32], index: 5, kind: output, shape index: {1}]  }
   0x1   :  { %v2287_v0 = vld [vmem:[%s3234_s3 + $0x30] sm:$0xf]  ;;  %v2384_v1 = vld [vmem:[%s3234_s3 + $0x34] sm:$0xf0]  ;;  %v2383_v2 = vld [vmem:[%s3234_s3 + $0x34] sm:$0xf] }
   0x2   :  { %v2622_v3 = vor.u32 %v2384_v1, %v2287_v0  ;;  %v2289_v4 = vld [vmem:[%s3234_s3 + $0x38] sm:$0xf0]  ;;  %v2279_v5 = vld [vmem:[%s3234_s3 + $0x20] sm:$0xf]  ;;  %v2382_v6 = vld [vmem:[%s3234_s3 + $0x24] sm:$0xf0] }
   0x3   :  { %v2633_v7 = vor.u32 %v2383_v2, %v2289_v4  ;;  %v2381_v8 = vld [vmem:[%s3234_s3 + $0x24] sm:$0xf]  ;;  %v2281_v9 = vld [vmem:[%s3234_s3 + $0x28] sm:$0xf0]  ;;  %v2642_v10 = vor.u32 %v2382_v6, %v2279_v5  ;;  %v2271_v11 = vld [vmem:[%s3234_s3 + $0x10] sm:$0xf] }
   0x4   :  { %340 = vmatpush.bf16.msra.mxu2 %v2622_v3  ;;  %v2380_v12 = vld [vmem:[%s3234_s3 + $0x14] sm:$0xf0]  ;;  %v2651_v13 = vor.u32 %v2381_v8, %v2281_v9  ;;  %v2375_v14 = vld [vmem:[%s3233_s2 + $0x34] sm:$0xf]  ;;  %v2255_v15 = vld [vmem:[%s3233_s2 + $0x38] sm:$0xf0] }
   0x5   :  { %353 = vmatpush.bf16.msra.mxu3 %v2633_v7  ;;  %v2253_v16 = vld [vmem:[%s3233_s2 + $0x30] sm:$0xf]  ;;  %v2379_v17 = vld [vmem:[%s3234_s3 + $0x14] sm:$0xf]  ;;  %v2273_v18 = vld [vmem:[%s3234_s3 + $0x18] sm:$0xf0]  ;;  %v2668_v19 = vor.u32 %v2375_v14, %v2255_v15  ;;  %v2685_v25 = vor.u32 %v2380_v12, %v2271_v11 }
   0x6   :  { %v2376_v20 = vld [vmem:[%s3233_s2 + $0x34] sm:$0xf0]  ;;  %v2263_v22 = vld [vmem:[%s3234_s3] sm:$0xf]  ;;  %v2378_v23 = vld [vmem:[%s3234_s3 + $0x4] sm:$0xf0]  ;;  %v2698_v29 = vor.u32 %v2379_v17, %v2273_v18 }
   0x7   :  { %v2673_v21 = vor.u32 %v2376_v20, %v2253_v16  ;;  %v2373_v24 = vld [vmem:[%s3233_s2 + $0x24] sm:$0xf]  ;;  %274 = vmatpush.bf16.msra.mxu1 %v2668_v19  ;;  %v2265_v27 = vld [vmem:[%s3234_s3 + $0x8] sm:$0xf0]  ;;  %191 = vst.msk [vmem:[#allocation4] sm:$0x3] %vm188_vm0, %v2580_v31  ;;  %v2727_v39 = vor.u32 %v2378_v23, %v2263_v22 }
   0x8   :  { %341 = vmatpush.bf16.msra.mxu2 %v2642_v10  ;;  %v2377_v26 = vld [vmem:[%s3234_s3 + $0x4] sm:$0xf]  ;;  %v2247_v28 = vld [vmem:[%s3233_s2 + $0x28] sm:$0xf0]  ;;  %v2245_v32 = vld [vmem:[%s3233_s2 + $0x20] sm:$0xf] }
   0x9   :  { %354 = vmatpush.bf16.msra.mxu3 %v2651_v13  ;;  %261 = vmatpush.bf16.msra.mxu0 %v2673_v21  ;;  %v2701_v30 = vor.u32 %v2373_v24, %v2247_v28  ;;  %v2374_v33 = vld [vmem:[%s3233_s2 + $0x24] sm:$0xf0]  ;;  %189 = vst.msk [vmem:[#allocation2] sm:$0x3] %vm188_vm0, %v2580_v31  ;;  %v2371_v35 = vld [vmem:[%s3233_s2 + $0x14] sm:$0xf]  ;;  %v2734_v41 = vor.u32 %v2377_v26, %v2265_v27 }
   0xa   :  { %v2711_v34 = vor.u32 %v2374_v33, %v2245_v32  ;;  %v2239_v36 = vld [vmem:[%s3233_s2 + $0x18] sm:$0xf0]  ;;  %190 = vst.msk [vmem:[#allocation3] sm:$0x3] %vm188_vm0, %v2580_v31  ;;  %v2237_v37 = vld [vmem:[%s3233_s2 + $0x10] sm:$0xf] }
   0xb   :  { %v2372_v38 = vld [vmem:[%s3233_s2 + $0x14] sm:$0xf0]  ;;  %275 = vmatpush.bf16.msra.mxu1 %v2701_v30  ;;  %192 = vst.msk [vmem:[#allocation5] sm:$0x3] %vm188_vm0, %v2580_v31  ;;  %v2731_v40 = vor.u32 %v2371_v35, %v2239_v36  ;;  %v2369_v43 = vld [vmem:[%s3233_s2 + $0x4] sm:$0xf] }
   0xc   :  { %342 = vmatpush.bf16.msra.mxu2 %v2685_v25  ;;  %v2737_v42 = vor.u32 %v2372_v38, %v2237_v37  ;;  %v2231_v44 = vld [vmem:[%s3233_s2 + $0x8] sm:$0xf0]  ;;  %v2229_v45 = vld [vmem:[%s3233_s2] sm:$0xf]  ;;  %v2370_v46 = vld [vmem:[%s3233_s2 + $0x4] sm:$0xf0] }
   0xd   :  { %355 = vmatpush.bf16.msra.mxu3 %v2698_v29  ;;  %262 = vmatpush.bf16.msra.mxu0 %v2711_v34  ;;  %v2753_v48 = vor.u32 %v2369_v43, %v2231_v44  ;;  %v2757_v50 = vor.u32 %v2370_v46, %v2229_v45  ;;  %s2581_s2 = smov 64   ;;  %v2226_v54 = vld [vmem:[%s3232_s1 + $0x3c] sm:$0xf]  ;;  %v29_v55 = vld [vmem:[%s3231_s0] sm:$0xf] }
   0xe   :  { %v210_v47 = vld [vmem:[#allocation4] sm:$0x3]  ;;  %121 = vst [vmem:[#allocation7 + $0x1c] sm:$0xf] %v2226_v54 }
   0xf   :  { %276 = vmatpush.bf16.msra.mxu1 %v2731_v40  ;;  %v292_v49 = vpack.c.bf16 %v210_v47, %v210_v47  ;;  %30 = vst [vmem:[#allocation6] sm:$0xf] %v29_v55 }
  0x10   :  { %343 = vmatpush.bf16.msra.mxu2 %v2727_v39  ;;  %v209_v51 = vld [vmem:[#allocation2] sm:$0x3] }
  0x11   :  { %356 = vmatpush.bf16.msra.mxu3 %v2734_v41  ;;  %263 = vmatpush.bf16.msra.mxu0 %v2737_v42  ;;  %v212_v52 = vpack.c.bf16 %v209_v51, %v209_v51  ;;  %v460_v15 = vld [vmem:[#allocation3] sm:$0x3] }
  0x12   :  { %v478_v53 = vld [vmem:[#allocation5] sm:$0x3] }
  0x13   :  { %2293 = vmatmul.msk.bf16.vlgmr.msra.gmra.mxu2 %vm253_vm1, %v292_v49  ;;  %277 = vmatpush.bf16.msra.mxu1 %v2753_v48 }
  0x14   :  { %577 = vmatpush.bf16.msrb.mxu2 %v2622_v3  ;;  %2294 = vmatmul.msk.bf16.vlgmr.msra.gmra.mxu3 %vm253_vm1, %v292_v49 }
  0x15   :  { %590 = vmatpush.bf16.msrb.mxu3 %v2633_v7  ;;  %264 = vmatpush.bf16.msra.mxu0 %v2757_v50  ;;  %v291_v1 = vld [vmem:[#allocation7 + $0x1c] sm:$0xf] }
  0x16   :  { %480 = vrot.lane.b32.xlu0 %v478_v53, %s2581_s2  ;;  %2260 = vmatmul.msk.bf16.vlgmr.msra.gmra.mxu1 %vm253_vm1, %v212_v52  ;;  %v211_v58 = vld [vmem:[#allocation6] sm:$0xf] }
  0x17   :  { %552 = vmatpush.bf16.msrb.mxu1 %v2668_v19 }
  0x18   :  { %578 = vmatpush.bf16.msrb.mxu2 %v2642_v10  ;;  %2259 = vmatmul.msk.bf16.vlgmr.msra.gmra.mxu0 %vm253_vm1, %v212_v52 }
  0x19   :  { %591 = vmatpush.bf16.msrb.mxu3 %v2651_v13  ;;  %539 = vmatpush.bf16.msrb.mxu0 %v2673_v21 }
  0x1b   :  { %553 = vmatpush.bf16.msrb.mxu1 %v2701_v30 }
  0x1c   :  { %579 = vmatpush.bf16.msrb.mxu2 %v2685_v25 }
  0x1d   :  { %592 = vmatpush.bf16.msrb.mxu3 %v2698_v29  ;;  %540 = vmatpush.bf16.msrb.mxu0 %v2711_v34 }
  0x1f   :  { %554 = vmatpush.bf16.msrb.mxu1 %v2731_v40 }
  0x20   :  { %580 = vmatpush.bf16.msrb.mxu2 %v2727_v39 }
  0x21   :  { %593 = vmatpush.bf16.msrb.mxu3 %v2734_v41  ;;  %541 = vmatpush.bf16.msrb.mxu0 %v2737_v42 }
  0x23   :  { %555 = vmatpush.bf16.msrb.mxu1 %v2753_v48 }
  0x24   :  { %813 = vmatpush.bf16.msra.mxu2 %v2622_v3 }
  0x25   :  { %826 = vmatpush.bf16.msra.mxu3 %v2633_v7  ;;  %542 = vmatpush.bf16.msrb.mxu0 %v2757_v50 }
  0x27   :  { %788 = vmatpush.bf16.msra.mxu1 %v2668_v19 }
  0x28   :  { %814 = vmatpush.bf16.msra.mxu2 %v2642_v10 }
  0x29   :  { %775 = vmatpush.bf16.msra.mxu0 %v2673_v21  ;;  %827 = vmatpush.bf16.msra.mxu3 %v2651_v13 }
  0x2b   :  { %789 = vmatpush.bf16.msra.mxu1 %v2701_v30 }
  0x2c   :  { %815 = vmatpush.bf16.msra.mxu2 %v2685_v25 }
  0x2d   :  { %776 = vmatpush.bf16.msra.mxu0 %v2711_v34  ;;  %828 = vmatpush.bf16.msra.mxu3 %v2698_v29 }
  0x2f   :  { %790 = vmatpush.bf16.msra.mxu1 %v2731_v40 }
  0x30   :  { %816 = vmatpush.bf16.msra.mxu2 %v2727_v39 }
  0x31   :  { %777 = vmatpush.bf16.msra.mxu0 %v2737_v42  ;;  %829 = vmatpush.bf16.msra.mxu3 %v2734_v41 }
  0x33   :  { %791 = vmatpush.bf16.msra.mxu1 %v2753_v48 }
  0x35   :  { %778 = vmatpush.bf16.msra.mxu0 %v2757_v50 }
  0x93   :  { %v279_v56 = vpop.f32.mrf.mxu1 }
  0x94   :  { %v285_v57 = vrot.slane %v279_v56, 6 }
  0x95   :  { %v266_v59 = vpop.f32.mrf.mxu0 }
  0x96   :  { %v345_v60 = vpop.f32.mrf.mxu2  ;;  %v287_v62 = vsel %vm286_vm2, %v266_v59, %v285_v57 }
  0x97   :  { %v358_v61 = vpop.f32.mrf.mxu3  ;;  %v289_v0 = vadd.f32 %v287_v62, %v211_v58 }
  0x98   :  { %v364_v63 = vrot.slane %v358_v61, 6 }
  0x99   :  { %v2295_v2 = vmul.f32 -1.442695, %v289_v0  ;;  %v388_v20 = vrot.slane %v289_v0, 2 }
  0x9a   :  { %v365_v4 = vsel %vm286_vm2, %v345_v60, %v364_v63 }
  0x9b   :  { %v367_v5 = vadd.f32 %v365_v4, %v291_v1  ;;  %2388 = vpow2.f32 %v2295_v2  ;;  %v281_v6 = vpop.f32.mrf.mxu1  ;;  %v481_v1 = vpop.permute.xlu0 %480 }
  0x9d   :  { %437 = vrot.lane.b32.xlu1 %v367_v5, %s2581_s2  ;;  %v2297_v8 = vmul.f32 -1.442695, %v367_v5  ;;  %v268_v9 = vpop.f32.mrf.mxu0  ;;  %v434_v24 = vrot.slane %v367_v5, 2 }
  0x9e   :  { %v347_v11 = vpop.f32.mrf.mxu2 }
  0x9f   :  { %2390 = vpow2.f32 %v2297_v8  ;;  %v360_v12 = vpop.f32.mrf.mxu3 }
  0xa1   :  { %v2389_v14 = vpop.eup %2388 }
  0xa2   :  { %v371_v16 = vadd.f32 1.0, %v2389_v14 }
  0xa4   :  { %2392 = vrcp.f32 %v371_v16  ;;  %v383_v26 = vand.u32 2147483648, %v371_v16  ;;  %vm377_vm3 = vweird.f32 %v371_v16  ;;  %v381_v31 = vand.u32 2147483647, %v371_v16 }
  0xa5   :  { %v2391_v17 = vpop.eup %2390  ;;  %462 = vrot.lane.b32.xlu1 %v460_v15, %s2581_s2 }
  0xa6   :  { %v417_v18 = vadd.f32 1.0, %v2391_v17  ;;  %v384_v36 = vor.u32 1.1754944e-38, %v383_v26  ;;  %vm382_vm6 = vcmp.eq.f32.partialorder %v381_v31, 8.507059e+37 }
  0xa8   :  { %2394 = vrcp.f32 %v417_v18  ;;  %v429_v37 = vand.u32 2147483648, %v417_v18  ;;  %v427_v45 = vand.u32 2147483647, %v417_v18  ;;  %vm423_vm8 = vweird.f32 %v417_v18 }
  0xa9   :  { %2396 = vtanh.f32 %v388_v20 }
  0xaa   :  { %v2393_v22 = vpop.eup %2392  ;;  %2398 = vtanh.f32 %v434_v24  ;;  %v430_v51 = vor.u32 1.1754944e-38, %v429_v37  ;;  %vm428_vm10 = vcmp.eq.f32.partialorder %v427_v45, 8.507059e+37 }
  0xab   :  { %v373_v23 = vmul.f32 %v2393_v22, %v371_v16  ;;  %vm378_vm4 = vweird.f32 %v2393_v22 }
  0xac   :  { %vm379_vm5 = vmor %vm377_vm3, %vm378_vm4 }
  0xad   :  { %v374_v28 = vsub.f32 1.0, %v373_v23 }
  0xae   :  { %v2395_v27 = vpop.eup %2394 }
  0xaf   :  { %v419_v32 = vmul.f32 %v2395_v27, %v417_v18  ;;  %v375_v33 = vmul.f32 %v2393_v22, %v374_v28  ;;  %v2397_v43 = vpop.eup %2396  ;;  %vm424_vm7 = vweird.f32 %v2395_v27 }
  0xb0   :  { %vm425_vm9 = vmor %vm423_vm8, %vm424_vm7  ;;  %v2399_v54 = vpop.eup %2398 }
  0xb1   :  { %v420_v35 = vsub.f32 1.0, %v419_v32  ;;  %v376_v38 = vadd.f32 %v2393_v22, %v375_v33 }
  0xb3   :  { %v421_v44 = vmul.f32 %v2395_v27, %v420_v35  ;;  %v380_v46 = vsel %vm379_vm5, %v2393_v22, %v376_v38 }
  0xb4   :  { %v385_v49 = vsel %vm382_vm6, %v384_v36, %v380_v46 }
  0xb5   :  { %v422_v47 = vadd.f32 %v2395_v27, %v421_v44  ;;  %v466_v52 = vmul.f32 %v2397_v43, %v385_v49 }
  0xb7   :  { %v426_v53 = vsel %vm425_vm9, %v2395_v27, %v422_v47  ;;  %468 = vrot.lane.b32.xlu2 %v466_v52, %s2581_s2 }
  0xb8   :  { %v431_v55 = vsel %vm428_vm10, %v430_v51, %v426_v53 }
  0xb9   :  { %v484_v56 = vmul.f32 %v2399_v54, %v431_v55  ;;  %v483_v2 = vmul.f32 %v481_v1, %v431_v55  ;;  %v2225_v1 = vld [vmem:[%s3232_s1 + $0x34] sm:$0xf] }
  0xba   :  { %119 = vst [vmem:[#allocation7 + $0x18] sm:$0xf] %v2225_v1 }
  0xbb   :  { %486 = vrot.lane.b32.xlu0 %v484_v56, %s2581_s2 }
  0xc3   :  { %391 = vrot.lane.b32.xlu0 %v289_v0, %s2581_s2 }
 0x10f   :  { %v438_v57 = vpop.permute.xlu1 %437 }
 0x110   :  { %v439_v8 = vrot.slane %v438_v57, 2 }
 0x111   :  { %v469_v59 = vpop.permute.xlu2 %468 }
 0x112   :  { %v2298_v11 = vmul.f32 -1.442695, %v439_v8 }
 0x117   :  { %v463_v58 = vpop.permute.xlu1 %462 }
 0x118   :  { %v465_v60 = vmul.f32 %v463_v58, %v385_v49 }
 0x11a   :  { %v471_v61 = vadd.f32 %v469_v59, %v465_v60 }
 0x11c   :  { %2400 = vtanh.f32 %v471_v61  ;;  %499 = vst [vmem:[#allocation1] ss:$4 sm:$0xff] %v471_v61 }
 0x122   :  { %v2401_v62 = vpop.eup %2400 }
 0x123   :  { %v500_v63 = vld.sshfl [vmem:[#allocation1] sm:$0xff pattern:$0x73625140]  ;;  %474 = vrot.lane.b32.xlu1 %v2401_v62, %s2581_s2 }
 0x124   :  { %501 = vrot.lane.b32.xlu0 %v500_v63, %s2581_s2  ;;  %v31_v63 = vld [vmem:[%s3231_s0 + $0x8] sm:$0xf] }
 0x125   :  { %32 = vst [vmem:[#allocation6 + $0x4] sm:$0xf] %v31_v63 }
 0x12c   :  { %v530_v8 = vld [vmem:[#allocation6 + $0x4] sm:$0xf] }
 0x12d   :  { %v487_v4 = vpop.permute.xlu0 %486 }
 0x12e   :  { %v489_v5 = vadd.f32 %v487_v4, %v483_v2 }
 0x130   :  { %2402 = vtanh.f32 %v489_v5  ;;  %507 = vst [vmem:[#allocation1] ss:$4 sm:$0xff] %v489_v5 }
 0x131   :  { %2404 = vpow2.f32 %v2298_v11  ;;  %v568_v11 = vld [vmem:[#allocation7 + $0x18] sm:$0xf] }
 0x135   :  { %v392_v9 = vpop.permute.xlu0 %391 }
 0x136   :  { %v2403_v0 = vpop.eup %2402  ;;  %v393_v12 = vrot.slane %v392_v9, 2 }
 0x137   :  { %492 = vrot.lane.b32.xlu2 %v2403_v0, %s2581_s2  ;;  %v508_v6 = vld.sshfl [vmem:[#allocation1] sm:$0xff pattern:$0x73625140]  ;;  %v2405_v15 = vpop.eup %2404 }
 0x138   :  { %v2296_v14 = vmul.f32 -1.442695, %v393_v12  ;;  %v444_v16 = vadd.f32 1.0, %v2405_v15 }
 0x13a   :  { %2406 = vpow2.f32 %v2296_v14  ;;  %v456_v33 = vand.u32 2147483648, %v444_v16  ;;  %vm450_vm12 = vweird.f32 %v444_v16  ;;  %v454_v35 = vand.u32 2147483647, %v444_v16 }
 0x13b   :  { %2408 = vrcp.f32 %v444_v16 }
 0x13c   :  { %v457_v44 = vor.u32 1.1754944e-38, %v456_v33  ;;  %vm455_vm4 = vcmp.eq.f32.partialorder %v454_v35, 8.507059e+37 }
 0x13f   :  { %509 = vrot.lane.b32.xlu2 %v508_v6, %s2581_s2 }
 0x140   :  { %v2407_v17 = vpop.eup %2406 }
 0x141   :  { %v398_v18 = vadd.f32 1.0, %v2407_v17  ;;  %v2409_v20 = vpop.eup %2408 }
 0x142   :  { %v446_v22 = vmul.f32 %v2409_v20, %v444_v16  ;;  %vm451_vm11 = vweird.f32 %v2409_v20 }
 0x143   :  { %2410 = vrcp.f32 %v398_v18  ;;  %vm404_vm13 = vweird.f32 %v398_v18  ;;  %vm452_vm15 = vmor %vm450_vm12, %vm451_vm11  ;;  %v410_v36 = vand.u32 2147483648, %v398_v18  ;;  %v408_v43 = vand.u32 2147483647, %v398_v18 }
 0x144   :  { %v447_v24 = vsub.f32 1.0, %v446_v22 }
 0x145   :  { %v411_v47 = vor.u32 1.1754944e-38, %v410_v36  ;;  %vm409_vm5 = vcmp.eq.f32.partialorder %v408_v43, 8.507059e+37 }
 0x146   :  { %v448_v27 = vmul.f32 %v2409_v20, %v447_v24 }
 0x148   :  { %v449_v31 = vadd.f32 %v2409_v20, %v448_v27 }
 0x149   :  { %v2411_v23 = vpop.eup %2410 }
 0x14a   :  { %v400_v26 = vmul.f32 %v2411_v23, %v398_v18  ;;  %vm405_vm14 = vweird.f32 %v2411_v23  ;;  %v453_v37 = vsel %vm452_vm15, %v2409_v20, %v449_v31 }
 0x14b   :  { %vm406_vm3 = vmor %vm404_vm13, %vm405_vm14  ;;  %v458_v45 = vsel %vm455_vm4, %v457_v44, %v453_v37 }
 0x14c   :  { %v401_v28 = vsub.f32 1.0, %v400_v26 }
 0x14e   :  { %v402_v32 = vmul.f32 %v2411_v23, %v401_v28 }
 0x150   :  { %v403_v38 = vadd.f32 %v2411_v23, %v402_v32 }
 0x152   :  { %v407_v51 = vsel %vm406_vm3, %v2411_v23, %v403_v38 }
 0x153   :  { %v412_v52 = vsel %vm409_vm5, %v411_v47, %v407_v51 }
 0x191   :  { %v493_v46 = vpop.permute.xlu2 %492 }
 0x192   :  { %v2815_v49 = vmul.f32 %v493_v46, %v458_v45 }
 0x194   :  { %505 = vst.msk [vmem:[#allocation4] sm:$0x3] %vm188_vm0, %v2815_v49 }
 0x195   :  { %v475_v53 = vpop.permute.xlu1 %474 }
 0x196   :  { %v2819_v54 = vmul.f32 %v475_v53, %v412_v52  ;;  %v502_v55 = vpop.permute.xlu0 %501 }
 0x197   :  { %504 = vst.msk [vmem:[#allocation3] sm:$0x3] %vm188_vm0, %v502_v55 }
 0x198   :  { %497 = vst.msk [vmem:[#allocation2] sm:$0x3] %vm188_vm0, %v2819_v54 }
 0x199   :  { %v510_v56 = vpop.permute.xlu2 %509 }
 0x19a   :  { %512 = vst.msk [vmem:[#allocation5] sm:$0x3] %vm188_vm0, %v510_v56 }
 0x19b   :  { %v528_v57 = vld [vmem:[#allocation4] sm:$0x3] }
 0x19c   :  { %v569_v58 = vpack.c.bf16 %v528_v57, %v528_v57 }
 0x19e   :  { %2302 = vmatmul.msk.bf16.vlgmr.msrb.gmra.mxu2 %vm253_vm1, %v569_v58  ;;  %2303 = vmatmul.msk.bf16.vlgmr.msrb.gmra.mxu3 %vm253_vm1, %v569_v58  ;;  %v697_v62 = vld [vmem:[#allocation3] sm:$0x3] }
 0x19f   :  { %v527_v59 = vld [vmem:[#allocation2] sm:$0x3]  ;;  %1062 = vmatpush.bf16.msrb.mxu3 %v2633_v7  ;;  %1049 = vmatpush.bf16.msrb.mxu2 %v2622_v3 }
 0x1a0   :  { %v531_v60 = vpack.c.bf16 %v527_v59, %v527_v59 }
 0x1a1   :  { %v715_v61 = vld [vmem:[#allocation5] sm:$0x3] }
 0x1a2   :  { %717 = vrot.lane.b32.xlu1 %v715_v61, %s2581_s2  ;;  %2300 = vmatmul.msk.bf16.vlgmr.msrb.gmra.mxu0 %vm253_vm1, %v531_v60 }
 0x1a3   :  { %2301 = vmatmul.msk.bf16.vlgmr.msrb.gmra.mxu1 %vm253_vm1, %v531_v60  ;;  %1063 = vmatpush.bf16.msrb.mxu3 %v2651_v13 }
 0x1a4   :  { %1050 = vmatpush.bf16.msrb.mxu2 %v2642_v10  ;;  %1011 = vmatpush.bf16.msrb.mxu0 %v2673_v21 }
 0x1a5   :  { %1024 = vmatpush.bf16.msrb.mxu1 %v2668_v19 }
 0x1a7   :  { %1064 = vmatpush.bf16.msrb.mxu3 %v2698_v29 }
 0x1a8   :  { %1051 = vmatpush.bf16.msrb.mxu2 %v2685_v25  ;;  %1012 = vmatpush.bf16.msrb.mxu0 %v2711_v34 }
 0x1a9   :  { %1025 = vmatpush.bf16.msrb.mxu1 %v2701_v30 }
 0x1aa   :  { %699 = vrot.lane.b32.xlu1 %v697_v62, %s2581_s2 }
 0x1ab   :  { %1065 = vmatpush.bf16.msrb.mxu3 %v2734_v41 }
 0x1ac   :  { %1052 = vmatpush.bf16.msrb.mxu2 %v2727_v39  ;;  %1013 = vmatpush.bf16.msrb.mxu0 %v2737_v42 }
 0x1ad   :  { %1026 = vmatpush.bf16.msrb.mxu1 %v2731_v40 }
 0x1b0   :  { %1014 = vmatpush.bf16.msrb.mxu0 %v2757_v50 }
 0x1b1   :  { %1027 = vmatpush.bf16.msrb.mxu1 %v2753_v48 }
 0x21f   :  { %v544_v2 = vpop.f32.mrf.mxu0 }
 0x220   :  { %v557_v4 = vpop.f32.mrf.mxu1 }
 0x221   :  { %v563_v5 = vrot.slane %v557_v4, 6  ;;  %v582_v0 = vpop.f32.mrf.mxu2  ;;  %v595_v6 = vpop.f32.mrf.mxu3 }
 0x222   :  { %v601_v9 = vrot.slane %v595_v6, 6 }
 0x223   :  { %v564_v12 = vsel %vm286_vm2, %v544_v2, %v563_v5  ;;  %v718_v5 = vpop.permute.xlu1 %717 }
 0x224   :  { %v566_v14 = vadd.f32 %v564_v12, %v530_v8  ;;  %v602_v15 = vsel %vm286_vm2, %v582_v0, %v601_v9 }
 0x225   :  { %v604_v16 = vadd.f32 %v602_v15, %v568_v11 }
 0x226   :  { %628 = vrot.lane.b32.xlu1 %v566_v14, %s2581_s2  ;;  %v2304_v17 = vmul.f32 -1.442695, %v566_v14  ;;  %v625_v52 = vrot.slane %v566_v14, 2 }
 0x227   :  { %v2306_v18 = vmul.f32 -1.442695, %v604_v16  ;;  %674 = vrot.lane.b32.xlu0 %v604_v16, %s2581_s2  ;;  %v546_v20 = vpop.f32.mrf.mxu0  ;;  %v671_v36 = vrot.slane %v604_v16, 2 }
 0x228   :  { %2412 = vpow2.f32 %v2304_v17  ;;  %v559_v22 = vpop.f32.mrf.mxu1 }
 0x229   :  { %v584_v23 = vpop.f32.mrf.mxu2  ;;  %v597_v24 = vpop.f32.mrf.mxu3  ;;  %2414 = vpow2.f32 %v2306_v18 }
 0x22b   :  { %v700_v9 = vpop.permute.xlu1 %699 }
 0x22e   :  { %v2413_v26 = vpop.eup %2412 }
 0x22f   :  { %v608_v27 = vadd.f32 1.0, %v2413_v26  ;;  %v2415_v28 = vpop.eup %2414 }
 0x230   :  { %v654_v31 = vadd.f32 1.0, %v2415_v28 }
 0x231   :  { %2416 = vrcp.f32 %v608_v27  ;;  %v620_v59 = vand.u32 2147483648, %v608_v27  ;;  %vm614_vm11 = vweird.f32 %v608_v27  ;;  %v618_v61 = vand.u32 2147483647, %v608_v27 }
 0x232   :  { %2418 = vrcp.f32 %v654_v31  ;;  %v666_v44 = vand.u32 2147483648, %v654_v31  ;;  %v664_v46 = vand.u32 2147483647, %v654_v31  ;;  %vm660_vm7 = vweird.f32 %v654_v31 }
 0x233   :  { %2420 = vtanh.f32 %v671_v36  ;;  %v621_v63 = vor.u32 1.1754944e-38, %v620_v59  ;;  %vm619_vm13 = vcmp.eq.f32.partialorder %v618_v61, 8.507059e+37 }
 0x234   :  { %v667_v53 = vor.u32 1.1754944e-38, %v666_v44  ;;  %vm665_vm9 = vcmp.eq.f32.partialorder %v664_v46, 8.507059e+37  ;;  %2422 = vtanh.f32 %v625_v52 }
 0x237   :  { %v2417_v32 = vpop.eup %2416 }
 0x238   :  { %v610_v33 = vmul.f32 %v2417_v32, %v608_v27  ;;  %v2419_v35 = vpop.eup %2418  ;;  %vm615_vm10 = vweird.f32 %v2417_v32 }
 0x239   :  { %v656_v37 = vmul.f32 %v2419_v35, %v654_v31  ;;  %vm661_vm6 = vweird.f32 %v2419_v35  ;;  %v2421_v57 = vpop.eup %2420  ;;  %vm616_vm12 = vmor %vm614_vm11, %vm615_vm10 }
 0x23a   :  { %v611_v38 = vsub.f32 1.0, %v610_v33  ;;  %vm662_vm8 = vmor %vm660_vm7, %vm661_vm6  ;;  %v2423_v2 = vpop.eup %2422 }
 0x23b   :  { %v657_v43 = vsub.f32 1.0, %v656_v37 }
 0x23c   :  { %v612_v47 = vmul.f32 %v2417_v32, %v611_v38 }
 0x23d   :  { %v658_v45 = vmul.f32 %v2419_v35, %v657_v43 }
 0x23e   :  { %v613_v56 = vadd.f32 %v2417_v32, %v612_v47 }
 0x23f   :  { %v659_v51 = vadd.f32 %v2419_v35, %v658_v45 }
 0x240   :  { %v617_v62 = vsel %vm616_vm12, %v2417_v32, %v613_v56 }
 0x241   :  { %v663_v55 = vsel %vm662_vm8, %v2419_v35, %v659_v51  ;;  %v622_v1 = vsel %vm619_vm13, %v621_v63, %v617_v62 }
 0x242   :  { %v668_v58 = vsel %vm665_vm9, %v667_v53, %v663_v55  ;;  %v703_v4 = vmul.f32 %v2423_v2, %v622_v1  ;;  %v702_v11 = vmul.f32 %v700_v9, %v622_v1 }
 0x243   :  { %v721_v60 = vmul.f32 %v2421_v57, %v668_v58  ;;  %v720_v0 = vmul.f32 %v718_v5, %v668_v58 }
 0x245   :  { %723 = vrot.lane.b32.xlu2 %v721_v60, %s2581_s2 }
 0x24d   :  { %705 = vrot.lane.b32.xlu2 %v703_v4, %s2581_s2 }
 0x298   :  { %v629_v20 = vpop.permute.xlu1 %628 }
 0x299   :  { %v630_v22 = vrot.slane %v629_v20, 2  ;;  %v675_v24 = vpop.permute.xlu0 %674 }
 0x29a   :  { %v676_v27 = vrot.slane %v675_v24, 2 }
 0x29b   :  { %v2305_v23 = vmul.f32 -1.442695, %v630_v22 }
 0x29c   :  { %v2307_v31 = vmul.f32 -1.442695, %v676_v27 }
 0x29f   :  { %v724_v6 = vpop.permute.xlu2 %723 }
 0x2a0   :  { %v726_v8 = vadd.f32 %v724_v6, %v720_v0 }
 0x2a2   :  { %2424 = vtanh.f32 %v726_v8 }
 0x2a7   :  { %v706_v12 = vpop.permute.xlu2 %705 }
 0x2a8   :  { %v2425_v14 = vpop.eup %2424  ;;  %v708_v15 = vadd.f32 %v706_v12, %v702_v11 }
 0x2a9   :  { %729 = vrot.lane.b32.xlu0 %v2425_v14, %s2581_s2 }
 0x2aa   :  { %2426 = vtanh.f32 %v708_v15  ;;  %735 = vst [vmem:[#allocation1] ss:$4 sm:$0xff] %v708_v15  ;;  %v33_v15 = vld [vmem:[%s3231_s0 + $0x10] sm:$0xf] }
 0x2ab   :  { %2428 = vpow2.f32 %v2305_v23  ;;  %34 = vst [vmem:[#allocation6 + $0x8] sm:$0xf] %v33_v15 }
 0x2b0   :  { %v2427_v16 = vpop.eup %2426 }
 0x2b1   :  { %v736_v17 = vld.sshfl [vmem:[#allocation1] sm:$0xff pattern:$0x73625140]  ;;  %711 = vrot.lane.b32.xlu2 %v2427_v16, %s2581_s2  ;;  %v2429_v26 = vpop.eup %2428  ;;  %v2224_v16 = vld [vmem:[%s3232_s1 + $0x2c] sm:$0xf] }
 0x2b2   :  { %743 = vst [vmem:[#allocation1] ss:$4 sm:$0xff] %v726_v8  ;;  %737 = vrot.lane.b32.xlu1 %v736_v17, %s2581_s2  ;;  %v635_v28 = vadd.f32 1.0, %v2429_v26  ;;  %v766_v24 = vld [vmem:[#allocation6 + $0x8] sm:$0xf] }
 0x2b3   :  { %117 = vst [vmem:[#allocation7 + $0x14] sm:$0xf] %v2224_v16 }
 0x2b4   :  { %2430 = vrcp.f32 %v635_v28  ;;  %v647_v45 = vand.u32 2147483648, %v635_v28  ;;  %vm641_vm15 = vweird.f32 %v635_v28  ;;  %v645_v46 = vand.u32 2147483647, %v635_v28 }
 0x2b5   :  { %2432 = vpow2.f32 %v2307_v31 }
 0x2b6   :  { %v648_v52 = vor.u32 1.1754944e-38, %v647_v45  ;;  %vm646_vm4 = vcmp.eq.f32.partialorder %v645_v46, 8.507059e+37 }
 0x2b9   :  { %v744_v18 = vld.sshfl [vmem:[#allocation1] sm:$0xff pattern:$0x73625140] }
 0x2ba   :  { %745 = vrot.lane.b32.xlu0 %v744_v18, %s2581_s2  ;;  %v2431_v32 = vpop.eup %2430 }
 0x2bb   :  { %v2433_v33 = vpop.eup %2432  ;;  %v637_v35 = vmul.f32 %v2431_v32, %v635_v28  ;;  %vm642_vm14 = vweird.f32 %v2431_v32 }
 0x2bc   :  { %v681_v36 = vadd.f32 1.0, %v2433_v33  ;;  %vm643_vm3 = vmor %vm641_vm15, %vm642_vm14 }
 0x2bd   :  { %v638_v37 = vsub.f32 1.0, %v637_v35  ;;  %v804_v35 = vld [vmem:[#allocation7 + $0x14] sm:$0xf] }
 0x2be   :  { %2434 = vrcp.f32 %v681_v36  ;;  %v693_v61 = vand.u32 2147483648, %v681_v36  ;;  %vm687_vm6 = vweird.f32 %v681_v36  ;;  %v691_v63 = vand.u32 2147483647, %v681_v36 }
 0x2bf   :  { %v639_v38 = vmul.f32 %v2431_v32, %v638_v37 }
 0x2c0   :  { %v694_v2 = vor.u32 1.1754944e-38, %v693_v61  ;;  %vm692_vm8 = vcmp.eq.f32.partialorder %v691_v63, 8.507059e+37 }
 0x2c1   :  { %v640_v43 = vadd.f32 %v2431_v32, %v639_v38 }
 0x2c3   :  { %v644_v47 = vsel %vm643_vm3, %v2431_v32, %v640_v43 }
 0x2c4   :  { %v2435_v44 = vpop.eup %2434  ;;  %v649_v55 = vsel %vm646_vm4, %v648_v52, %v644_v47 }
 0x2c5   :  { %v683_v51 = vmul.f32 %v2435_v44, %v681_v36  ;;  %vm688_vm5 = vweird.f32 %v2435_v44 }
 0x2c6   :  { %vm689_vm7 = vmor %vm687_vm6, %vm688_vm5 }
 0x2c7   :  { %v684_v57 = vsub.f32 1.0, %v683_v51 }
 0x2c9   :  { %v685_v58 = vmul.f32 %v2435_v44, %v684_v57 }
 0x2cb   :  { %v686_v59 = vadd.f32 %v2435_v44, %v685_v58 }
 0x2cd   :  { %v690_v1 = vsel %vm689_vm7, %v2435_v44, %v686_v59 }
 0x2ce   :  { %v695_v4 = vsel %vm692_vm8, %v694_v2, %v690_v1 }
 0x30b   :  { %v712_v53 = vpop.permute.xlu2 %711 }
 0x30c   :  { %v2863_v56 = vmul.f32 %v712_v53, %v649_v55 }
 0x30e   :  { %733 = vst.msk [vmem:[#allocation2] sm:$0x3] %vm188_vm0, %v2863_v56 }
 0x315   :  { %v763_v60 = vld [vmem:[#allocation2] sm:$0x3] }
 0x316   :  { %v767_v62 = vpack.c.bf16 %v763_v60, %v763_v60 }
 0x318   :  { %2310 = vmatmul.msk.bf16.vlgmr.msra.gmra.mxu0 %vm253_vm1, %v767_v62  ;;  %2311 = vmatmul.msk.bf16.vlgmr.msra.gmra.mxu1 %vm253_vm1, %v767_v62 }
 0x319   :  { %1247 = vmatpush.bf16.msra.mxu0 %v2673_v21  ;;  %1260 = vmatpush.bf16.msra.mxu1 %v2668_v19 }
 0x31b   :  { %v730_v5 = vpop.permute.xlu0 %729 }
 0x31c   :  { %v2871_v0 = vmul.f32 %v730_v5, %v695_v4 }
 0x31d   :  { %1248 = vmatpush.bf16.msra.mxu0 %v2711_v34  ;;  %1261 = vmatpush.bf16.msra.mxu1 %v2701_v30 }
 0x31e   :  { %741 = vst.msk [vmem:[#allocation4] sm:$0x3] %vm188_vm0, %v2871_v0 }
 0x321   :  { %1249 = vmatpush.bf16.msra.mxu0 %v2737_v42  ;;  %1262 = vmatpush.bf16.msra.mxu1 %v2731_v40 }
 0x324   :  { %v738_v6 = vpop.permute.xlu1 %737 }
 0x325   :  { %740 = vst.msk [vmem:[#allocation3] sm:$0x3] %vm188_vm0, %v738_v6  ;;  %v764_v8 = vld [vmem:[#allocation4] sm:$0x3]  ;;  %1250 = vmatpush.bf16.msra.mxu0 %v2757_v50  ;;  %1263 = vmatpush.bf16.msra.mxu1 %v2753_v48 }
 0x326   :  { %v805_v9 = vpack.c.bf16 %v764_v8, %v764_v8 }
 0x328   :  { %2312 = vmatmul.msk.bf16.vlgmr.msra.gmra.mxu2 %vm253_vm1, %v805_v9  ;;  %2313 = vmatmul.msk.bf16.vlgmr.msra.gmra.mxu3 %vm253_vm1, %v805_v9 }
 0x329   :  { %1298 = vmatpush.bf16.msra.mxu3 %v2633_v7  ;;  %1285 = vmatpush.bf16.msra.mxu2 %v2622_v3 }
 0x32c   :  { %v746_v11 = vpop.permute.xlu0 %745  ;;  %v933_v14 = vld [vmem:[#allocation3] sm:$0x3] }
 0x32d   :  { %748 = vst.msk [vmem:[#allocation5] sm:$0x3] %vm188_vm0, %v746_v11  ;;  %1299 = vmatpush.bf16.msra.mxu3 %v2651_v13  ;;  %1286 = vmatpush.bf16.msra.mxu2 %v2642_v10 }
 0x331   :  { %1300 = vmatpush.bf16.msra.mxu3 %v2698_v29  ;;  %1287 = vmatpush.bf16.msra.mxu2 %v2685_v25 }
 0x334   :  { %v951_v12 = vld [vmem:[#allocation5] sm:$0x3] }
 0x335   :  { %953 = vrot.lane.b32.xlu2 %v951_v12, %s2581_s2  ;;  %1301 = vmatpush.bf16.msra.mxu3 %v2734_v41 }
 0x336   :  { %1288 = vmatpush.bf16.msra.mxu2 %v2727_v39 }
 0x33d   :  { %935 = vrot.lane.b32.xlu2 %v933_v14, %s2581_s2 }
 0x395   :  { %v780_v17 = vpop.f32.mrf.mxu0  ;;  %v793_v18 = vpop.f32.mrf.mxu1 }
 0x396   :  { %v799_v20 = vrot.slane %v793_v18, 6 }
 0x398   :  { %v800_v26 = vsel %vm286_vm2, %v780_v17, %v799_v20 }
 0x399   :  { %v802_v27 = vadd.f32 %v800_v26, %v766_v24 }
 0x39b   :  { %v2314_v28 = vmul.f32 -1.442695, %v802_v27  ;;  %v861_v4 = vrot.slane %v802_v27, 2 }
 0x39d   :  { %v782_v22 = vpop.f32.mrf.mxu0  ;;  %v795_v23 = vpop.f32.mrf.mxu1  ;;  %2436 = vpow2.f32 %v2314_v28 }
 0x39e   :  { %v954_v23 = vpop.permute.xlu2 %953 }
 0x3a3   :  { %v2437_v37 = vpop.eup %2436 }
 0x3a4   :  { %v844_v44 = vadd.f32 1.0, %v2437_v37 }
 0x3a6   :  { %v856_v11 = vand.u32 2147483648, %v844_v44  ;;  %vm850_vm14 = vweird.f32 %v844_v44  ;;  %v854_v14 = vand.u32 2147483647, %v844_v44  ;;  %v936_v28 = vpop.permute.xlu2 %935 }
 0x3a8   :  { %v857_v17 = vor.u32 1.1754944e-38, %v856_v11  ;;  %vm855_vm3 = vcmp.eq.f32.partialorder %v854_v14, 8.507059e+37 }
 0x3ab   :  { %v818_v31 = vpop.f32.mrf.mxu2  ;;  %v831_v32 = vpop.f32.mrf.mxu3 }
 0x3ac   :  { %v837_v33 = vrot.slane %v831_v32, 6 }
 0x3ae   :  { %v838_v36 = vsel %vm286_vm2, %v818_v31, %v837_v33 }
 0x3af   :  { %v840_v38 = vadd.f32 %v838_v36, %v804_v35 }
 0x3b1   :  { %v2316_v43 = vmul.f32 -1.442695, %v840_v38  ;;  %910 = vrot.lane.b32.xlu1 %v840_v38, %s2581_s2  ;;  %v907_v57 = vrot.slane %v840_v38, 2 }
 0x3b3   :  { %2438 = vpow2.f32 %v2316_v43  ;;  %v820_v45 = vpop.f32.mrf.mxu2  ;;  %v833_v46 = vpop.f32.mrf.mxu3 }
 0x3b4   :  { %2440 = vrcp.f32 %v844_v44 }
 0x3b9   :  { %v2439_v47 = vpop.eup %2438  ;;  %864 = vrot.lane.b32.xlu1 %v802_v27, %s2581_s2 }
 0x3ba   :  { %v890_v51 = vadd.f32 1.0, %v2439_v47  ;;  %v2441_v52 = vpop.eup %2440 }
 0x3bb   :  { %v846_v53 = vmul.f32 %v2441_v52, %v844_v44  ;;  %vm851_vm12 = vweird.f32 %v2441_v52 }
 0x3bc   :  { %2442 = vrcp.f32 %v890_v51  ;;  %v902_v61 = vand.u32 2147483648, %v890_v51  ;;  %v900_v1 = vand.u32 2147483647, %v890_v51  ;;  %vm896_vm10 = vweird.f32 %v890_v51  ;;  %vm852_vm15 = vmor %vm850_vm14, %vm851_vm12 }
 0x3bd   :  { %v847_v58 = vsub.f32 1.0, %v846_v53  ;;  %2444 = vtanh.f32 %v907_v57 }
 0x3be   :  { %v903_v5 = vor.u32 1.1754944e-38, %v902_v61  ;;  %vm901_vm13 = vcmp.eq.f32.partialorder %v900_v1, 8.507059e+37  ;;  %2446 = vtanh.f32 %v861_v4 }
 0x3bf   :  { %v848_v62 = vmul.f32 %v2441_v52, %v847_v58 }
 0x3c1   :  { %v849_v6 = vadd.f32 %v2441_v52, %v848_v62 }
 0x3c2   :  { %v2443_v55 = vpop.eup %2442 }
 0x3c3   :  { %v892_v59 = vmul.f32 %v2443_v55, %v890_v51  ;;  %vm897_vm9 = vweird.f32 %v2443_v55  ;;  %v2445_v9 = vpop.eup %2444  ;;  %v853_v16 = vsel %vm852_vm15, %v2441_v52, %v849_v6 }
 0x3c4   :  { %vm898_vm11 = vmor %vm896_vm10, %vm897_vm9  ;;  %v858_v18 = vsel %vm855_vm3, %v857_v17, %v853_v16  ;;  %v2447_v20 = vpop.eup %2446 }
 0x3c5   :  { %v893_v60 = vsub.f32 1.0, %v892_v59  ;;  %v939_v22 = vmul.f32 %v2447_v20, %v858_v18  ;;  %v938_v31 = vmul.f32 %v936_v28, %v858_v18 }
 0x3c7   :  { %v894_v63 = vmul.f32 %v2443_v55, %v893_v60 }
 0x3c9   :  { %v895_v2 = vadd.f32 %v2443_v55, %v894_v63 }
 0x3cb   :  { %v899_v8 = vsel %vm898_vm11, %v2443_v55, %v895_v2 }
 0x3cc   :  { %v904_v12 = vsel %vm901_vm13, %v903_v5, %v899_v8 }
 0x3cd   :  { %v957_v15 = vmul.f32 %v2445_v9, %v904_v12  ;;  %v956_v24 = vmul.f32 %v954_v23, %v904_v12 }
 0x3cf   :  { %959 = vrot.lane.b32.xlu0 %v957_v15, %s2581_s2 }
 0x3d7   :  { %941 = vrot.lane.b32.xlu0 %v939_v22, %s2581_s2 }
 0x423   :  { %v911_v43 = vpop.permute.xlu1 %910 }
 0x424   :  { %v912_v44 = vrot.slane %v911_v43, 2 }
 0x426   :  { %v2317_v45 = vmul.f32 -1.442695, %v912_v44 }
 0x42b   :  { %v865_v52 = vpop.permute.xlu1 %864 }
 0x42c   :  { %v866_v55 = vrot.slane %v865_v52, 2 }
 0x42e   :  { %v2315_v58 = vmul.f32 -1.442695, %v866_v55 }
 0x441   :  { %v960_v26 = vpop.permute.xlu0 %959 }
 0x442   :  { %v962_v27 = vadd.f32 %v960_v26, %v956_v24 }
 0x444   :  { %2448 = vtanh.f32 %v962_v27 }
 0x449   :  { %v942_v32 = vpop.permute.xlu0 %941 }
 0x44a   :  { %v2449_v33 = vpop.eup %2448  ;;  %v944_v35 = vadd.f32 %v942_v32, %v938_v31 }
 0x44b   :  { %965 = vrot.lane.b32.xlu2 %v2449_v33, %s2581_s2 }
 0x44c   :  { %2450 = vtanh.f32 %v944_v35  ;;  %971 = vst [vmem:[#allocation1] ss:$4 sm:$0xff] %v944_v35 }
 0x44d   :  { %2452 = vpow2.f32 %v2317_v45 }
 0x452   :  { %v2451_v36 = vpop.eup %2450 }
 0x453   :  { %v972_v37 = vld.sshfl [vmem:[#allocation1] sm:$0xff pattern:$0x73625140]  ;;  %947 = vrot.lane.b32.xlu0 %v2451_v36, %s2581_s2  ;;  %v2453_v46 = vpop.eup %2452 }
 0x454   :  { %979 = vst [vmem:[#allocation1] ss:$4 sm:$0xff] %v962_v27  ;;  %973 = vrot.lane.b32.xlu2 %v972_v37, %s2581_s2  ;;  %v917_v47 = vadd.f32 1.0, %v2453_v46  ;;  %v2223_v37 = vld [vmem:[%s3232_s1 + $0x24] sm:$0xf] }
 0x455   :  { %115 = vst [vmem:[#allocation7 + $0x10] sm:$0xf] %v2223_v37 }
 0x456   :  { %2454 = vrcp.f32 %v917_v47  ;;  %v929_v61 = vand.u32 2147483648, %v917_v47  ;;  %vm923_vm5 = vweird.f32 %v917_v47  ;;  %v927_v62 = vand.u32 2147483647, %v917_v47 }
 0x457   :  { %2456 = vpow2.f32 %v2315_v58 }
 0x458   :  { %v930_v2 = vor.u32 1.1754944e-38, %v929_v61  ;;  %vm928_vm7 = vcmp.eq.f32.partialorder %v927_v62, 8.507059e+37 }
 0x45b   :  { %v980_v38 = vld.sshfl [vmem:[#allocation1] sm:$0xff pattern:$0x73625140] }
 0x45c   :  { %981 = vrot.lane.b32.xlu1 %v980_v38, %s2581_s2  ;;  %v2455_v51 = vpop.eup %2454  ;;  %v35_v38 = vld [vmem:[%s3231_s0 + $0x18] sm:$0xf]  ;;  %v1040_v46 = vld [vmem:[#allocation7 + $0x10] sm:$0xf] }
 0x45d   :  { %v919_v53 = vmul.f32 %v2455_v51, %v917_v47  ;;  %vm924_vm4 = vweird.f32 %v2455_v51  ;;  %v2457_v63 = vpop.eup %2456  ;;  %36 = vst [vmem:[#allocation6 + $0xc] sm:$0xf] %v35_v38 }
 0x45e   :  { %vm925_vm6 = vmor %vm923_vm5, %vm924_vm4  ;;  %v871_v4 = vadd.f32 1.0, %v2457_v63 }
 0x45f   :  { %v920_v57 = vsub.f32 1.0, %v919_v53 }
 0x460   :  { %2458 = vrcp.f32 %v871_v4  ;;  %v883_v20 = vand.u32 2147483648, %v871_v4  ;;  %vm877_vm9 = vweird.f32 %v871_v4  ;;  %v881_v22 = vand.u32 2147483647, %v871_v4 }
 0x461   :  { %v921_v59 = vmul.f32 %v2455_v51, %v920_v57 }
 0x462   :  { %v884_v24 = vor.u32 1.1754944e-38, %v883_v20  ;;  %vm882_vm11 = vcmp.eq.f32.partialorder %v881_v22, 8.507059e+37 }
 0x463   :  { %v922_v60 = vadd.f32 %v2455_v51, %v921_v59 }
 0x465   :  { %v926_v1 = vsel %vm925_vm6, %v2455_v51, %v922_v60 }
 0x466   :  { %v931_v6 = vsel %vm928_vm7, %v930_v2, %v926_v1  ;;  %v2459_v11 = vpop.eup %2458 }
 0x467   :  { %v873_v15 = vmul.f32 %v2459_v11, %v871_v4  ;;  %vm878_vm8 = vweird.f32 %v2459_v11  ;;  %v1002_v4 = vld [vmem:[#allocation6 + $0xc] sm:$0xf] }
 0x468   :  { %vm879_vm10 = vmor %vm877_vm9, %vm878_vm8 }
 0x469   :  { %v874_v16 = vsub.f32 1.0, %v873_v15 }
 0x46b   :  { %v875_v17 = vmul.f32 %v2459_v11, %v874_v16 }
 0x46d   :  { %v876_v18 = vadd.f32 %v2459_v11, %v875_v17 }
 0x46f   :  { %v880_v23 = vsel %vm879_vm10, %v2459_v11, %v876_v18 }
 0x470   :  { %v885_v27 = vsel %vm882_vm11, %v884_v24, %v880_v23 }
 0x4a5   :  { %v966_v5 = vpop.permute.xlu2 %965 }
 0x4a6   :  { %v2911_v8 = vmul.f32 %v966_v5, %v931_v6 }
 0x4a8   :  { %977 = vst.msk [vmem:[#allocation4] sm:$0x3] %vm188_vm0, %v2911_v8 }
 0x4ae   :  { %v974_v9 = vpop.permute.xlu2 %973 }
 0x4af   :  { %976 = vst.msk [vmem:[#allocation3] sm:$0x3] %vm188_vm0, %v974_v9  ;;  %v1000_v12 = vld [vmem:[#allocation4] sm:$0x3] }
 0x4b0   :  { %v1041_v14 = vpack.c.bf16 %v1000_v12, %v1000_v12 }
 0x4b2   :  { %2322 = vmatmul.msk.bf16.vlgmr.msrb.gmra.mxu2 %vm253_vm1, %v1041_v14  ;;  %2323 = vmatmul.msk.bf16.vlgmr.msrb.gmra.mxu3 %vm253_vm1, %v1041_v14 }
 0x4b3   :  { %1534 = vmatpush.bf16.msrb.mxu3 %v2633_v7  ;;  %1521 = vmatpush.bf16.msrb.mxu2 %v2622_v3 }
 0x4b6   :  { %v1169_v36 = vld [vmem:[#allocation3] sm:$0x3] }
 0x4b7   :  { %1535 = vmatpush.bf16.msrb.mxu3 %v2651_v13  ;;  %1522 = vmatpush.bf16.msrb.mxu2 %v2642_v10 }
 0x4bb   :  { %1536 = vmatpush.bf16.msrb.mxu3 %v2698_v29  ;;  %1523 = vmatpush.bf16.msrb.mxu2 %v2685_v25 }
 0x4bf   :  { %1537 = vmatpush.bf16.msrb.mxu3 %v2734_v41  ;;  %1524 = vmatpush.bf16.msrb.mxu2 %v2727_v39 }
 0x4c5   :  { %v948_v26 = vpop.permute.xlu0 %947 }
 0x4c6   :  { %v2926_v28 = vmul.f32 %v948_v26, %v885_v27 }
 0x4c8   :  { %969 = vst.msk [vmem:[#allocation2] sm:$0x3] %vm188_vm0, %v2926_v28 }
 0x4ce   :  { %v982_v31 = vpop.permute.xlu1 %981 }
 0x4cf   :  { %984 = vst.msk [vmem:[#allocation5] sm:$0x3] %vm188_vm0, %v982_v31  ;;  %v999_v32 = vld [vmem:[#allocation2] sm:$0x3] }
 0x4d0   :  { %v1003_v33 = vpack.c.bf16 %v999_v32, %v999_v32 }
 0x4d2   :  { %2320 = vmatmul.msk.bf16.vlgmr.msrb.gmra.mxu0 %vm253_vm1, %v1003_v33  ;;  %2321 = vmatmul.msk.bf16.vlgmr.msrb.gmra.mxu1 %vm253_vm1, %v1003_v33 }
 0x4d3   :  { %1483 = vmatpush.bf16.msrb.mxu0 %v2673_v21  ;;  %1496 = vmatpush.bf16.msrb.mxu1 %v2668_v19 }
 0x4d6   :  { %v1187_v35 = vld [vmem:[#allocation5] sm:$0x3] }
 0x4d7   :  { %1189 = vrot.lane.b32.xlu0 %v1187_v35, %s2581_s2  ;;  %1484 = vmatpush.bf16.msrb.mxu0 %v2711_v34 }
 0x4d8   :  { %1497 = vmatpush.bf16.msrb.mxu1 %v2701_v30 }
 0x4db   :  { %1485 = vmatpush.bf16.msrb.mxu0 %v2737_v42 }
 0x4dc   :  { %1498 = vmatpush.bf16.msrb.mxu1 %v2731_v40 }
 0x4df   :  { %1171 = vrot.lane.b32.xlu0 %v1169_v36, %s2581_s2  ;;  %1486 = vmatpush.bf16.msrb.mxu0 %v2757_v50 }
 0x4e0   :  { %1499 = vmatpush.bf16.msrb.mxu1 %v2753_v48 }
 0x535   :  { %v1054_v43 = vpop.f32.mrf.mxu2  ;;  %v1067_v44 = vpop.f32.mrf.mxu3 }
 0x536   :  { %v1073_v45 = vrot.slane %v1067_v44, 6 }
 0x538   :  { %v1074_v47 = vsel %vm286_vm2, %v1054_v43, %v1073_v45 }
 0x539   :  { %v1076_v51 = vadd.f32 %v1074_v47, %v1040_v46 }
 0x53b   :  { %1146 = vrot.lane.b32.xlu2 %v1076_v51, %s2581_s2  ;;  %v2326_v52 = vmul.f32 -1.442695, %v1076_v51  ;;  %v1143_v60 = vrot.slane %v1076_v51, 2 }
 0x53d   :  { %2460 = vpow2.f32 %v2326_v52  ;;  %v1056_v53 = vpop.f32.mrf.mxu2  ;;  %v1069_v55 = vpop.f32.mrf.mxu3 }
 0x543   :  { %v2461_v57 = vpop.eup %2460 }
 0x544   :  { %v1126_v58 = vadd.f32 1.0, %v2461_v57 }
 0x546   :  { %2462 = vrcp.f32 %v1126_v58  ;;  %v1138_v2 = vand.u32 2147483648, %v1126_v58  ;;  %v1136_v9 = vand.u32 2147483647, %v1126_v58  ;;  %vm1132_vm13 = vweird.f32 %v1126_v58 }
 0x547   :  { %2464 = vtanh.f32 %v1143_v60 }
 0x548   :  { %v1139_v15 = vor.u32 1.1754944e-38, %v1138_v2  ;;  %vm1137_vm15 = vcmp.eq.f32.partialorder %v1136_v9, 8.507059e+37 }
 0x549   :  { %v1190_v52 = vpop.permute.xlu0 %1189 }
 0x54c   :  { %v2463_v59 = vpop.eup %2462 }
 0x54d   :  { %v1128_v61 = vmul.f32 %v2463_v59, %v1126_v58  ;;  %vm1133_vm12 = vweird.f32 %v2463_v59  ;;  %v2465_v18 = vpop.eup %2464 }
 0x54e   :  { %vm1134_vm14 = vmor %vm1132_vm13, %vm1133_vm12 }
 0x54f   :  { %v1129_v62 = vsub.f32 1.0, %v1128_v61  ;;  %v1016_v63 = vpop.f32.mrf.mxu0  ;;  %v1029_v1 = vpop.f32.mrf.mxu1 }
 0x550   :  { %v1035_v5 = vrot.slane %v1029_v1, 6 }
 0x551   :  { %v1130_v6 = vmul.f32 %v2463_v59, %v1129_v62 }
 0x552   :  { %v1036_v11 = vsel %vm286_vm2, %v1016_v63, %v1035_v5 }
 0x553   :  { %v1131_v12 = vadd.f32 %v2463_v59, %v1130_v6  ;;  %v1038_v14 = vadd.f32 %v1036_v11, %v1002_v4 }
 0x555   :  { %v1135_v16 = vsel %vm1134_vm14, %v2463_v59, %v1131_v12  ;;  %v2324_v17 = vmul.f32 -1.442695, %v1038_v14  ;;  %1100 = vrot.lane.b32.xlu2 %v1038_v14, %s2581_s2  ;;  %v1097_v32 = vrot.slane %v1038_v14, 2  ;;  %v1172_v59 = vpop.permute.xlu0 %1171 }
 0x556   :  { %v1140_v20 = vsel %vm1137_vm15, %v1139_v15, %v1135_v16 }
 0x557   :  { %v1193_v22 = vmul.f32 %v2465_v18, %v1140_v20  ;;  %2466 = vpow2.f32 %v2324_v17  ;;  %v1018_v23 = vpop.f32.mrf.mxu0  ;;  %v1031_v24 = vpop.f32.mrf.mxu1  ;;  %v1192_v53 = vmul.f32 %v1190_v52, %v1140_v20 }
 0x559   :  { %1195 = vrot.lane.b32.xlu1 %v1193_v22, %s2581_s2 }
 0x55d   :  { %v2467_v26 = vpop.eup %2466 }
 0x55e   :  { %v1080_v27 = vadd.f32 1.0, %v2467_v26 }
 0x560   :  { %2468 = vrcp.f32 %v1080_v27  ;;  %v1092_v36 = vand.u32 2147483648, %v1080_v27  ;;  %v1090_v38 = vand.u32 2147483647, %v1080_v27  ;;  %vm1086_vm4 = vweird.f32 %v1080_v27 }
 0x561   :  { %2470 = vtanh.f32 %v1097_v32 }
 0x562   :  { %v1093_v44 = vor.u32 1.1754944e-38, %v1092_v36  ;;  %vm1091_vm6 = vcmp.eq.f32.partialorder %v1090_v38, 8.507059e+37 }
 0x566   :  { %v2469_v31 = vpop.eup %2468 }
 0x567   :  { %v1082_v33 = vmul.f32 %v2469_v31, %v1080_v27  ;;  %vm1087_vm3 = vweird.f32 %v2469_v31  ;;  %v2471_v46 = vpop.eup %2470 }
 0x568   :  { %vm1088_vm5 = vmor %vm1086_vm4, %vm1087_vm3 }
 0x569   :  { %v1083_v35 = vsub.f32 1.0, %v1082_v33 }
 0x56b   :  { %v1084_v37 = vmul.f32 %v2469_v31, %v1083_v35 }
 0x56d   :  { %v1085_v43 = vadd.f32 %v2469_v31, %v1084_v37 }
 0x56f   :  { %v1089_v45 = vsel %vm1088_vm5, %v2469_v31, %v1085_v43 }
 0x570   :  { %v1094_v47 = vsel %vm1091_vm6, %v1093_v44, %v1089_v45 }
 0x571   :  { %v1175_v51 = vmul.f32 %v2471_v46, %v1094_v47  ;;  %v1174_v60 = vmul.f32 %v1172_v59, %v1094_v47 }
 0x573   :  { %1177 = vrot.lane.b32.xlu1 %v1175_v51, %s2581_s2 }
 0x595   :  { %v1147_v4 = vpop.permute.xlu2 %1146 }
 0x596   :  { %v1148_v5 = vrot.slane %v1147_v4, 2  ;;  %v2222_v4 = vld [vmem:[%s3232_s1 + $0x1c] sm:$0xf] }
 0x597   :  { %113 = vst [vmem:[#allocation7 + $0xc] sm:$0xf] %v2222_v4 }
 0x598   :  { %v2327_v6 = vmul.f32 -1.442695, %v1148_v5  ;;  %v37_v5 = vld [vmem:[%s3231_s0 + $0x20] sm:$0xf] }
 0x599   :  { %38 = vst [vmem:[#allocation6 + $0x10] sm:$0xf] %v37_v5 }
 0x5af   :  { %v1101_v12 = vpop.permute.xlu2 %1100 }
 0x5b0   :  { %v1102_v14 = vrot.slane %v1101_v12, 2  ;;  %v1276_v12 = vld [vmem:[#allocation7 + $0xc] sm:$0xf] }
 0x5b2   :  { %v2325_v16 = vmul.f32 -1.442695, %v1102_v14 }
 0x5cb   :  { %v1196_v55 = vpop.permute.xlu1 %1195 }
 0x5cc   :  { %v1198_v57 = vadd.f32 %v1196_v55, %v1192_v53 }
 0x5ce   :  { %2472 = vtanh.f32 %v1198_v57 }
 0x5d4   :  { %v2473_v58 = vpop.eup %2472 }
 0x5d5   :  { %1201 = vrot.lane.b32.xlu0 %v2473_v58, %s2581_s2 }
 0x5e5   :  { %v1178_v61 = vpop.permute.xlu1 %1177 }
 0x5e6   :  { %v1180_v62 = vadd.f32 %v1178_v61, %v1174_v60 }
 0x5e8   :  { %2474 = vtanh.f32 %v1180_v62  ;;  %1207 = vst [vmem:[#allocation1] ss:$4 sm:$0xff] %v1180_v62 }
 0x5e9   :  { %2476 = vpow2.f32 %v2327_v6 }
 0x5ee   :  { %v2475_v63 = vpop.eup %2474 }
 0x5ef   :  { %1183 = vrot.lane.b32.xlu1 %v2475_v63, %s2581_s2  ;;  %v1208_v1 = vld.sshfl [vmem:[#allocation1] sm:$0xff pattern:$0x73625140]  ;;  %v2477_v9 = vpop.eup %2476 }
 0x5f0   :  { %1209 = vrot.lane.b32.xlu0 %v1208_v1, %s2581_s2  ;;  %1215 = vst [vmem:[#allocation1] ss:$4 sm:$0xff] %v1198_v57  ;;  %v1153_v11 = vadd.f32 1.0, %v2477_v9 }
 0x5f2   :  { %2478 = vrcp.f32 %v1153_v11  ;;  %v1165_v26 = vand.u32 2147483648, %v1153_v11  ;;  %vm1159_vm8 = vweird.f32 %v1153_v11  ;;  %v1163_v27 = vand.u32 2147483647, %v1153_v11 }
 0x5f3   :  { %2480 = vpow2.f32 %v2325_v16 }
 0x5f4   :  { %v1166_v32 = vor.u32 1.1754944e-38, %v1165_v26  ;;  %vm1164_vm10 = vcmp.eq.f32.partialorder %v1163_v27, 8.507059e+37  ;;  %v1238_v27 = vld [vmem:[#allocation6 + $0x10] sm:$0xf] }
 0x5f7   :  { %v1216_v2 = vld.sshfl [vmem:[#allocation1] sm:$0xff pattern:$0x73625140] }
 0x5f8   :  { %1217 = vrot.lane.b32.xlu2 %v1216_v2, %s2581_s2  ;;  %v2479_v15 = vpop.eup %2478 }
 0x5f9   :  { %v1155_v17 = vmul.f32 %v2479_v15, %v1153_v11  ;;  %v2481_v22 = vpop.eup %2480  ;;  %vm1160_vm7 = vweird.f32 %v2479_v15 }
 0x5fa   :  { %v1107_v24 = vadd.f32 1.0, %v2481_v22  ;;  %vm1161_vm9 = vmor %vm1159_vm8, %vm1160_vm7 }
 0x5fb   :  { %v1156_v18 = vsub.f32 1.0, %v1155_v17 }
 0x5fc   :  { %2482 = vrcp.f32 %v1107_v24  ;;  %v1119_v53 = vand.u32 2147483648, %v1107_v24  ;;  %vm1113_vm12 = vweird.f32 %v1107_v24  ;;  %v1117_v55 = vand.u32 2147483647, %v1107_v24 }
 0x5fd   :  { %v1157_v20 = vmul.f32 %v2479_v15, %v1156_v18 }
 0x5fe   :  { %v1120_v58 = vor.u32 1.1754944e-38, %v1119_v53  ;;  %vm1118_vm14 = vcmp.eq.f32.partialorder %v1117_v55, 8.507059e+37 }
 0x5ff   :  { %v1158_v23 = vadd.f32 %v2479_v15, %v1157_v20 }
 0x601   :  { %v1162_v31 = vsel %vm1161_vm9, %v2479_v15, %v1158_v23 }
 0x602   :  { %v1167_v33 = vsel %vm1164_vm10, %v1166_v32, %v1162_v31  ;;  %v2483_v37 = vpop.eup %2482 }
 0x603   :  { %v1109_v38 = vmul.f32 %v2483_v37, %v1107_v24  ;;  %vm1114_vm11 = vweird.f32 %v2483_v37 }
 0x604   :  { %vm1115_vm13 = vmor %vm1113_vm12, %vm1114_vm11 }
 0x605   :  { %v1110_v46 = vsub.f32 1.0, %v1109_v38 }
 0x607   :  { %v1111_v47 = vmul.f32 %v2483_v37, %v1110_v46 }
 0x609   :  { %v1112_v52 = vadd.f32 %v2483_v37, %v1111_v47 }
 0x60b   :  { %v1116_v57 = vsel %vm1115_vm13, %v2483_v37, %v1112_v52 }
 0x60c   :  { %v1121_v59 = vsel %vm1118_vm14, %v1120_v58, %v1116_v57 }
 0x647   :  { %v1202_v35 = vpop.permute.xlu0 %1201 }
 0x648   :  { %v2959_v36 = vmul.f32 %v1202_v35, %v1167_v33 }
 0x64a   :  { %1213 = vst.msk [vmem:[#allocation4] sm:$0x3] %vm188_vm0, %v2959_v36 }
 0x651   :  { %v1236_v43 = vld [vmem:[#allocation4] sm:$0x3] }
 0x652   :  { %v1218_v44 = vpop.permute.xlu2 %1217  ;;  %v1277_v45 = vpack.c.bf16 %v1236_v43, %v1236_v43 }
 0x653   :  { %1220 = vst.msk [vmem:[#allocation5] sm:$0x3] %vm188_vm0, %v1218_v44 }
 0x654   :  { %2332 = vmatmul.msk.bf16.vlgmr.msra.gmra.mxu2 %vm253_vm1, %v1277_v45  ;;  %2333 = vmatmul.msk.bf16.vlgmr.msra.gmra.mxu3 %vm253_vm1, %v1277_v45 }
 0x655   :  { %1770 = vmatpush.bf16.msra.mxu3 %v2633_v7  ;;  %1757 = vmatpush.bf16.msra.mxu2 %v2622_v3 }
 0x659   :  { %1771 = vmatpush.bf16.msra.mxu3 %v2651_v13  ;;  %1758 = vmatpush.bf16.msra.mxu2 %v2642_v10 }
 0x65a   :  { %v1423_v51 = vld [vmem:[#allocation5] sm:$0x3] }
 0x65b   :  { %1425 = vrot.lane.b32.xlu1 %v1423_v51, %s2581_s2 }
 0x65d   :  { %1772 = vmatpush.bf16.msra.mxu3 %v2698_v29  ;;  %1759 = vmatpush.bf16.msra.mxu2 %v2685_v25 }
 0x661   :  { %v1184_v60 = vpop.permute.xlu1 %1183  ;;  %1773 = vmatpush.bf16.msra.mxu3 %v2734_v41  ;;  %1760 = vmatpush.bf16.msra.mxu2 %v2727_v39 }
 0x662   :  { %v2975_v61 = vmul.f32 %v1184_v60, %v1121_v59  ;;  %v1210_v62 = vpop.permute.xlu0 %1209 }
 0x663   :  { %1212 = vst.msk [vmem:[#allocation3] sm:$0x3] %vm188_vm0, %v1210_v62 }
 0x664   :  { %1205 = vst.msk [vmem:[#allocation2] sm:$0x3] %vm188_vm0, %v2975_v61 }
 0x66a   :  { %v1405_v63 = vld [vmem:[#allocation3] sm:$0x3] }
 0x66b   :  { %1407 = vrot.lane.b32.xlu0 %v1405_v63, %s2581_s2  ;;  %v1235_v1 = vld [vmem:[#allocation2] sm:$0x3] }
 0x66c   :  { %v1239_v2 = vpack.c.bf16 %v1235_v1, %v1235_v1 }
 0x66e   :  { %2330 = vmatmul.msk.bf16.vlgmr.msra.gmra.mxu0 %vm253_vm1, %v1239_v2  ;;  %2331 = vmatmul.msk.bf16.vlgmr.msra.gmra.mxu1 %vm253_vm1, %v1239_v2 }
 0x66f   :  { %1719 = vmatpush.bf16.msra.mxu0 %v2673_v21  ;;  %1732 = vmatpush.bf16.msra.mxu1 %v2668_v19 }
 0x673   :  { %1720 = vmatpush.bf16.msra.mxu0 %v2711_v34  ;;  %1733 = vmatpush.bf16.msra.mxu1 %v2701_v30 }
 0x677   :  { %1721 = vmatpush.bf16.msra.mxu0 %v2737_v42  ;;  %1734 = vmatpush.bf16.msra.mxu1 %v2731_v40 }
 0x67b   :  { %1722 = vmatpush.bf16.msra.mxu0 %v2757_v50  ;;  %1735 = vmatpush.bf16.msra.mxu1 %v2753_v48 }
 0x6d7   :  { %v1290_v6 = vpop.f32.mrf.mxu2  ;;  %v1303_v9 = vpop.f32.mrf.mxu3 }
 0x6d8   :  { %v1309_v11 = vrot.slane %v1303_v9, 6 }
 0x6da   :  { %v1310_v14 = vsel %vm286_vm2, %v1290_v6, %v1309_v11 }
 0x6db   :  { %v1312_v15 = vadd.f32 %v1310_v14, %v1276_v12 }
 0x6dd   :  { %v2336_v16 = vmul.f32 -1.442695, %v1312_v15  ;;  %1382 = vrot.lane.b32.xlu1 %v1312_v15, %s2581_s2  ;;  %v1379_v32 = vrot.slane %v1312_v15, 2 }
 0x6df   :  { %2484 = vpow2.f32 %v2336_v16  ;;  %v1292_v17 = vpop.f32.mrf.mxu2  ;;  %v1305_v18 = vpop.f32.mrf.mxu3 }
 0x6e0   :  { %v1426_v18 = vpop.permute.xlu1 %1425 }
 0x6e5   :  { %v2485_v20 = vpop.eup %2484 }
 0x6e6   :  { %v1362_v22 = vadd.f32 1.0, %v2485_v20 }
 0x6e8   :  { %2486 = vrcp.f32 %v1362_v22  ;;  %v1374_v44 = vand.u32 2147483648, %v1362_v22  ;;  %v1372_v51 = vand.u32 2147483647, %v1362_v22  ;;  %vm1368_vm3 = vweird.f32 %v1362_v22 }
 0x6e9   :  { %2488 = vtanh.f32 %v1379_v32 }
 0x6ea   :  { %v1375_v53 = vor.u32 1.1754944e-38, %v1374_v44  ;;  %vm1373_vm5 = vcmp.eq.f32.partialorder %v1372_v51, 8.507059e+37 }
 0x6eb   :  { %v1252_v23 = vpop.f32.mrf.mxu0  ;;  %v1265_v24 = vpop.f32.mrf.mxu1 }
 0x6ec   :  { %v1271_v26 = vrot.slane %v1265_v24, 6 }
 0x6ee   :  { %v2487_v31 = vpop.eup %2486  ;;  %v1272_v33 = vsel %vm286_vm2, %v1252_v23, %v1271_v26  ;;  %v1408_v26 = vpop.permute.xlu0 %1407 }
 0x6ef   :  { %v1274_v35 = vadd.f32 %v1272_v33, %v1238_v27  ;;  %v1364_v37 = vmul.f32 %v2487_v31, %v1362_v22  ;;  %vm1369_vm15 = vweird.f32 %v2487_v31  ;;  %v2489_v57 = vpop.eup %2488 }
 0x6f0   :  { %vm1370_vm4 = vmor %vm1368_vm3, %vm1369_vm15 }
 0x6f1   :  { %1336 = vrot.lane.b32.xlu0 %v1274_v35, %s2581_s2  ;;  %v2334_v38 = vmul.f32 -1.442695, %v1274_v35  ;;  %v1365_v43 = vsub.f32 1.0, %v1364_v37  ;;  %v1333_v1 = vrot.slane %v1274_v35, 2 }
 0x6f3   :  { %2490 = vpow2.f32 %v2334_v38  ;;  %v1254_v45 = vpop.f32.mrf.mxu0  ;;  %v1267_v46 = vpop.f32.mrf.mxu1  ;;  %v1366_v47 = vmul.f32 %v2487_v31, %v1365_v43 }
 0x6f5   :  { %v1367_v52 = vadd.f32 %v2487_v31, %v1366_v47 }
 0x6f7   :  { %v1371_v55 = vsel %vm1370_vm4, %v2487_v31, %v1367_v52 }
 0x6f8   :  { %v1376_v58 = vsel %vm1373_vm5, %v1375_v53, %v1371_v55 }
 0x6f9   :  { %v2491_v59 = vpop.eup %2490  ;;  %v1429_v60 = vmul.f32 %v2489_v57, %v1376_v58  ;;  %v1428_v20 = vmul.f32 %v1426_v18, %v1376_v58 }
 0x6fa   :  { %v1316_v62 = vadd.f32 1.0, %v2491_v59 }
 0x6fb   :  { %1431 = vrot.lane.b32.xlu2 %v1429_v60, %s2581_s2 }
 0x6fc   :  { %2492 = vrcp.f32 %v1316_v62  ;;  %v1328_v5 = vand.u32 2147483648, %v1316_v62  ;;  %v1326_v9 = vand.u32 2147483647, %v1316_v62  ;;  %vm1322_vm7 = vweird.f32 %v1316_v62 }
 0x6fd   :  { %2494 = vtanh.f32 %v1333_v1 }
 0x6fe   :  { %v1329_v12 = vor.u32 1.1754944e-38, %v1328_v5  ;;  %vm1327_vm9 = vcmp.eq.f32.partialorder %v1326_v9, 8.507059e+37 }
 0x702   :  { %v2493_v63 = vpop.eup %2492 }
 0x703   :  { %v1318_v2 = vmul.f32 %v2493_v63, %v1316_v62  ;;  %vm1323_vm6 = vweird.f32 %v2493_v63  ;;  %v2495_v15 = vpop.eup %2494 }
 0x704   :  { %vm1324_vm8 = vmor %vm1322_vm7, %vm1323_vm6 }
 0x705   :  { %v1319_v4 = vsub.f32 1.0, %v1318_v2 }
 0x707   :  { %v1320_v6 = vmul.f32 %v2493_v63, %v1319_v4 }
 0x709   :  { %v1321_v11 = vadd.f32 %v2493_v63, %v1320_v6 }
 0x70b   :  { %v1325_v14 = vsel %vm1324_vm8, %v2493_v63, %v1321_v11 }
 0x70c   :  { %v1330_v16 = vsel %vm1327_vm9, %v1329_v12, %v1325_v14 }
 0x70d   :  { %v1411_v17 = vmul.f32 %v2495_v15, %v1330_v16  ;;  %v1410_v27 = vmul.f32 %v1408_v26, %v1330_v16 }
 0x70f   :  { %1413 = vrot.lane.b32.xlu2 %v1411_v17, %s2581_s2 }
 0x74f   :  { %v1383_v44 = vpop.permute.xlu1 %1382 }
 0x750   :  { %v1384_v45 = vrot.slane %v1383_v44, 2 }
 0x752   :  { %v2337_v47 = vmul.f32 -1.442695, %v1384_v45 }
 0x755   :  { %v1432_v22 = vpop.permute.xlu2 %1431 }
 0x756   :  { %v1434_v23 = vadd.f32 %v1432_v22, %v1428_v20 }
 0x758   :  { %2496 = vtanh.f32 %v1434_v23 }
 0x75e   :  { %v2497_v24 = vpop.eup %2496 }
 0x75f   :  { %1437 = vrot.lane.b32.xlu1 %v2497_v24, %s2581_s2 }
 0x763   :  { %v1337_v38 = vpop.permute.xlu0 %1336 }
 0x764   :  { %v1338_v43 = vrot.slane %v1337_v38, 2 }
 0x766   :  { %v2335_v46 = vmul.f32 -1.442695, %v1338_v43 }
 0x769   :  { %v1414_v31 = vpop.permute.xlu2 %1413 }
 0x76a   :  { %v1416_v32 = vadd.f32 %v1414_v31, %v1410_v27 }
 0x76c   :  { %2498 = vtanh.f32 %v1416_v32  ;;  %1443 = vst [vmem:[#allocation1] ss:$4 sm:$0xff] %v1416_v32 }
 0x76d   :  { %2500 = vpow2.f32 %v2335_v46 }
 0x76e   :  { %2502 = vpow2.f32 %v2337_v47 }
 0x772   :  { %v2499_v33 = vpop.eup %2498 }
 0x773   :  { %1419 = vrot.lane.b32.xlu2 %v2499_v33, %s2581_s2  ;;  %v1444_v35 = vld.sshfl [vmem:[#allocation1] sm:$0xff pattern:$0x73625140]  ;;  %v2501_v51 = vpop.eup %2500 }
 0x774   :  { %1445 = vrot.lane.b32.xlu1 %v1444_v35, %s2581_s2  ;;  %1451 = vst [vmem:[#allocation1] ss:$4 sm:$0xff] %v1434_v23  ;;  %v1343_v52 = vadd.f32 1.0, %v2501_v51  ;;  %v2503_v53 = vpop.eup %2502 }
 0x775   :  { %v1389_v55 = vadd.f32 1.0, %v2503_v53 }
 0x776   :  { %2504 = vrcp.f32 %v1343_v52  ;;  %v1355_v5 = vand.u32 2147483648, %v1343_v52  ;;  %vm1349_vm11 = vweird.f32 %v1343_v52  ;;  %v1353_v6 = vand.u32 2147483647, %v1343_v52 }
 0x777   :  { %2506 = vrcp.f32 %v1389_v55  ;;  %v1401_v14 = vand.u32 2147483648, %v1389_v55  ;;  %vm1395_vm15 = vweird.f32 %v1389_v55  ;;  %v1399_v15 = vand.u32 2147483647, %v1389_v55 }
 0x778   :  { %v1356_v12 = vor.u32 1.1754944e-38, %v1355_v5  ;;  %vm1354_vm14 = vcmp.eq.f32.partialorder %v1353_v6, 8.507059e+37 }
 0x779   :  { %v1402_v22 = vor.u32 1.1754944e-38, %v1401_v14  ;;  %vm1400_vm4 = vcmp.eq.f32.partialorder %v1399_v15, 8.507059e+37 }
 0x77b   :  { %v1452_v37 = vld.sshfl [vmem:[#allocation1] sm:$0xff pattern:$0x73625140] }
 0x77c   :  { %1453 = vrot.lane.b32.xlu0 %v1452_v37, %s2581_s2  ;;  %v2505_v57 = vpop.eup %2504 }
 0x77d   :  { %v1345_v58 = vmul.f32 %v2505_v57, %v1343_v52  ;;  %v2507_v59 = vpop.eup %2506  ;;  %vm1350_vm10 = vweird.f32 %v2505_v57 }
 0x77e   :  { %v1391_v62 = vmul.f32 %v2507_v59, %v1389_v55  ;;  %vm1351_vm12 = vmor %vm1349_vm11, %vm1350_vm10  ;;  %vm1396_vm13 = vweird.f32 %v2507_v59 }
 0x77f   :  { %v1346_v60 = vsub.f32 1.0, %v1345_v58  ;;  %vm1397_vm3 = vmor %vm1395_vm15, %vm1396_vm13 }
 0x780   :  { %v1392_v1 = vsub.f32 1.0, %v1391_v62 }
 0x781   :  { %v1347_v63 = vmul.f32 %v2505_v57, %v1346_v60 }
 0x782   :  { %v1393_v4 = vmul.f32 %v2507_v59, %v1392_v1 }
 0x783   :  { %v1348_v2 = vadd.f32 %v2505_v57, %v1347_v63 }
 0x784   :  { %v1394_v11 = vadd.f32 %v2507_v59, %v1393_v4 }
 0x785   :  { %v1352_v9 = vsel %vm1351_vm12, %v2505_v57, %v1348_v2 }
 0x786   :  { %v1357_v16 = vsel %vm1354_vm14, %v1356_v12, %v1352_v9  ;;  %v1398_v20 = vsel %vm1397_vm3, %v2507_v59, %v1394_v11 }
 0x787   :  { %v1403_v23 = vsel %vm1400_vm4, %v1402_v22, %v1398_v20 }
 0x7cd   :  { %v1420_v17 = vpop.permute.xlu2 %1419 }
 0x7ce   :  { %v3007_v18 = vmul.f32 %v1420_v17, %v1357_v16 }
 0x7d0   :  { %1441 = vst.msk [vmem:[#allocation2] sm:$0x3] %vm188_vm0, %v3007_v18 }
 0x7d1   :  { %v1438_v24 = vpop.permute.xlu1 %1437 }
 0x7d2   :  { %v3011_v26 = vmul.f32 %v1438_v24, %v1403_v23 }
 0x7d4   :  { %1449 = vst.msk [vmem:[#allocation4] sm:$0x3] %vm188_vm0, %v3011_v26 }
 0x7d7   :  { %v1471_v27 = vld [vmem:[#allocation2] sm:$0x3] }
 0x7d8   :  { %v1475_v31 = vpack.c.bf16 %v1471_v27, %v1471_v27 }
 0x7da   :  { %2340 = vmatmul.msk.bf16.vlgmr.msrb.gmra.mxu0 %vm253_vm1, %v1475_v31  ;;  %2341 = vmatmul.msk.bf16.vlgmr.msrb.gmra.mxu1 %vm253_vm1, %v1475_v31 }
 0x7db   :  { %v1472_v32 = vld [vmem:[#allocation4] sm:$0x3]  ;;  %1955 = vmatpush.bf16.msrb.mxu0 %v2673_v21  ;;  %1968 = vmatpush.bf16.msrb.mxu1 %v2668_v19  ;;  %v2221_v21 = vld [vmem:[%s3232_s1 + $0x14] sm:$0xf] }
 0x7dc   :  { %v1513_v33 = vpack.c.bf16 %v1472_v32, %v1472_v32  ;;  %111 = vst [vmem:[#allocation7 + $0x8] sm:$0xf] %v2221_v21 }
 0x7de   :  { %2342 = vmatmul.msk.bf16.vlgmr.msrb.gmra.mxu2 %vm253_vm1, %v1513_v33  ;;  %2343 = vmatmul.msk.bf16.vlgmr.msrb.gmra.mxu3 %vm253_vm1, %v1513_v33 }
 0x7df   :  { %1956 = vmatpush.bf16.msrb.mxu0 %v2711_v34  ;;  %1969 = vmatpush.bf16.msrb.mxu1 %v2701_v30 }
 0x7e0   :  { %2005 = vmatpush.bf16.msrb.mxu3 %v2633_v7  ;;  %1992 = vmatpush.bf16.msrb.mxu2 %v2622_v3 }
 0x7e3   :  { %1957 = vmatpush.bf16.msrb.mxu0 %v2737_v42  ;;  %1970 = vmatpush.bf16.msrb.mxu1 %v2731_v40  ;;  %v1512_v37 = vld [vmem:[#allocation7 + $0x8] sm:$0xf] }
 0x7e4   :  { %2006 = vmatpush.bf16.msrb.mxu3 %v2651_v13  ;;  %1993 = vmatpush.bf16.msrb.mxu2 %v2642_v10  ;;  %v39_v13 = vld [vmem:[%s3231_s0 + $0x28] sm:$0xf] }
 0x7e5   :  { %40 = vst [vmem:[#allocation6 + $0x14] sm:$0xf] %v39_v13 }
 0x7e6   :  { %v1446_v19 = vpop.permute.xlu1 %1445 }
 0x7e7   :  { %1448 = vst.msk [vmem:[#allocation3] sm:$0x3] %vm188_vm0, %v1446_v19  ;;  %1958 = vmatpush.bf16.msrb.mxu0 %v2757_v50  ;;  %1971 = vmatpush.bf16.msrb.mxu1 %v2753_v48 }
 0x7e8   :  { %2007 = vmatpush.bf16.msrb.mxu3 %v2698_v29  ;;  %1994 = vmatpush.bf16.msrb.mxu2 %v2685_v25 }
 0x7ec   :  { %2008 = vmatpush.bf16.msrb.mxu3 %v2734_v41  ;;  %1995 = vmatpush.bf16.msrb.mxu2 %v2727_v39  ;;  %v1474_v34 = vld [vmem:[#allocation6 + $0x14] sm:$0xf] }
 0x7ee   :  { %v1454_v3 = vpop.permute.xlu0 %1453  ;;  %v1641_v7 = vld [vmem:[#allocation3] sm:$0x3] }
 0x7ef   :  { %1456 = vst.msk [vmem:[#allocation5] sm:$0x3] %vm188_vm0, %v1454_v3  ;;  %1643 = vrot.lane.b32.xlu1 %v1641_v7, %s2581_s2 }
 0x7f6   :  { %v1659_v10 = vld [vmem:[#allocation5] sm:$0x3] }
 0x7f7   :  { %1661 = vrot.lane.b32.xlu2 %v1659_v10, %s2581_s2 }
 0x851   :  { %v1662_v19 = vpop.permute.xlu2 %1661 }
 0x857   :  { %v1488_v25 = vpop.f32.mrf.mxu0  ;;  %v1501_v29 = vpop.f32.mrf.mxu1 }
 0x858   :  { %v1507_v30 = vrot.slane %v1501_v29, 6 }
 0x85a   :  { %v1508_v39 = vsel %vm286_vm2, %v1488_v25, %v1507_v30 }
 0x85b   :  { %v1510_v40 = vadd.f32 %v1508_v39, %v1474_v34 }
 0x85d   :  { %v2344_v41 = vmul.f32 -1.442695, %v1510_v40  ;;  %1572 = vrot.lane.b32.xlu1 %v1510_v40, %s2581_s2  ;;  %v1569_v53 = vrot.slane %v1510_v40, 2 }
 0x85f   :  { %2508 = vpow2.f32 %v2344_v41  ;;  %v1490_v42 = vpop.f32.mrf.mxu0  ;;  %v1503_v48 = vpop.f32.mrf.mxu1 }
 0x861   :  { %v1526_v50 = vpop.f32.mrf.mxu2  ;;  %v1539_v35 = vpop.f32.mrf.mxu3 }
 0x862   :  { %v1545_v38 = vrot.slane %v1539_v35, 6  ;;  %v1644_v3 = vpop.permute.xlu1 %1643 }
 0x864   :  { %v1546_v43 = vsel %vm286_vm2, %v1526_v50, %v1545_v38 }
 0x865   :  { %v2509_v44 = vpop.eup %2508  ;;  %v1548_v45 = vadd.f32 %v1546_v43, %v1512_v37 }
 0x866   :  { %v1552_v46 = vadd.f32 1.0, %v2509_v44 }
 0x867   :  { %v2346_v47 = vmul.f32 -1.442695, %v1548_v45  ;;  %v1615_v11 = vrot.slane %v1548_v45, 2 }
 0x868   :  { %2510 = vrcp.f32 %v1552_v46  ;;  %v1564_v62 = vand.u32 2147483648, %v1552_v46  ;;  %v1562_v1 = vand.u32 2147483647, %v1552_v46  ;;  %vm1558_vm6 = vweird.f32 %v1552_v46 }
 0x869   :  { %2512 = vpow2.f32 %v2346_v47  ;;  %v1528_v51 = vpop.f32.mrf.mxu2  ;;  %v1541_v52 = vpop.f32.mrf.mxu3 }
 0x86a   :  { %2514 = vtanh.f32 %v1569_v53  ;;  %v1565_v4 = vor.u32 1.1754944e-38, %v1564_v62  ;;  %vm1563_vm8 = vcmp.eq.f32.partialorder %v1562_v1, 8.507059e+37 }
 0x86e   :  { %v2511_v55 = vpop.eup %2510 }
 0x86f   :  { %v2513_v57 = vpop.eup %2512  ;;  %v1554_v58 = vmul.f32 %v2511_v55, %v1552_v46  ;;  %vm1559_vm5 = vweird.f32 %v2511_v55 }
 0x870   :  { %v1598_v59 = vadd.f32 1.0, %v2513_v57  ;;  %vm1560_vm7 = vmor %vm1558_vm6, %vm1559_vm5  ;;  %v2515_v5 = vpop.eup %2514 }
 0x871   :  { %v1555_v60 = vsub.f32 1.0, %v1554_v58 }
 0x872   :  { %2516 = vrcp.f32 %v1598_v59  ;;  %v1610_v17 = vand.u32 2147483648, %v1598_v59  ;;  %v1608_v22 = vand.u32 2147483647, %v1598_v59  ;;  %vm1604_vm10 = vweird.f32 %v1598_v59 }
 0x873   :  { %v1556_v63 = vmul.f32 %v2511_v55, %v1555_v60  ;;  %2518 = vtanh.f32 %v1615_v11 }
 0x874   :  { %v1611_v24 = vor.u32 1.1754944e-38, %v1610_v17  ;;  %vm1609_vm12 = vcmp.eq.f32.partialorder %v1608_v22, 8.507059e+37 }
 0x875   :  { %v1557_v2 = vadd.f32 %v2511_v55, %v1556_v63 }
 0x877   :  { %v1561_v6 = vsel %vm1560_vm7, %v2511_v55, %v1557_v2 }
 0x878   :  { %v2517_v9 = vpop.eup %2516  ;;  %v1566_v12 = vsel %vm1563_vm8, %v1565_v4, %v1561_v6 }
 0x879   :  { %v1647_v14 = vmul.f32 %v2515_v5, %v1566_v12  ;;  %v1600_v15 = vmul.f32 %v2517_v9, %v1598_v59  ;;  %vm1605_vm9 = vweird.f32 %v2517_v9  ;;  %v2519_v31 = vpop.eup %2518  ;;  %v1646_v7 = vmul.f32 %v1644_v3, %v1566_v12  ;;  %v2220_v3 = vld [vmem:[%s3232_s1 + $0xc] sm:$0xf] }
 0x87a   :  { %vm1606_vm11 = vmor %vm1604_vm10, %vm1605_vm9  ;;  %109 = vst [vmem:[#allocation7 + $0x4] sm:$0xf] %v2220_v3 }
 0x87b   :  { %1649 = vrot.lane.b32.xlu2 %v1647_v14, %s2581_s2  ;;  %v1601_v16 = vsub.f32 1.0, %v1600_v15 }
 0x87d   :  { %v1602_v20 = vmul.f32 %v2517_v9, %v1601_v16 }
 0x87f   :  { %v1603_v23 = vadd.f32 %v2517_v9, %v1602_v20 }
 0x881   :  { %v1607_v27 = vsel %vm1606_vm11, %v2517_v9, %v1603_v23 }
 0x882   :  { %v1612_v32 = vsel %vm1609_vm12, %v1611_v24, %v1607_v27 }
 0x883   :  { %v1665_v33 = vmul.f32 %v2519_v31, %v1612_v32  ;;  %v1664_v25 = vmul.f32 %v1662_v19, %v1612_v32  ;;  %v41_v19 = vld [vmem:[%s3231_s0 + $0x30] sm:$0xf] }
 0x884   :  { %42 = vst [vmem:[#allocation6 + $0x18] sm:$0xf] %v41_v19 }
 0x885   :  { %1667 = vrot.lane.b32.xlu0 %v1665_v33, %s2581_s2 }
 0x88d   :  { %1618 = vrot.lane.b32.xlu0 %v1548_v45, %s2581_s2 }
 0x8cf   :  { %v1573_v41 = vpop.permute.xlu1 %1572 }
 0x8d0   :  { %v1574_v42 = vrot.slane %v1573_v41, 2 }
 0x8d2   :  { %v2345_v48 = vmul.f32 -1.442695, %v1574_v42 }
 0x8d5   :  { %v1650_v10 = vpop.permute.xlu2 %1649 }
 0x8d6   :  { %v1652_v13 = vadd.f32 %v1650_v10, %v1646_v7 }
 0x8d8   :  { %2520 = vtanh.f32 %v1652_v13  ;;  %1679 = vst [vmem:[#allocation1] ss:$4 sm:$0xff] %v1652_v13 }
 0x8de   :  { %v2521_v21 = vpop.eup %2520 }
 0x8df   :  { %1655 = vrot.lane.b32.xlu0 %v2521_v21, %s2581_s2  ;;  %v1680_v34 = vld.sshfl [vmem:[#allocation1] sm:$0xff pattern:$0x73625140]  ;;  %v1710_v21 = vld [vmem:[#allocation6 + $0x18] sm:$0xf] }
 0x8f7   :  { %v1668_v29 = vpop.permute.xlu0 %1667 }
 0x8f8   :  { %v1670_v30 = vadd.f32 %v1668_v29, %v1664_v25 }
 0x8fa   :  { %2522 = vtanh.f32 %v1670_v30  ;;  %1687 = vst [vmem:[#allocation1] ss:$4 sm:$0xff] %v1670_v30 }
 0x8fb   :  { %2524 = vpow2.f32 %v2345_v48 }
 0x8ff   :  { %v1619_v50 = vpop.permute.xlu0 %1618 }
 0x900   :  { %v2523_v39 = vpop.eup %2522  ;;  %v1620_v35 = vrot.slane %v1619_v50, 2  ;;  %v1748_v50 = vld [vmem:[#allocation7 + $0x4] sm:$0xf] }
 0x901   :  { %1673 = vrot.lane.b32.xlu2 %v2523_v39, %s2581_s2  ;;  %v1688_v40 = vld.sshfl [vmem:[#allocation1] sm:$0xff pattern:$0x73625140]  ;;  %v2525_v37 = vpop.eup %2524 }
 0x902   :  { %1689 = vrot.lane.b32.xlu1 %v1688_v40, %s2581_s2  ;;  %v2347_v38 = vmul.f32 -1.442695, %v1620_v35  ;;  %v1579_v43 = vadd.f32 1.0, %v2525_v37 }
 0x904   :  { %2526 = vpow2.f32 %v2347_v38  ;;  %v1591_v58 = vand.u32 2147483648, %v1579_v43  ;;  %vm1585_vm14 = vweird.f32 %v1579_v43  ;;  %v1589_v59 = vand.u32 2147483647, %v1579_v43 }
 0x905   :  { %2528 = vrcp.f32 %v1579_v43 }
 0x906   :  { %v1592_v63 = vor.u32 1.1754944e-38, %v1591_v58  ;;  %vm1590_vm3 = vcmp.eq.f32.partialorder %v1589_v59, 8.507059e+37 }
 0x909   :  { %1681 = vrot.lane.b32.xlu2 %v1680_v34, %s2581_s2 }
 0x90a   :  { %v2527_v44 = vpop.eup %2526 }
 0x90b   :  { %v2529_v45 = vpop.eup %2528  ;;  %v1625_v46 = vadd.f32 1.0, %v2527_v44 }
 0x90c   :  { %v1581_v47 = vmul.f32 %v2529_v45, %v1579_v43  ;;  %vm1586_vm13 = vweird.f32 %v2529_v45 }
 0x90d   :  { %2530 = vrcp.f32 %v1625_v46  ;;  %vm1587_vm15 = vmor %vm1585_vm14, %vm1586_vm13  ;;  %v1637_v9 = vand.u32 2147483648, %v1625_v46  ;;  %vm1631_vm5 = vweird.f32 %v1625_v46  ;;  %v1635_v11 = vand.u32 2147483647, %v1625_v46 }
 0x90e   :  { %v1582_v51 = vsub.f32 1.0, %v1581_v47 }
 0x90f   :  { %v1638_v14 = vor.u32 1.1754944e-38, %v1637_v9  ;;  %vm1636_vm7 = vcmp.eq.f32.partialorder %v1635_v11, 8.507059e+37 }
 0x910   :  { %v1583_v53 = vmul.f32 %v2529_v45, %v1582_v51 }
 0x912   :  { %v1584_v57 = vadd.f32 %v2529_v45, %v1583_v53 }
 0x913   :  { %v2531_v52 = vpop.eup %2530 }
 0x914   :  { %v1627_v55 = vmul.f32 %v2531_v52, %v1625_v46  ;;  %v1588_v62 = vsel %vm1587_vm15, %v2529_v45, %v1584_v57  ;;  %vm1632_vm4 = vweird.f32 %v2531_v52 }
 0x915   :  { %v1593_v4 = vsel %vm1590_vm3, %v1592_v63, %v1588_v62  ;;  %vm1633_vm6 = vmor %vm1631_vm5, %vm1632_vm4 }
 0x916   :  { %v1628_v60 = vsub.f32 1.0, %v1627_v55 }
 0x918   :  { %v1629_v1 = vmul.f32 %v2531_v52, %v1628_v60 }
 0x91a   :  { %v1630_v6 = vadd.f32 %v2531_v52, %v1629_v1 }
 0x91c   :  { %v1634_v12 = vsel %vm1633_vm6, %v2531_v52, %v1630_v6 }
 0x91d   :  { %v1639_v15 = vsel %vm1636_vm7, %v1638_v14, %v1634_v12 }
 0x951   :  { %v1656_v2 = vpop.permute.xlu0 %1655 }
 0x952   :  { %v3055_v5 = vmul.f32 %v1656_v2, %v1593_v4 }
 0x954   :  { %1677 = vst.msk [vmem:[#allocation2] sm:$0x3] %vm188_vm0, %v3055_v5 }
 0x95b   :  { %v1674_v16 = vpop.permute.xlu2 %1673  ;;  %v1707_v17 = vld [vmem:[#allocation2] sm:$0x3] }
 0x95c   :  { %v3059_v20 = vmul.f32 %v1674_v16, %v1639_v15  ;;  %v1711_v22 = vpack.c.bf16 %v1707_v17, %v1707_v17 }
 0x95e   :  { %1685 = vst.msk [vmem:[#allocation4] sm:$0x3] %vm188_vm0, %v3059_v20  ;;  %2350 = vmatmul.msk.bf16.vlgmr.msra.gmra.mxu0 %vm253_vm1, %v1711_v22  ;;  %2351 = vmatmul.msk.bf16.vlgmr.msra.gmra.mxu1 %vm253_vm1, %v1711_v22 }
 0x963   :  { %v1682_v23 = vpop.permute.xlu2 %1681 }
 0x964   :  { %1684 = vst.msk [vmem:[#allocation3] sm:$0x3] %vm188_vm0, %v1682_v23 }
 0x965   :  { %v1708_v24 = vld [vmem:[#allocation4] sm:$0x3] }
 0x966   :  { %v1749_v27 = vpack.c.bf16 %v1708_v24, %v1708_v24 }
 0x968   :  { %2352 = vmatmul.msk.bf16.vlgmr.msra.gmra.mxu2 %vm253_vm1, %v1749_v27  ;;  %2353 = vmatmul.msk.bf16.vlgmr.msra.gmra.mxu3 %vm253_vm1, %v1749_v27 }
 0x96b   :  { %v1877_v31 = vld [vmem:[#allocation3] sm:$0x3] }
 0x96c   :  { %1879 = vrot.lane.b32.xlu2 %v1877_v31, %s2581_s2 }
 0x974   :  { %v1690_v32 = vpop.permute.xlu1 %1689 }
 0x975   :  { %1692 = vst.msk [vmem:[#allocation5] sm:$0x3] %vm188_vm0, %v1690_v32 }
 0x97c   :  { %v1895_v33 = vld [vmem:[#allocation5] sm:$0x3] }
 0x97d   :  { %1897 = vrot.lane.b32.xlu0 %v1895_v33, %s2581_s2 }
 0x9c6   :  { %v1880_v33 = vpop.permute.xlu2 %1879 }
 0x9db   :  { %v1724_v7 = vpop.f32.mrf.mxu0  ;;  %v1737_v10 = vpop.f32.mrf.mxu1 }
 0x9dc   :  { %v1743_v13 = vrot.slane %v1737_v10, 6 }
 0x9de   :  { %v1744_v25 = vsel %vm286_vm2, %v1724_v7, %v1743_v13 }
 0x9df   :  { %v1746_v29 = vadd.f32 %v1744_v25, %v1710_v21 }
 0x9e1   :  { %1808 = vrot.lane.b32.xlu2 %v1746_v29, %s2581_s2  ;;  %v2354_v30 = vmul.f32 -1.442695, %v1746_v29  ;;  %v1805_v45 = vrot.slane %v1746_v29, 2 }
 0x9e3   :  { %2532 = vpow2.f32 %v2354_v30  ;;  %v1726_v34 = vpop.f32.mrf.mxu0  ;;  %v1739_v39 = vpop.f32.mrf.mxu1 }
 0x9e9   :  { %v2533_v40 = vpop.eup %2532 }
 0x9ea   :  { %v1788_v41 = vadd.f32 1.0, %v2533_v40 }
 0x9eb   :  { %v1762_v42 = vpop.f32.mrf.mxu2  ;;  %v1775_v48 = vpop.f32.mrf.mxu3 }
 0x9ec   :  { %2534 = vrcp.f32 %v1788_v41  ;;  %v1781_v35 = vrot.slane %v1775_v48, 6  ;;  %v1800_v55 = vand.u32 2147483648, %v1788_v41  ;;  %v1798_v57 = vand.u32 2147483647, %v1788_v41 }
 0x9ed   :  { %vm1794_vm9 = vweird.f32 %v1788_v41 }
 0x9ee   :  { %v1782_v37 = vsel %vm286_vm2, %v1762_v42, %v1781_v35  ;;  %v1801_v63 = vor.u32 1.1754944e-38, %v1800_v55  ;;  %vm1799_vm11 = vcmp.eq.f32.partialorder %v1798_v57, 8.507059e+37 }
 0x9ef   :  { %v1784_v38 = vadd.f32 %v1782_v37, %v1748_v50  ;;  %v1898_v32 = vpop.permute.xlu0 %1897 }
 0x9f1   :  { %v2356_v43 = vmul.f32 -1.442695, %v1784_v38  ;;  %v1851_v9 = vrot.slane %v1784_v38, 2 }
 0x9f2   :  { %v2535_v44 = vpop.eup %2534 }
 0x9f3   :  { %2536 = vpow2.f32 %v2356_v43  ;;  %v1764_v46 = vpop.f32.mrf.mxu2  ;;  %v1777_v47 = vpop.f32.mrf.mxu3  ;;  %v1790_v51 = vmul.f32 %v2535_v44, %v1788_v41  ;;  %vm1795_vm8 = vweird.f32 %v2535_v44 }
 0x9f4   :  { %2538 = vtanh.f32 %v1805_v45  ;;  %vm1796_vm10 = vmor %vm1794_vm9, %vm1795_vm8 }
 0x9f5   :  { %v1791_v52 = vsub.f32 1.0, %v1790_v51 }
 0x9f7   :  { %v1792_v53 = vmul.f32 %v2535_v44, %v1791_v52 }
 0x9f9   :  { %v2537_v58 = vpop.eup %2536  ;;  %v1793_v59 = vadd.f32 %v2535_v44, %v1792_v53 }
 0x9fa   :  { %v1834_v60 = vadd.f32 1.0, %v2537_v58  ;;  %v2539_v1 = vpop.eup %2538 }
 0x9fb   :  { %v1797_v62 = vsel %vm1796_vm10, %v2535_v44, %v1793_v59 }
 0x9fc   :  { %2540 = vrcp.f32 %v1834_v60  ;;  %v1802_v2 = vsel %vm1799_vm11, %v1801_v63, %v1797_v62  ;;  %v1846_v14 = vand.u32 2147483648, %v1834_v60  ;;  %v1844_v16 = vand.u32 2147483647, %v1834_v60 }
 0x9fd   :  { %v1883_v4 = vmul.f32 %v2539_v1, %v1802_v2  ;;  %2542 = vtanh.f32 %v1851_v9  ;;  %vm1840_vm13 = vweird.f32 %v1834_v60  ;;  %v1882_v19 = vmul.f32 %v1880_v33, %v1802_v2 }
 0x9fe   :  { %v1847_v22 = vor.u32 1.1754944e-38, %v1846_v14  ;;  %vm1845_vm15 = vcmp.eq.f32.partialorder %v1844_v16, 8.507059e+37 }
 0x9ff   :  { %1885 = vrot.lane.b32.xlu0 %v1883_v4, %s2581_s2 }
 0xa02   :  { %v2541_v6 = vpop.eup %2540 }
 0xa03   :  { %v1836_v11 = vmul.f32 %v2541_v6, %v1834_v60  ;;  %vm1841_vm12 = vweird.f32 %v2541_v6  ;;  %v2543_v24 = vpop.eup %2542 }
 0xa04   :  { %vm1842_vm14 = vmor %vm1840_vm13, %vm1841_vm12 }
 0xa05   :  { %v1837_v12 = vsub.f32 1.0, %v1836_v11 }
 0xa07   :  { %v1838_v15 = vmul.f32 %v2541_v6, %v1837_v12 }
 0xa09   :  { %v1839_v17 = vadd.f32 %v2541_v6, %v1838_v15 }
 0xa0b   :  { %v1843_v23 = vsel %vm1842_vm14, %v2541_v6, %v1839_v17 }
 0xa0c   :  { %v1848_v27 = vsel %vm1845_vm15, %v1847_v22, %v1843_v23 }
 0xa0d   :  { %v1901_v31 = vmul.f32 %v2543_v24, %v1848_v27  ;;  %v1900_v21 = vmul.f32 %v1898_v32, %v1848_v27 }
 0xa0f   :  { %1903 = vrot.lane.b32.xlu1 %v1901_v31, %s2581_s2 }
 0xa17   :  { %1854 = vrot.lane.b32.xlu1 %v1784_v38, %s2581_s2 }
 0xa3b   :  { %v1809_v39 = vpop.permute.xlu2 %1808 }
 0xa3c   :  { %v1810_v40 = vrot.slane %v1809_v39, 2 }
 0xa3e   :  { %v2355_v41 = vmul.f32 -1.442695, %v1810_v40 }
 0xa71   :  { %v1886_v3 = vpop.permute.xlu0 %1885 }
 0xa72   :  { %v1888_v7 = vadd.f32 %v1886_v3, %v1882_v19  ;;  %v43_v19 = vld [vmem:[%s3231_s0 + $0x38] sm:$0xf]  ;;  %v2219_v3 = vld [vmem:[%s3232_s1 + $0x4] sm:$0xf]  ;;  %s2582_s0 = smov 96  }
 0xa73   :  { %44 = vst [vmem:[#allocation6 + $0x1c] sm:$0xf] %v43_v19 }
 0xa74   :  { %2544 = vtanh.f32 %v1888_v7  ;;  %1915 = vst [vmem:[#allocation1] ss:$4 sm:$0xff] %v1888_v7 }
 0xa75   :  { %107 = vst [vmem:[#allocation7] sm:$0xf] %v2219_v3 }
 0xa7a   :  { %v2545_v10 = vpop.eup %2544 }
 0xa7b   :  { %1891 = vrot.lane.b32.xlu1 %v2545_v10, %s2581_s2  ;;  %v1916_v13 = vld.sshfl [vmem:[#allocation1] sm:$0xff pattern:$0x73625140] }
 0xa7c   :  { %1917 = vrot.lane.b32.xlu2 %v1916_v13, %s2581_s2 }
 0xa81   :  { %v1904_v25 = vpop.permute.xlu1 %1903 }
 0xa82   :  { %v1906_v29 = vadd.f32 %v1904_v25, %v1900_v21  ;;  %v1946_v21 = vld [vmem:[#allocation6 + $0x1c] sm:$0xf] }
 0xa84   :  { %2546 = vtanh.f32 %v1906_v29  ;;  %1923 = vst [vmem:[#allocation1] ss:$4 sm:$0xff] %v1906_v29 }
 0xa85   :  { %2548 = vpow2.f32 %v2355_v41 }
 0xa89   :  { %v1855_v42 = vpop.permute.xlu1 %1854 }
 0xa8a   :  { %v2547_v30 = vpop.eup %2546  ;;  %v1856_v50 = vrot.slane %v1855_v42, 2 }
 0xa8b   :  { %1909 = vrot.lane.b32.xlu0 %v2547_v30, %s2581_s2  ;;  %v1924_v34 = vld.sshfl [vmem:[#allocation1] sm:$0xff pattern:$0x73625140]  ;;  %v2549_v48 = vpop.eup %2548 }
 0xa8c   :  { %v1815_v35 = vadd.f32 1.0, %v2549_v48  ;;  %v2357_v37 = vmul.f32 -1.442695, %v1856_v50 }
 0xa8e   :  { %2550 = vrcp.f32 %v1815_v35  ;;  %v1827_v57 = vand.u32 2147483648, %v1815_v35  ;;  %vm1821_vm4 = vweird.f32 %v1815_v35  ;;  %v1825_v58 = vand.u32 2147483647, %v1815_v35 }
 0xa8f   :  { %2552 = vpow2.f32 %v2357_v37 }
 0xa90   :  { %v1828_v62 = vor.u32 1.1754944e-38, %v1827_v57  ;;  %vm1826_vm6 = vcmp.eq.f32.partialorder %v1825_v58, 8.507059e+37 }
 0xa93   :  { %1925 = vrot.lane.b32.xlu0 %v1924_v34, %s2581_s2 }
 0xa94   :  { %v2551_v43 = vpop.eup %2550 }
 0xa95   :  { %v2553_v44 = vpop.eup %2552  ;;  %v1817_v45 = vmul.f32 %v2551_v43, %v1815_v35  ;;  %vm1822_vm3 = vweird.f32 %v2551_v43  ;;  %v1983_v35 = vld [vmem:[#allocation7] sm:$0xf] }
 0xa96   :  { %v1861_v46 = vadd.f32 1.0, %v2553_v44  ;;  %vm1823_vm5 = vmor %vm1821_vm4, %vm1822_vm3  ;;  %vm518_vm4 = vcmask 254976  }
 0xa97   :  { %v1818_v51 = vsub.f32 1.0, %v1817_v45 }
 0xa98   :  { %2554 = vrcp.f32 %v1861_v46  ;;  %v1873_v11 = vand.u32 2147483648, %v1861_v46  ;;  %vm1867_vm8 = vweird.f32 %v1861_v46  ;;  %v1871_v14 = vand.u32 2147483647, %v1861_v46 }
 0xa99   :  { %v1819_v52 = vmul.f32 %v2551_v43, %v1818_v51 }
 0xa9a   :  { %v1874_v17 = vor.u32 1.1754944e-38, %v1873_v11  ;;  %vm1872_vm10 = vcmp.eq.f32.partialorder %v1871_v14, 8.507059e+37 }
 0xa9b   :  { %v1820_v55 = vadd.f32 %v2551_v43, %v1819_v52 }
 0xa9d   :  { %v1824_v60 = vsel %vm1823_vm5, %v2551_v43, %v1820_v55 }
 0xa9e   :  { %v2555_v53 = vpop.eup %2554  ;;  %v1829_v63 = vsel %vm1826_vm6, %v1828_v62, %v1824_v60 }
 0xa9f   :  { %v1863_v59 = vmul.f32 %v2555_v53, %v1861_v46  ;;  %vm1868_vm7 = vweird.f32 %v2555_v53 }
 0xaa0   :  { %vm1869_vm9 = vmor %vm1867_vm8, %vm1868_vm7 }
 0xaa1   :  { %v1864_v2 = vsub.f32 1.0, %v1863_v59 }
 0xaa3   :  { %v1865_v6 = vmul.f32 %v2555_v53, %v1864_v2 }
 0xaa5   :  { %v1866_v9 = vadd.f32 %v2555_v53, %v1865_v6 }
 0xaa7   :  { %v1870_v16 = vsel %vm1869_vm9, %v2555_v53, %v1866_v9 }
 0xaa8   :  { %v1875_v23 = vsel %vm1872_vm10, %v1874_v17, %v1870_v16 }
 0xad6   :  { %v1918_v38 = vpop.permute.xlu2 %1917 }
 0xad7   :  { %1920 = vst.msk [vmem:[#allocation3] sm:$0x3] %vm188_vm0, %v1918_v38 }
 0xade   :  { %v2112_v47 = vld [vmem:[#allocation3] sm:$0x3] }
 0xadf   :  { %2114 = vrot.lane.b32.xlu1 %v2112_v47, %s2581_s2 }
 0xaed   :  { %v1892_v1 = vpop.permute.xlu1 %1891 }
 0xaee   :  { %v3089_v4 = vmul.f32 %v1892_v1, %v1829_v63 }
 0xaf0   :  { %1913 = vst.msk [vmem:[#allocation2] sm:$0x3] %vm188_vm0, %v3089_v4 }
 0xaf7   :  { %v1943_v12 = vld [vmem:[#allocation2] sm:$0x3] }
 0xaf8   :  { %v1947_v15 = vpack.c.bf16 %v1943_v12, %v1943_v12 }
 0xafa   :  { %2360 = vmatmul.msk.bf16.vlgmr.msrb.gmra.mxu0 %vm253_vm1, %v1947_v15  ;;  %2361 = vmatmul.msk.bf16.vlgmr.msrb.gmra.mxu1 %vm253_vm1, %v1947_v15 }
 0xafd   :  { %v1910_v22 = vpop.permute.xlu0 %1909 }
 0xafe   :  { %v3095_v24 = vmul.f32 %v1910_v22, %v1875_v23 }
 0xb00   :  { %1921 = vst.msk [vmem:[#allocation4] sm:$0x3] %vm188_vm0, %v3095_v24 }
 0xb05   :  { %v1926_v27 = vpop.permute.xlu0 %1925 }
 0xb06   :  { %1928 = vst.msk [vmem:[#allocation5] sm:$0x3] %vm188_vm0, %v1926_v27 }
 0xb07   :  { %v1944_v31 = vld [vmem:[#allocation4] sm:$0x3] }
 0xb08   :  { %v1984_v32 = vpack.c.bf16 %v1944_v31, %v1944_v31 }
 0xb0a   :  { %2362 = vmatmul.msk.bf16.vlgmr.msrb.gmra.mxu2 %vm253_vm1, %v1984_v32  ;;  %2363 = vmatmul.msk.bf16.vlgmr.msrb.gmra.mxu3 %vm253_vm1, %v1984_v32 }
 0xb0d   :  { %v2130_v33 = vld [vmem:[#allocation5] sm:$0x3] }
 0xb0e   :  { %2132 = vrot.lane.b32.xlu2 %v2130_v33, %s2581_s2 }
 0xb51   :  { %v2115_v19 = vpop.permute.xlu1 %2114 }
 0xb77   :  { %v1960_v7 = vpop.f32.mrf.mxu0  ;;  %v1973_v10 = vpop.f32.mrf.mxu1 }
 0xb78   :  { %v1979_v13 = vrot.slane %v1973_v10, 6 }
 0xb7a   :  { %v1980_v25 = vsel %vm286_vm2, %v1960_v7, %v1979_v13 }
 0xb7b   :  { %v1982_v29 = vadd.f32 %v1980_v25, %v1946_v21 }
 0xb7d   :  { %2043 = vrot.lane.b32.xlu2 %v1982_v29, %s2581_s2  ;;  %v2364_v30 = vmul.f32 -1.442695, %v1982_v29  ;;  %v2040_v38 = vrot.slane %v1982_v29, 2 }
 0xb7f   :  { %2556 = vpow2.f32 %v2364_v30  ;;  %v1962_v34 = vpop.f32.mrf.mxu0  ;;  %v1975_v39 = vpop.f32.mrf.mxu1 }
 0xb80   :  { %v2133_v30 = vpop.permute.xlu2 %2132 }
 0xb85   :  { %v2557_v40 = vpop.eup %2556 }
 0xb86   :  { %v2023_v41 = vadd.f32 1.0, %v2557_v40 }
 0xb88   :  { %2558 = vrcp.f32 %v2023_v41  ;;  %v2035_v47 = vand.u32 2147483648, %v2023_v41  ;;  %v2033_v53 = vand.u32 2147483647, %v2023_v41  ;;  %vm2029_vm11 = vweird.f32 %v2023_v41 }
 0xb89   :  { %2560 = vtanh.f32 %v2040_v38 }
 0xb8a   :  { %v2036_v59 = vor.u32 1.1754944e-38, %v2035_v47  ;;  %vm2034_vm13 = vcmp.eq.f32.partialorder %v2033_v53, 8.507059e+37 }
 0xb8d   :  { %v1997_v42 = vpop.f32.mrf.mxu2  ;;  %v2010_v48 = vpop.f32.mrf.mxu3 }
 0xb8e   :  { %v2016_v50 = vrot.slane %v2010_v48, 6  ;;  %v2559_v37 = vpop.eup %2558 }
 0xb8f   :  { %v2025_v43 = vmul.f32 %v2559_v37, %v2023_v41  ;;  %vm2030_vm1 = vweird.f32 %v2559_v37  ;;  %v2561_v62 = vpop.eup %2560 }
 0xb90   :  { %v2017_v44 = vsel %vm286_vm2, %v1997_v42, %v2016_v50  ;;  %vm2031_vm12 = vmor %vm2029_vm11, %vm2030_vm1 }
 0xb91   :  { %v2019_v45 = vadd.f32 %v2017_v44, %v1983_v35  ;;  %v2026_v46 = vsub.f32 1.0, %v2025_v43 }
 0xb93   :  { %v2366_v51 = vmul.f32 -1.442695, %v2019_v45  ;;  %v2027_v52 = vmul.f32 %v2559_v37, %v2026_v46  ;;  %v2086_v11 = vrot.slane %v2019_v45, 2 }
 0xb95   :  { %v1999_v55 = vpop.f32.mrf.mxu2  ;;  %v2012_v57 = vpop.f32.mrf.mxu3  ;;  %2562 = vpow2.f32 %v2366_v51  ;;  %v2028_v58 = vadd.f32 %v2559_v37, %v2027_v52 }
 0xb97   :  { %v2032_v60 = vsel %vm2031_vm12, %v2559_v37, %v2028_v58 }
 0xb98   :  { %v2037_v63 = vsel %vm2034_vm13, %v2036_v59, %v2032_v60 }
 0xb99   :  { %v2118_v1 = vmul.f32 %v2561_v62, %v2037_v63  ;;  %v2117_v3 = vmul.f32 %v2115_v19, %v2037_v63 }
 0xb9b   :  { %v2563_v2 = vpop.eup %2562  ;;  %2120 = vrot.lane.b32.xlu0 %v2118_v1, %s2581_s2 }
 0xb9c   :  { %v2069_v6 = vadd.f32 1.0, %v2563_v2 }
 0xb9e   :  { %2564 = vrcp.f32 %v2069_v6  ;;  %v2081_v15 = vand.u32 2147483648, %v2069_v6  ;;  %v2079_v17 = vand.u32 2147483647, %v2069_v6  ;;  %vm2075_vm14 = vweird.f32 %v2069_v6 }
 0xb9f   :  { %2566 = vtanh.f32 %v2086_v11 }
 0xba0   :  { %v2082_v23 = vor.u32 1.1754944e-38, %v2081_v15  ;;  %vm2080_vm3 = vcmp.eq.f32.partialorder %v2079_v17, 8.507059e+37 }
 0xba3   :  { %2089 = vrot.lane.b32.xlu0 %v2019_v45, %s2581_s2 }
 0xba4   :  { %v2565_v9 = vpop.eup %2564 }
 0xba5   :  { %v2071_v12 = vmul.f32 %v2565_v9, %v2069_v6  ;;  %vm2076_vm2 = vweird.f32 %v2565_v9  ;;  %v2567_v31 = vpop.eup %2566 }
 0xba6   :  { %vm2077_vm15 = vmor %vm2075_vm14, %vm2076_vm2 }
 0xba7   :  { %v2072_v14 = vsub.f32 1.0, %v2071_v12 }
 0xba9   :  { %v2073_v16 = vmul.f32 %v2565_v9, %v2072_v14 }
 0xbab   :  { %v2074_v22 = vadd.f32 %v2565_v9, %v2073_v16  ;;  %514 = vrot.lane.b32.xlu0 %v2819_v54, %s2582_s0 }
 0xbad   :  { %v2078_v27 = vsel %vm2077_vm15, %v2565_v9, %v2074_v22 }
 0xbae   :  { %v2083_v32 = vsel %vm2080_vm3, %v2082_v23, %v2078_v27 }
 0xbaf   :  { %v2136_v33 = vmul.f32 %v2567_v31, %v2083_v32  ;;  %v2135_v34 = vmul.f32 %v2133_v30, %v2083_v32 }
 0xbb1   :  { %2138 = vrot.lane.b32.xlu1 %v2136_v33, %s2581_s2 }
 0xbb3   :  { %757 = vrot.lane.b32.xlu0 %v2871_v0, %s2582_s0 }
 0xbbb   :  { %1222 = vrot.lane.b32.xlu0 %v2975_v61, %s2582_s0 }
 0xbc3   :  { %1465 = vrot.lane.b32.xlu0 %v3011_v26, %s2582_s0 }
 0xbcb   :  { %1930 = vrot.lane.b32.xlu0 %v3089_v4, %s2582_s0 }
 0xc0d   :  { %v2121_v7 = vpop.permute.xlu0 %2120 }
 0xc0e   :  { %v2123_v10 = vadd.f32 %v2121_v7, %v2117_v3 }
 0xc10   :  { %2568 = vtanh.f32 %v2123_v10  ;;  %2150 = vst [vmem:[#allocation1] ss:$4 sm:$0xff] %v2123_v10 }
 0xc15   :  { %v2090_v13 = vpop.permute.xlu0 %2089 }
 0xc16   :  { %v2569_v21 = vpop.eup %2568  ;;  %v2091_v43 = vrot.slane %v2090_v13, 2 }
 0xc17   :  { %2126 = vrot.lane.b32.xlu1 %v2569_v21, %s2581_s2  ;;  %v2151_v41 = vld.sshfl [vmem:[#allocation1] sm:$0xff pattern:$0x73625140] }
 0xc1d   :  { %v515_v25 = vpop.permute.xlu0 %514 }
 0xc1e   :  { %v517_v29 = vmul.f32 %v515_v25, %v2819_v54 }
 0xc1f   :  { %521 = vrot.lane.b32.xlu1 %v2815_v49, %s2582_s0 }
 0xc20   :  { %519 = vst.msk [vmem:[%s3235_s4] sm:$0x3] %vm518_vm4, %v517_v29 }
 0xc23   :  { %v2139_v39 = vpop.permute.xlu1 %2138 }
 0xc24   :  { %v2141_v40 = vadd.f32 %v2139_v39, %v2135_v34 }
 0xc25   :  { %v758_v42 = vpop.permute.xlu0 %757 }
 0xc26   :  { %2570 = vtanh.f32 %v2141_v40  ;;  %2158 = vst [vmem:[#allocation1] ss:$4 sm:$0xff] %v2141_v40  ;;  %v760_v48 = vmul.f32 %v758_v42, %v2871_v0 }
 0xc27   :  { %986 = vrot.lane.b32.xlu1 %v2926_v28, %s2582_s0 }
 0xc28   :  { %2309 = vst.msk [vmem:[%s3236_s5 + $0xc] sm:$0x3] %vm518_vm4, %v760_v48 }
 0xc2c   :  { %v2571_v54 = vpop.eup %2570 }
 0xc2d   :  { %2144 = vrot.lane.b32.xlu2 %v2571_v54, %s2581_s2  ;;  %v1223_v50 = vpop.permute.xlu0 %1222  ;;  %v2159_v13 = vld.sshfl [vmem:[#allocation1] sm:$0xff pattern:$0x73625140] }
 0xc2e   :  { %v1225_v35 = vmul.f32 %v1223_v50, %v2975_v61 }
 0xc2f   :  { %1229 = vrot.lane.b32.xlu1 %v2959_v36, %s2582_s0 }
 0xc30   :  { %2328 = vst.msk [vmem:[%s3235_s4 + $0x6] sm:$0x3] %vm518_vm4, %v1225_v35 }
 0xc35   :  { %750 = vrot.lane.b32.xlu2 %v2863_v56, %s2582_s0  ;;  %v1466_v0 = vpop.permute.xlu0 %1465 }
 0xc36   :  { %v1468_v37 = vmul.f32 %v1466_v0, %v3011_v26  ;;  %v2044_v26 = vpop.permute.xlu2 %2043 }
 0xc37   :  { %1694 = vrot.lane.b32.xlu1 %v3055_v5, %s2582_s0  ;;  %v2045_v44 = vrot.slane %v2044_v26, 2 }
 0xc38   :  { %2339 = vst.msk [vmem:[%s3236_s5 + $0x6] sm:$0x3] %vm518_vm4, %v1468_v37 }
 0xc39   :  { %v2365_v45 = vmul.f32 -1.442695, %v2045_v44 }
 0xc3d   :  { %993 = vrot.lane.b32.xlu2 %v2911_v8, %s2582_s0  ;;  %v1931_v61 = vpop.permute.xlu0 %1930 }
 0xc3e   :  { %v1933_v38 = vmul.f32 %v1931_v61, %v3089_v4  ;;  %v2367_v4 = vmul.f32 -1.442695, %v2091_v43 }
 0xc3f   :  { %1937 = vrot.lane.b32.xlu1 %v3095_v24, %s2582_s0 }
 0xc40   :  { %2358 = vst.msk [vmem:[%s3235_s4 + $0xc] sm:$0x3] %vm518_vm4, %v1933_v38  ;;  %2572 = vpow2.f32 %v2367_v4 }
 0xc41   :  { %2574 = vpow2.f32 %v2365_v45 }
 0xc45   :  { %1458 = vrot.lane.b32.xlu2 %v3007_v18, %s2582_s0 }
 0xc46   :  { %v2573_v46 = vpop.eup %2572 }
 0xc47   :  { %2152 = vrot.lane.b32.xlu1 %v2151_v41, %s2581_s2  ;;  %v2575_v47 = vpop.eup %2574  ;;  %v2096_v51 = vadd.f32 1.0, %v2573_v46 }
 0xc48   :  { %v2050_v52 = vadd.f32 1.0, %v2575_v47 }
 0xc49   :  { %2576 = vrcp.f32 %v2096_v51  ;;  %v2108_v2 = vand.u32 2147483648, %v2096_v51  ;;  %vm2102_vm6 = vweird.f32 %v2096_v51  ;;  %v2106_v6 = vand.u32 2147483647, %v2096_v51 }
 0xc4a   :  { %2578 = vrcp.f32 %v2050_v52  ;;  %v2062_v12 = vand.u32 2147483648, %v2050_v52  ;;  %vm2056_vm9 = vweird.f32 %v2050_v52  ;;  %v2060_v15 = vand.u32 2147483647, %v2050_v52 }
 0xc4b   :  { %v2109_v14 = vor.u32 1.1754944e-38, %v2108_v2  ;;  %vm2107_vm10 = vcmp.eq.f32.partialorder %v2106_v6, 8.507059e+37 }
 0xc4c   :  { %v2063_v27 = vor.u32 1.1754944e-38, %v2062_v12  ;;  %vm2061_vm11 = vcmp.eq.f32.partialorder %v2060_v15, 8.507059e+37 }
 0xc4d   :  { %1701 = vrot.lane.b32.xlu2 %v3059_v20, %s2582_s0 }
 0xc4f   :  { %v2577_v53 = vpop.eup %2576 }
 0xc50   :  { %v2579_v55 = vpop.eup %2578  ;;  %v2098_v57 = vmul.f32 %v2577_v53, %v2096_v51  ;;  %vm2103_vm5 = vweird.f32 %v2577_v53 }
 0xc51   :  { %v2052_v58 = vmul.f32 %v2579_v55, %v2050_v52  ;;  %vm2104_vm7 = vmor %vm2102_vm6, %vm2103_vm5  ;;  %vm2057_vm8 = vweird.f32 %v2579_v55 }
 0xc52   :  { %v2099_v59 = vsub.f32 1.0, %v2098_v57  ;;  %vm2058_vm1 = vmor %vm2056_vm9, %vm2057_vm8 }
 0xc53   :  { %v2053_v60 = vsub.f32 1.0, %v2052_v58 }
 0xc54   :  { %v2100_v62 = vmul.f32 %v2577_v53, %v2099_v59 }
 0xc55   :  { %v2054_v63 = vmul.f32 %v2579_v55, %v2053_v60 }
 0xc56   :  { %v2101_v1 = vadd.f32 %v2577_v53, %v2100_v62 }
 0xc57   :  { %v2055_v9 = vadd.f32 %v2579_v55, %v2054_v63 }
 0xc58   :  { %v2105_v11 = vsel %vm2104_vm7, %v2577_v53, %v2101_v1 }
 0xc59   :  { %v2110_v16 = vsel %vm2107_vm10, %v2109_v14, %v2105_v11  ;;  %v2059_v22 = vsel %vm2058_vm1, %v2579_v55, %v2055_v9 }
 0xc5a   :  { %v2064_v31 = vsel %vm2061_vm11, %v2063_v27, %v2059_v22 }
 0xc87   :  { %v2145_v17 = vpop.permute.xlu2 %2144 }
 0xc88   :  { %v2147_v23 = vmul.f32 %v2145_v17, %v2110_v16 }
 0xc89   :  { %v2127_v32 = vpop.permute.xlu1 %2126 }
 0xc8a   :  { %2156 = vst.msk [vmem:[#allocation4] sm:$0x3] %vm188_vm0, %v2147_v23  ;;  %2172 = vrot.lane.b32.xlu0 %v2147_v23, %s2582_s0  ;;  %v2129_v33 = vmul.f32 %v2127_v32, %v2064_v31 }
 0xc8c   :  { %2148 = vst.msk [vmem:[#allocation2] sm:$0x3] %vm188_vm0, %v2129_v33  ;;  %2165 = vrot.lane.b32.xlu2 %v2129_v33, %s2582_s0 }
 0xc8f   :  { %v751_v19 = vpop.permute.xlu2 %750 }
 0xc90   :  { %v753_v3 = vmul.f32 %v751_v19, %v2863_v56 }
 0xc91   :  { %v522_v7 = vpop.permute.xlu1 %521 }
 0xc92   :  { %2308 = vst.msk [vmem:[%s3235_s4 + $0x2] sm:$0x3] %vm518_vm4, %v753_v3  ;;  %v524_v10 = vmul.f32 %v522_v7, %v2815_v49 }
 0xc94   :  { %2299 = vst.msk [vmem:[%s3236_s5 + $0xe] sm:$0x3] %vm518_vm4, %v524_v10  ;;  %2160 = vrot.lane.b32.xlu2 %v2159_v13, %s2581_s2 }
 0xc97   :  { %v994_v21 = vpop.permute.xlu2 %993 }
 0xc98   :  { %v996_v25 = vmul.f32 %v994_v21, %v2911_v8 }
 0xc99   :  { %v987_v56 = vpop.permute.xlu1 %986 }
 0xc9a   :  { %2319 = vst.msk [vmem:[%s3236_s5 + $0xa] sm:$0x3] %vm518_vm4, %v996_v25  ;;  %v989_v29 = vmul.f32 %v987_v56, %v2926_v28 }
 0xc9c   :  { %2318 = vst.msk [vmem:[%s3235_s4 + $0x4] sm:$0x3] %vm518_vm4, %v989_v29 }
 0xc9f   :  { %v1459_v49 = vpop.permute.xlu2 %1458 }
 0xca0   :  { %v1461_v30 = vmul.f32 %v1459_v49, %v3007_v18 }
 0xca1   :  { %v1230_v8 = vpop.permute.xlu1 %1229 }
 0xca2   :  { %2338 = vst.msk [vmem:[%s3235_s4 + $0x8] sm:$0x3] %vm518_vm4, %v1461_v30  ;;  %v1232_v34 = vmul.f32 %v1230_v8, %v2959_v36 }
 0xca4   :  { %2329 = vst.msk [vmem:[%s3236_s5 + $0x8] sm:$0x3] %vm518_vm4, %v1232_v34 }
 0xca7   :  { %v1702_v28 = vpop.permute.xlu2 %1701 }
 0xca8   :  { %v1704_v39 = vmul.f32 %v1702_v28, %v3059_v20 }
 0xca9   :  { %v1695_v18 = vpop.permute.xlu1 %1694 }
 0xcaa   :  { %2349 = vst.msk [vmem:[%s3236_s5 + $0x4] sm:$0x3] %vm518_vm4, %v1704_v39  ;;  %v1697_v40 = vmul.f32 %v1695_v18, %v3055_v5 }
 0xcac   :  { %2348 = vst.msk [vmem:[%s3235_s4 + $0xa] sm:$0x3] %vm518_vm4, %v1697_v40 }
 0xcb1   :  { %v1938_v36 = vpop.permute.xlu1 %1937 }
 0xcb2   :  { %v1940_v41 = vmul.f32 %v1938_v36, %v3095_v24 }
 0xcb4   :  { %2359 = vst.msk [vmem:[%s3236_s5 + $0x2] sm:$0x3] %vm518_vm4, %v1940_v41 }
 0xcb9   :  { %v2153_v20 = vpop.permute.xlu1 %2152 }
 0xcba   :  { %2155 = vst.msk [vmem:[#allocation3] sm:$0x3] %vm188_vm0, %v2153_v20 }
 0xce6   :  { %v2166_v42 = vpop.permute.xlu2 %2165 }
 0xce7   :  { %v2168_v48 = vmul.f32 %v2166_v42, %v2129_v33 }
 0xce9   :  { %2368 = vst.msk [vmem:[%s3235_s4 + $0xe] sm:$0x3] %vm518_vm4, %v2168_v48 }
 0xcee   :  { %v2161_v5 = vpop.permute.xlu2 %2160 }
 0xcef   :  { %2163 = vst.msk [vmem:[#allocation5] sm:$0x3] %vm188_vm0, %v2161_v5 }
 0xcfc   :  { %v2173_v54 = vpop.permute.xlu0 %2172 }
 0xcfd   :  { %v2175_v24 = vmul.f32 %v2173_v54, %v2147_v23 }
 0xcff   :  { %2176 = vst.msk [vmem:[%s3236_s5] sm:$0x3] %vm518_vm4, %v2175_v24 }

</bundles_post_ra>
